<compile_context>
chip_gen: v7x
topology: tpu7x:2x2x1
jax: 0.10.0
libtpu: 0.0.40
codegen_flags: <defaults>
</compile_context>

<pallas_src>
import functools

import numpy as np
import jax
import jax.numpy as jnp
from jax.experimental import pallas as pl
from jax.experimental.pallas import tpu as pltpu  # noqa: F401  (TPU backend)

LEAKY_SLOPE = 0.01   # torch.nn.LeakyReLU default negative_slope
BN_EPS = 1e-5        # torch.nn.BatchNorm2d default eps


# ------------------------------ in-kernel math ------------------------------ #

def _leaky_relu(x):
    return jnp.where(x >= 0.0, x, LEAKY_SLOPE * x)


def _conv_banded(x, p_ref, b_ref, bias_ref):
    """3x3 reflect-padded conv as 3 banded matmuls.

    x:        (M_in,  W_in*Cin)          f32, row = n*H+h, lane = w*Cin+ci
    p_ref:    (3, M_out, M_in)           f32 0/1 row selection (dy tap, H-reflect, stride)
    b_ref:    (3, W_in*Cin, W_out*Cout)  bf16 block-banded weights (dx tap, W-reflect, stride)
    bias_ref: (1, W_out*Cout)            f32 bias tiled per output column
    returns   (M_out, W_out*Cout)        f32 pre-activation
    """
    xb = x.astype(jnp.bfloat16)
    acc = bias_ref[...]
    for dy in range(3):
        y = jnp.dot(xb, b_ref[dy], preferred_element_type=jnp.float32)
        acc = acc + jnp.dot(p_ref[dy], y, preferred_element_type=jnp.float32)
    return acc


def _batchnorm(z, gamma_l, beta_l, ggt, count):
    """Training-mode BatchNorm2d on the (M, W*C) layout.

    ggt is a (W*C, W*C) 0/1 'same-channel' matrix, so z @ ggt sums lanes over w
    within each channel; the axis-0 sum then yields per-channel batch stats
    already broadcast back to every lane of that channel.
    """
    inv_n = 1.0 / count
    sum_l = jnp.sum(jnp.dot(z, ggt, preferred_element_type=jnp.float32),
                    axis=0, keepdims=True)
    sumsq_l = jnp.sum(jnp.dot(z * z, ggt, preferred_element_type=jnp.float32),
                      axis=0, keepdims=True)
    mean_l = sum_l * inv_n
    var_l = jnp.maximum(sumsq_l * inv_n - mean_l * mean_l, 0.0)   # biased variance
    scale_l = gamma_l * jax.lax.rsqrt(var_l + BN_EPS)
    shift_l = beta_l - mean_l * scale_l
    return z * scale_l + shift_l


def _block_kernel(*refs, has_down, count):
    """[optional stride-2 conv] -> (conv3x3 -> LeakyReLU -> BN) x 2, all in VMEM."""
    if has_down:
        (x_ref, pd_ref, bd_ref, biasd_ref,
         p_ref, b1_ref, bias1_ref, g1_ref, be1_ref,
         b2_ref, bias2_ref, g2_ref, be2_ref, ggt_ref, o_ref) = refs
    else:
        (x_ref, p_ref, b1_ref, bias1_ref, g1_ref, be1_ref,
         b2_ref, bias2_ref, g2_ref, be2_ref, ggt_ref, o_ref) = refs

    x = x_ref[...]
    if has_down:
        # Encoder down-sample conv (no activation / BN).
        x = _conv_banded(x, pd_ref, bd_ref, biasd_ref)

    ggt = ggt_ref[...]
    z = _leaky_relu(_conv_banded(x, p_ref, b1_ref, bias1_ref))
    z = _batchnorm(z, g1_ref[...], be1_ref[...], ggt, count)
    z = _leaky_relu(_conv_banded(z, p_ref, b2_ref, bias2_ref))
    z = _batchnorm(z, g2_ref[...], be2_ref[...], ggt, count)
    o_ref[...] = z.astype(o_ref.dtype)


# ------------------------------ kernel wrapper ------------------------------ #

def _run_block(x2d, prep, *, shape, count, has_down):
    """One pallas_call for (optional downsample conv) + full Block."""
    n, hh, ww, cc = shape
    args = [x2d]
    if has_down:
        args += [prep["pd"], prep["bd"], prep["biasd"]]
    args += [prep["p"], prep["b1"], prep["bias1"], prep["g1"], prep["be1"],
             prep["b2"], prep["bias2"], prep["g2"], prep["be2"], prep["ggt"]]
    kernel = functools.partial(_block_kernel, has_down=has_down, count=count)
    return pl.pallas_call(
        kernel,
        out_shape=jax.ShapeDtypeStruct((n * hh, ww * cc), jnp.float32),
    )(*args)


# --------------------------- parameter preparation -------------------------- #

def _reflect(i, n):
    if i < 0:
        return -i
    if i >= n:
        return 2 * n - 2 - i
    return i


def _build_rowsel(n, h_in, h_out, stride):
    """(3, n*h_out, n*h_in) 0/1 matrices: dy taps with per-image H-reflect."""
    P = np.zeros((3, n * h_out, n * h_in), np.float32)
    for dy in range(3):
        for b in range(n):
            for ho in range(h_out):
                hi = _reflect(stride * ho + dy - 1, h_in)
                P[dy, b * h_out + ho, b * h_in + hi] = 1.0
    return jnp.asarray(P)


def _build_band(w_hwio, w_in, w_out, stride):
    """(3, w_in*Ci, w_out*Co) block-banded weights: dx taps with W-reflect."""
    w = np.asarray(w_hwio, np.float32)           # (3, 3, Ci, Co)
    ci, co = w.shape[2], w.shape[3]
    B = np.zeros((3, w_in * ci, w_out * co), np.float32)
    for dy in range(3):
        for wo in range(w_out):
            for dx in range(3):
                wi = _reflect(stride * wo + dx - 1, w_in)
                B[dy, wi * ci:(wi + 1) * ci, wo * co:(wo + 1) * co] += w[dy, dx]
    return jnp.asarray(B, jnp.bfloat16)


def _build_group_sum(w, c):
    """(w*c, w*c) 0/1 matrix summing lanes that share a channel."""
    ch = np.arange(w * c) % c
    return jnp.asarray((ch[:, None] == ch[None, :]).astype(np.float32))


def _tile_vec(v, w):
    """(C,) per-channel vector -> (1, w*C) lane-tiled f32."""
    v = np.asarray(v, np.float32).reshape(1, -1)
    return jnp.asarray(np.tile(v, (1, w)))


def prepare_encoder(params, n, h, w):
    """Pre-pack weights into banded/selection matrices (done once, outside jit)."""
    levels, meta = [], []
    hh, ww = h, w
    for lvl, blk in enumerate(params["blocks"]):
        prep = {}
        has_down = lvl > 0
        if has_down:
            d = params["down"][lvl - 1]
            h_in, w_in = hh, ww
            hh = (h_in - 1) // 2 + 1      # conv: k=3, stride=2, pad=1
            ww = (w_in - 1) // 2 + 1
            prep["pd"] = _build_rowsel(n, h_in, hh, 2)
            prep["bd"] = _build_band(d["w"], w_in, ww, 2)
            prep["biasd"] = _tile_vec(d["b"], ww)
        cmid = int(blk["w1"].shape[3])
        prep["p"] = _build_rowsel(n, hh, hh, 1)
        prep["b1"] = _build_band(blk["w1"], ww, ww, 1)
        prep["bias1"] = _tile_vec(blk["b1"], ww)
        prep["g1"] = _tile_vec(blk["g1"], ww)
        prep["be1"] = _tile_vec(blk["be1"], ww)
        prep["b2"] = _build_band(blk["w2"], ww, ww, 1)
        prep["bias2"] = _tile_vec(blk["b2"], ww)
        prep["g2"] = _tile_vec(blk["g2"], ww)
        prep["be2"] = _tile_vec(blk["be2"], ww)
        prep["ggt"] = _build_group_sum(ww, cmid)
        levels.append(prep)
        meta.append((has_down, (n, hh, ww, cmid), float(n * hh * ww)))
    return levels, tuple(meta)


# ------------------------------- model forward ------------------------------ #

def encoder_forward(x_nchw, levels, *, meta):
    """NCHW in/out at the module boundary; (N*H, W*C) lane-dense layout inside."""
    n, c0, h, w = x_nchw.shape
    y = jnp.transpose(x_nchw, (0, 2, 3, 1)).reshape(n * h, w * c0)
    connections = [x_nchw]
    y_nchw = None
    last = len(levels) - 1
    for i, (prep, (has_down, shape, count)) in enumerate(zip(levels, meta)):
        y = _run_block(y, prep, shape=shape, count=count, has_down=has_down)
        nb, hh, ww, cc = shape
        y_nchw = jnp.transpose(y.reshape(nb, hh, ww, cc), (0, 3, 1, 2))
        if i < last:
            connections.append(y_nchw)
    return y_nchw, connections


# ------------------------------ parameter init ------------------------------ #

def _xavier_conv(key, cin, cout):
    fan_in, fan_out = cin * 9, cout * 9
    bound = (6.0 / (fan_in + fan_out)) ** 0.5
    return jax.random.uniform(key, (3, 3, cin, cout), jnp.float32, -bound, bound)


def _conv_bias(key, cin, cout):
    bound = 1.0 / (cin * 9) ** 0.5
    return jax.random.uniform(key, (cout,), jnp.float32, -bound, bound)


def _block_params(key, cin, cout):
    k = jax.random.split(key, 4)
    return {
        "w1": _xavier_conv(k[0], cin, cout), "b1": _conv_bias(k[1], cin, cout),
        "g1": jnp.ones((cout,), jnp.float32), "be1": jnp.zeros((cout,), jnp.float32),
        "w2": _xavier_conv(k[2], cout, cout), "b2": _conv_bias(k[3], cout, cout),
        "g2": jnp.ones((cout,), jnp.float32), "be2": jnp.zeros((cout,), jnp.float32),
    }


def init_encoder_params(key, in_channels):
    keys = jax.random.split(key, 2 * len(in_channels) + 4)
    ki = iter(range(len(keys)))
    blocks = [_block_params(keys[next(ki)], in_channels[0], in_channels[1])]
    down = []
    for i in range(1, len(in_channels) - 1):
        blocks.append(
            _block_params(keys[next(ki)], in_channels[i + 1], in_channels[i + 1]))
        kd = jax.random.split(keys[next(ki)], 2)
        down.append({
            "w": _xavier_conv(kd[0], in_channels[i], in_channels[i + 1]),
            "b": _conv_bias(kd[1], in_channels[i], in_channels[i + 1]),
        })
    return {"blocks": blocks, "down": down}


# ----------------------------------- main ----------------------------------- #

if __name__ == "__main__":
    key = jax.random.PRNGKey(0)
    k_param, k_x = jax.random.split(key)

    in_channels = [4, 8, 8, 16]            # Encoder([4, 8, 8, 16])
    N, H, W = 2, 16, 16
    x = jax.random.normal(k_x, (N, in_channels[0], H, W), jnp.float32)  # NCHW

    params = init_encoder_params(k_param, in_channels)
    levels, meta = prepare_encoder(params, N, H, W)     # one-time weight packing

    fwd = jax.jit(functools.partial(encoder_forward, meta=meta))
    out, connections = fwd(x, levels)

    out = jax.block_until_ready(out)
    connections = [jax.block_until_ready(c) for c in connections]

    # sanity on shapes implied by the PyTorch forward
    assert out.shape == (N, in_channels[-1], H // 4, W // 4), out.shape
    assert connections[0].shape == (N, in_channels[0], H, W)
    assert connections[1].shape == (N, in_channels[1], H, W)
    assert connections[2].shape == (N, in_channels[2], H // 2, W // 2)
    assert all(bool(jnp.all(jnp.isfinite(c))) for c in connections)
    assert bool(jnp.all(jnp.isfinite(out)))

    print("KERNEL_OK")
</pallas_src>

<mosaic_0001>
module attributes {stable_mosaic.version = 11 : i64} {
  func.func @_block_kernel(%arg0: memref<32x64xf32, #tpu.memory_space<vmem>>, %arg1: memref<3x32x32xf32, #tpu.memory_space<vmem>>, %arg2: memref<3x64x128xbf16, #tpu.memory_space<vmem>>, %arg3: memref<1x128xf32, #tpu.memory_space<vmem>>, %arg4: memref<1x128xf32, #tpu.memory_space<vmem>>, %arg5: memref<1x128xf32, #tpu.memory_space<vmem>>, %arg6: memref<3x128x128xbf16, #tpu.memory_space<vmem>>, %arg7: memref<1x128xf32, #tpu.memory_space<vmem>>, %arg8: memref<1x128xf32, #tpu.memory_space<vmem>>, %arg9: memref<1x128xf32, #tpu.memory_space<vmem>>, %arg10: memref<128x128xf32, #tpu.memory_space<vmem>>, %arg11: memref<32x128xf32, #tpu.memory_space<vmem>>) attributes {dimension_semantics = [], scalar_prefetch = 0 : i64, scratch_operands = 0 : i64, tpu.core_type = #tpu.core_type<tc>} {
    %c0 = arith.constant 0 : index
    %c0_0 = arith.constant 0 : index
    %0 = vector.load %arg0[%c0, %c0_0] : memref<32x64xf32, #tpu.memory_space<vmem>>, vector<32x64xf32>
    %c0_1 = arith.constant 0 : index
    %c0_2 = arith.constant 0 : index
    %1 = vector.load %arg10[%c0_1, %c0_2] : memref<128x128xf32, #tpu.memory_space<vmem>>, vector<128x128xf32>
    %2 = arith.truncf %0 : vector<32x64xf32> to vector<32x64xbf16>
    %c0_3 = arith.constant 0 : index
    %c0_4 = arith.constant 0 : index
    %3 = vector.load %arg3[%c0_3, %c0_4] : memref<1x128xf32, #tpu.memory_space<vmem>>, vector<1x128xf32>
    %c0_5 = arith.constant 0 : index
    %c0_6 = arith.constant 0 : index
    %c0_7 = arith.constant 0 : index
    %4 = vector.load %arg2[%c0_5, %c0_6, %c0_7] : memref<3x64x128xbf16, #tpu.memory_space<vmem>>, vector<1x64x128xbf16>
    %5 = vector.shape_cast %4 : vector<1x64x128xbf16> to vector<64x128xbf16>
    %cst = arith.constant dense<0.000000e+00> : vector<32x128xf32>
    %6 = tpu.matmul %2, %5, %cst {dimension_numbers = #tpu.dot_dimension_numbers<[1], [0], [0], [1], [0, 0, 1, 1], [], []>} : vector<32x64xbf16>, vector<64x128xbf16>, vector<32x128xf32> -> vector<32x128xf32>
    %c0_8 = arith.constant 0 : index
    %c0_9 = arith.constant 0 : index
    %c0_10 = arith.constant 0 : index
    %7 = vector.load %arg1[%c0_8, %c0_9, %c0_10] : memref<3x32x32xf32, #tpu.memory_space<vmem>>, vector<1x32x32xf32>
    %8 = vector.shape_cast %7 : vector<1x32x32xf32> to vector<32x32xf32>
    %cst_11 = arith.constant dense<0.000000e+00> : vector<32x128xf32>
    %9 = tpu.matmul %8, %6, %cst_11 {dimension_numbers = #tpu.dot_dimension_numbers<[1], [0], [0], [1], [0, 0, 1, 1], [], []>} : vector<32x32xf32>, vector<32x128xf32>, vector<32x128xf32> -> vector<32x128xf32>
    %10 = vector.broadcast %3 : vector<1x128xf32> to vector<32x128xf32>
    %11 = arith.addf %10, %9 : vector<32x128xf32>
    %c1 = arith.constant 1 : index
    %c0_12 = arith.constant 0 : index
    %c0_13 = arith.constant 0 : index
    %12 = vector.load %arg2[%c1, %c0_12, %c0_13] : memref<3x64x128xbf16, #tpu.memory_space<vmem>>, vector<1x64x128xbf16>
    %13 = vector.shape_cast %12 : vector<1x64x128xbf16> to vector<64x128xbf16>
    %cst_14 = arith.constant dense<0.000000e+00> : vector<32x128xf32>
    %14 = tpu.matmul %2, %13, %cst_14 {dimension_numbers = #tpu.dot_dimension_numbers<[1], [0], [0], [1], [0, 0, 1, 1], [], []>} : vector<32x64xbf16>, vector<64x128xbf16>, vector<32x128xf32> -> vector<32x128xf32>
    %c1_15 = arith.constant 1 : index
    %c0_16 = arith.constant 0 : index
    %c0_17 = arith.constant 0 : index
    %15 = vector.load %arg1[%c1_15, %c0_16, %c0_17] : memref<3x32x32xf32, #tpu.memory_space<vmem>>, vector<1x32x32xf32>
    %16 = vector.shape_cast %15 : vector<1x32x32xf32> to vector<32x32xf32>
    %cst_18 = arith.constant dense<0.000000e+00> : vector<32x128xf32>
    %17 = tpu.matmul %16, %14, %cst_18 {dimension_numbers = #tpu.dot_dimension_numbers<[1], [0], [0], [1], [0, 0, 1, 1], [], []>} : vector<32x32xf32>, vector<32x128xf32>, vector<32x128xf32> -> vector<32x128xf32>
    %18 = arith.addf %11, %17 : vector<32x128xf32>
    %c2 = arith.constant 2 : index
    %c0_19 = arith.constant 0 : index
    %c0_20 = arith.constant 0 : index
    %19 = vector.load %arg2[%c2, %c0_19, %c0_20] : memref<3x64x128xbf16, #tpu.memory_space<vmem>>, vector<1x64x128xbf16>
    %20 = vector.shape_cast %19 : vector<1x64x128xbf16> to vector<64x128xbf16>
    %cst_21 = arith.constant dense<0.000000e+00> : vector<32x128xf32>
    %21 = tpu.matmul %2, %20, %cst_21 {dimension_numbers = #tpu.dot_dimension_numbers<[1], [0], [0], [1], [0, 0, 1, 1], [], []>} : vector<32x64xbf16>, vector<64x128xbf16>, vector<32x128xf32> -> vector<32x128xf32>
    %c2_22 = arith.constant 2 : index
    %c0_23 = arith.constant 0 : index
    %c0_24 = arith.constant 0 : index
    %22 = vector.load %arg1[%c2_22, %c0_23, %c0_24] : memref<3x32x32xf32, #tpu.memory_space<vmem>>, vector<1x32x32xf32>
    %23 = vector.shape_cast %22 : vector<1x32x32xf32> to vector<32x32xf32>
    %cst_25 = arith.constant dense<0.000000e+00> : vector<32x128xf32>
    %24 = tpu.matmul %23, %21, %cst_25 {dimension_numbers = #tpu.dot_dimension_numbers<[1], [0], [0], [1], [0, 0, 1, 1], [], []>} : vector<32x32xf32>, vector<32x128xf32>, vector<32x128xf32> -> vector<32x128xf32>
    %25 = arith.addf %18, %24 : vector<32x128xf32>
    %cst_26 = arith.constant 0.000000e+00 : f32
    %26 = vector.broadcast %cst_26 : f32 to vector<32x128xf32>
    %27 = arith.cmpf oge, %25, %26 : vector<32x128xf32>
    %cst_27 = arith.constant 0.00999999977 : f32
    %28 = vector.broadcast %cst_27 : f32 to vector<32x128xf32>
    %29 = arith.mulf %28, %25 : vector<32x128xf32>
    %30 = arith.select %27, %25, %29 : vector<32x128xi1>, vector<32x128xf32>
    %c0_28 = arith.constant 0 : index
    %c0_29 = arith.constant 0 : index
    %31 = vector.load %arg4[%c0_28, %c0_29] : memref<1x128xf32, #tpu.memory_space<vmem>>, vector<1x128xf32>
    %c0_30 = arith.constant 0 : index
    %c0_31 = arith.constant 0 : index
    %32 = vector.load %arg5[%c0_30, %c0_31] : memref<1x128xf32, #tpu.memory_space<vmem>>, vector<1x128xf32>
    %cst_32 = arith.constant dense<0.000000e+00> : vector<32x128xf32>
    %33 = tpu.matmul %30, %1, %cst_32 {dimension_numbers = #tpu.dot_dimension_numbers<[1], [0], [0], [1], [0, 0, 1, 1], [], []>} : vector<32x128xf32>, vector<128x128xf32>, vector<32x128xf32> -> vector<32x128xf32>
    %cst_33 = arith.constant dense<0.000000e+00> : vector<128xf32>
    %34 = vector.multi_reduction <add>, %33, %cst_33 [0] : vector<32x128xf32> to vector<128xf32>
    %35 = vector.shape_cast %34 : vector<128xf32> to vector<1x128xf32>
    %36 = arith.mulf %30, %30 : vector<32x128xf32>
    %cst_34 = arith.constant dense<0.000000e+00> : vector<32x128xf32>
    %37 = tpu.matmul %36, %1, %cst_34 {dimension_numbers = #tpu.dot_dimension_numbers<[1], [0], [0], [1], [0, 0, 1, 1], [], []>} : vector<32x128xf32>, vector<128x128xf32>, vector<32x128xf32> -> vector<32x128xf32>
    %cst_35 = arith.constant dense<0.000000e+00> : vector<128xf32>
    %38 = vector.multi_reduction <add>, %37, %cst_35 [0] : vector<32x128xf32> to vector<128xf32>
    %39 = vector.shape_cast %38 : vector<128xf32> to vector<1x128xf32>
    %cst_36 = arith.constant 0.001953125 : f32
    %40 = vector.broadcast %cst_36 : f32 to vector<1x128xf32>
    %41 = arith.mulf %35, %40 : vector<1x128xf32>
    %cst_37 = arith.constant 0.001953125 : f32
    %42 = vector.broadcast %cst_37 : f32 to vector<1x128xf32>
    %43 = arith.mulf %39, %42 : vector<1x128xf32>
    %44 = arith.mulf %41, %41 : vector<1x128xf32>
    %45 = arith.subf %43, %44 : vector<1x128xf32>
    %cst_38 = arith.constant 0.000000e+00 : f32
    %46 = vector.broadcast %cst_38 : f32 to vector<1x128xf32>
    %47 = arith.maximumf %45, %46 : vector<1x128xf32>
    %cst_39 = arith.constant 9.99999974E-6 : f32
    %48 = vector.broadcast %cst_39 : f32 to vector<1x128xf32>
    %49 = arith.addf %47, %48 : vector<1x128xf32>
    %50 = math.rsqrt %49 : vector<1x128xf32>
    %51 = arith.mulf %31, %50 : vector<1x128xf32>
    %52 = arith.mulf %41, %51 : vector<1x128xf32>
    %53 = arith.subf %32, %52 : vector<1x128xf32>
    %54 = vector.broadcast %51 : vector<1x128xf32> to vector<32x128xf32>
    %55 = arith.mulf %30, %54 : vector<32x128xf32>
    %56 = vector.broadcast %53 : vector<1x128xf32> to vector<32x128xf32>
    %57 = arith.addf %55, %56 : vector<32x128xf32>
    %58 = arith.truncf %57 : vector<32x128xf32> to vector<32x128xbf16>
    %c0_40 = arith.constant 0 : index
    %c0_41 = arith.constant 0 : index
    %59 = vector.load %arg7[%c0_40, %c0_41] : memref<1x128xf32, #tpu.memory_space<vmem>>, vector<1x128xf32>
    %c0_42 = arith.constant 0 : index
    %c0_43 = arith.constant 0 : index
    %c0_44 = arith.constant 0 : index
    %60 = vector.load %arg6[%c0_42, %c0_43, %c0_44] : memref<3x128x128xbf16, #tpu.memory_space<vmem>>, vector<1x128x128xbf16>
    %61 = vector.shape_cast %60 : vector<1x128x128xbf16> to vector<128x128xbf16>
    %cst_45 = arith.constant dense<0.000000e+00> : vector<32x128xf32>
    %62 = tpu.matmul %58, %61, %cst_45 {dimension_numbers = #tpu.dot_dimension_numbers<[1], [0], [0], [1], [0, 0, 1, 1], [], []>} : vector<32x128xbf16>, vector<128x128xbf16>, vector<32x128xf32> -> vector<32x128xf32>
    %c0_46 = arith.constant 0 : index
    %c0_47 = arith.constant 0 : index
    %c0_48 = arith.constant 0 : index
    %63 = vector.load %arg1[%c0_46, %c0_47, %c0_48] : memref<3x32x32xf32, #tpu.memory_space<vmem>>, vector<1x32x32xf32>
    %64 = vector.shape_cast %63 : vector<1x32x32xf32> to vector<32x32xf32>
    %cst_49 = arith.constant dense<0.000000e+00> : vector<32x128xf32>
    %65 = tpu.matmul %64, %62, %cst_49 {dimension_numbers = #tpu.dot_dimension_numbers<[1], [0], [0], [1], [0, 0, 1, 1], [], []>} : vector<32x32xf32>, vector<32x128xf32>, vector<32x128xf32> -> vector<32x128xf32>
    %66 = vector.broadcast %59 : vector<1x128xf32> to vector<32x128xf32>
    %67 = arith.addf %66, %65 : vector<32x128xf32>
    %c1_50 = arith.constant 1 : index
    %c0_51 = arith.constant 0 : index
    %c0_52 = arith.constant 0 : index
    %68 = vector.load %arg6[%c1_50, %c0_51, %c0_52] : memref<3x128x128xbf16, #tpu.memory_space<vmem>>, vector<1x128x128xbf16>
    %69 = vector.shape_cast %68 : vector<1x128x128xbf16> to vector<128x128xbf16>
    %cst_53 = arith.constant dense<0.000000e+00> : vector<32x128xf32>
    %70 = tpu.matmul %58, %69, %cst_53 {dimension_numbers = #tpu.dot_dimension_numbers<[1], [0], [0], [1], [0, 0, 1, 1], [], []>} : vector<32x128xbf16>, vector<128x128xbf16>, vector<32x128xf32> -> vector<32x128xf32>
    %c1_54 = arith.constant 1 : index
    %c0_55 = arith.constant 0 : index
    %c0_56 = arith.constant 0 : index
    %71 = vector.load %arg1[%c1_54, %c0_55, %c0_56] : memref<3x32x32xf32, #tpu.memory_space<vmem>>, vector<1x32x32xf32>
    %72 = vector.shape_cast %71 : vector<1x32x32xf32> to vector<32x32xf32>
    %cst_57 = arith.constant dense<0.000000e+00> : vector<32x128xf32>
    %73 = tpu.matmul %72, %70, %cst_57 {dimension_numbers = #tpu.dot_dimension_numbers<[1], [0], [0], [1], [0, 0, 1, 1], [], []>} : vector<32x32xf32>, vector<32x128xf32>, vector<32x128xf32> -> vector<32x128xf32>
    %74 = arith.addf %67, %73 : vector<32x128xf32>
    %c2_58 = arith.constant 2 : index
    %c0_59 = arith.constant 0 : index
    %c0_60 = arith.constant 0 : index
    %75 = vector.load %arg6[%c2_58, %c0_59, %c0_60] : memref<3x128x128xbf16, #tpu.memory_space<vmem>>, vector<1x128x128xbf16>
    %76 = vector.shape_cast %75 : vector<1x128x128xbf16> to vector<128x128xbf16>
    %cst_61 = arith.constant dense<0.000000e+00> : vector<32x128xf32>
    %77 = tpu.matmul %58, %76, %cst_61 {dimension_numbers = #tpu.dot_dimension_numbers<[1], [0], [0], [1], [0, 0, 1, 1], [], []>} : vector<32x128xbf16>, vector<128x128xbf16>, vector<32x128xf32> -> vector<32x128xf32>
    %c2_62 = arith.constant 2 : index
    %c0_63 = arith.constant 0 : index
    %c0_64 = arith.constant 0 : index
    %78 = vector.load %arg1[%c2_62, %c0_63, %c0_64] : memref<3x32x32xf32, #tpu.memory_space<vmem>>, vector<1x32x32xf32>
    %79 = vector.shape_cast %78 : vector<1x32x32xf32> to vector<32x32xf32>
    %cst_65 = arith.constant dense<0.000000e+00> : vector<32x128xf32>
    %80 = tpu.matmul %79, %77, %cst_65 {dimension_numbers = #tpu.dot_dimension_numbers<[1], [0], [0], [1], [0, 0, 1, 1], [], []>} : vector<32x32xf32>, vector<32x128xf32>, vector<32x128xf32> -> vector<32x128xf32>
    %81 = arith.addf %74, %80 : vector<32x128xf32>
    %cst_66 = arith.constant 0.000000e+00 : f32
    %82 = vector.broadcast %cst_66 : f32 to vector<32x128xf32>
    %83 = arith.cmpf oge, %81, %82 : vector<32x128xf32>
    %cst_67 = arith.constant 0.00999999977 : f32
    %84 = vector.broadcast %cst_67 : f32 to vector<32x128xf32>
    %85 = arith.mulf %84, %81 : vector<32x128xf32>
    %86 = arith.select %83, %81, %85 : vector<32x128xi1>, vector<32x128xf32>
    %c0_68 = arith.constant 0 : index
    %c0_69 = arith.constant 0 : index
    %87 = vector.load %arg8[%c0_68, %c0_69] : memref<1x128xf32, #tpu.memory_space<vmem>>, vector<1x128xf32>
    %c0_70 = arith.constant 0 : index
    %c0_71 = arith.constant 0 : index
    %88 = vector.load %arg9[%c0_70, %c0_71] : memref<1x128xf32, #tpu.memory_space<vmem>>, vector<1x128xf32>
    %cst_72 = arith.constant dense<0.000000e+00> : vector<32x128xf32>
    %89 = tpu.matmul %86, %1, %cst_72 {dimension_numbers = #tpu.dot_dimension_numbers<[1], [0], [0], [1], [0, 0, 1, 1], [], []>} : vector<32x128xf32>, vector<128x128xf32>, vector<32x128xf32> -> vector<32x128xf32>
    %cst_73 = arith.constant dense<0.000000e+00> : vector<128xf32>
    %90 = vector.multi_reduction <add>, %89, %cst_73 [0] : vector<32x128xf32> to vector<128xf32>
    %91 = vector.shape_cast %90 : vector<128xf32> to vector<1x128xf32>
    %92 = arith.mulf %86, %86 : vector<32x128xf32>
    %cst_74 = arith.constant dense<0.000000e+00> : vector<32x128xf32>
    %93 = tpu.matmul %92, %1, %cst_74 {dimension_numbers = #tpu.dot_dimension_numbers<[1], [0], [0], [1], [0, 0, 1, 1], [], []>} : vector<32x128xf32>, vector<128x128xf32>, vector<32x128xf32> -> vector<32x128xf32>
    %cst_75 = arith.constant dense<0.000000e+00> : vector<128xf32>
    %94 = vector.multi_reduction <add>, %93, %cst_75 [0] : vector<32x128xf32> to vector<128xf32>
    %95 = vector.shape_cast %94 : vector<128xf32> to vector<1x128xf32>
    %cst_76 = arith.constant 0.001953125 : f32
    %96 = vector.broadcast %cst_76 : f32 to vector<1x128xf32>
    %97 = arith.mulf %91, %96 : vector<1x128xf32>
    %cst_77 = arith.constant 0.001953125 : f32
    %98 = vector.broadcast %cst_77 : f32 to vector<1x128xf32>
    %99 = arith.mulf %95, %98 : vector<1x128xf32>
    %100 = arith.mulf %97, %97 : vector<1x128xf32>
    %101 = arith.subf %99, %100 : vector<1x128xf32>
    %cst_78 = arith.constant 0.000000e+00 : f32
    %102 = vector.broadcast %cst_78 : f32 to vector<1x128xf32>
    %103 = arith.maximumf %101, %102 : vector<1x128xf32>
    %cst_79 = arith.constant 9.99999974E-6 : f32
    %104 = vector.broadcast %cst_79 : f32 to vector<1x128xf32>
    %105 = arith.addf %103, %104 : vector<1x128xf32>
    %106 = math.rsqrt %105 : vector<1x128xf32>
    %107 = arith.mulf %87, %106 : vector<1x128xf32>
    %108 = arith.mulf %97, %107 : vector<1x128xf32>
    %109 = arith.subf %88, %108 : vector<1x128xf32>
    %110 = vector.broadcast %107 : vector<1x128xf32> to vector<32x128xf32>
    %111 = arith.mulf %86, %110 : vector<32x128xf32>
    %112 = vector.broadcast %109 : vector<1x128xf32> to vector<32x128xf32>
    %113 = arith.addf %111, %112 : vector<32x128xf32>
    %c0_80 = arith.constant 0 : index
    %c0_81 = arith.constant 0 : index
    %114 = vector.load %arg11[%c0_80, %c0_81] : memref<32x128xf32, #tpu.memory_space<vmem>>, vector<32x128xf32>
    tpu.vector_store %arg11[%c0_80, %c0_81], %113 {strides = array<i32>} : memref<32x128xf32, #tpu.memory_space<vmem>>, vector<32x128xf32>,
    return
  }
}

module attributes {stable_mosaic.version = 11 : i64} {
  func.func @_block_kernel(%arg0: memref<32x128xf32, #tpu.memory_space<vmem>>, %arg1: memref<3x16x32xf32, #tpu.memory_space<vmem>>, %arg2: memref<3x128x64xbf16, #tpu.memory_space<vmem>>, %arg3: memref<1x64xf32, #tpu.memory_space<vmem>>, %arg4: memref<3x16x16xf32, #tpu.memory_space<vmem>>, %arg5: memref<3x64x64xbf16, #tpu.memory_space<vmem>>, %arg6: memref<1x64xf32, #tpu.memory_space<vmem>>, %arg7: memref<1x64xf32, #tpu.memory_space<vmem>>, %arg8: memref<1x64xf32, #tpu.memory_space<vmem>>, %arg9: memref<3x64x64xbf16, #tpu.memory_space<vmem>>, %arg10: memref<1x64xf32, #tpu.memory_space<vmem>>, %arg11: memref<1x64xf32, #tpu.memory_space<vmem>>, %arg12: memref<1x64xf32, #tpu.memory_space<vmem>>, %arg13: memref<64x64xf32, #tpu.memory_space<vmem>>, %arg14: memref<16x64xf32, #tpu.memory_space<vmem>>) attributes {dimension_semantics = [], scalar_prefetch = 0 : i64, scratch_operands = 0 : i64, tpu.core_type = #tpu.core_type<tc>} {
    %c0 = arith.constant 0 : index
    %c0_0 = arith.constant 0 : index
    %0 = vector.load %arg0[%c0, %c0_0] : memref<32x128xf32, #tpu.memory_space<vmem>>, vector<32x128xf32>
    %1 = arith.truncf %0 : vector<32x128xf32> to vector<32x128xbf16>
    %c0_1 = arith.constant 0 : index
    %c0_2 = arith.constant 0 : index
    %2 = vector.load %arg3[%c0_1, %c0_2] : memref<1x64xf32, #tpu.memory_space<vmem>>, vector<1x64xf32>
    %c0_3 = arith.constant 0 : index
    %c0_4 = arith.constant 0 : index
    %c0_5 = arith.constant 0 : index
    %3 = vector.load %arg2[%c0_3, %c0_4, %c0_5] : memref<3x128x64xbf16, #tpu.memory_space<vmem>>, vector<1x128x64xbf16>
    %4 = vector.shape_cast %3 : vector<1x128x64xbf16> to vector<128x64xbf16>
    %cst = arith.constant dense<0.000000e+00> : vector<32x64xf32>
    %5 = tpu.matmul %1, %4, %cst {dimension_numbers = #tpu.dot_dimension_numbers<[1], [0], [0], [1], [0, 0, 1, 1], [], []>} : vector<32x128xbf16>, vector<128x64xbf16>, vector<32x64xf32> -> vector<32x64xf32>
    %c0_6 = arith.constant 0 : index
    %c0_7 = arith.constant 0 : index
    %c0_8 = arith.constant 0 : index
    %6 = vector.load %arg1[%c0_6, %c0_7, %c0_8] : memref<3x16x32xf32, #tpu.memory_space<vmem>>, vector<1x16x32xf32>
    %7 = vector.shape_cast %6 : vector<1x16x32xf32> to vector<16x32xf32>
    %cst_9 = arith.constant dense<0.000000e+00> : vector<16x64xf32>
    %8 = tpu.matmul %7, %5, %cst_9 {dimension_numbers = #tpu.dot_dimension_numbers<[1], [0], [0], [1], [0, 0, 1, 1], [], []>} : vector<16x32xf32>, vector<32x64xf32>, vector<16x64xf32> -> vector<16x64xf32>
    %9 = vector.broadcast %2 : vector<1x64xf32> to vector<16x64xf32>
    %10 = arith.addf %9, %8 : vector<16x64xf32>
    %c1 = arith.constant 1 : index
    %c0_10 = arith.constant 0 : index
    %c0_11 = arith.constant 0 : index
    %11 = vector.load %arg2[%c1, %c0_10, %c0_11] : memref<3x128x64xbf16, #tpu.memory_space<vmem>>, vector<1x128x64xbf16>
    %12 = vector.shape_cast %11 : vector<1x128x64xbf16> to vector<128x64xbf16>
    %cst_12 = arith.constant dense<0.000000e+00> : vector<32x64xf32>
    %13 = tpu.matmul %1, %12, %cst_12 {dimension_numbers = #tpu.dot_dimension_numbers<[1], [0], [0], [1], [0, 0, 1, 1], [], []>} : vector<32x128xbf16>, vector<128x64xbf16>, vector<32x64xf32> -> vector<32x64xf32>
    %c1_13 = arith.constant 1 : index
    %c0_14 = arith.constant 0 : index
    %c0_15 = arith.constant 0 : index
    %14 = vector.load %arg1[%c1_13, %c0_14, %c0_15] : memref<3x16x32xf32, #tpu.memory_space<vmem>>, vector<1x16x32xf32>
    %15 = vector.shape_cast %14 : vector<1x16x32xf32> to vector<16x32xf32>
    %cst_16 = arith.constant dense<0.000000e+00> : vector<16x64xf32>
    %16 = tpu.matmul %15, %13, %cst_16 {dimension_numbers = #tpu.dot_dimension_numbers<[1], [0], [0], [1], [0, 0, 1, 1], [], []>} : vector<16x32xf32>, vector<32x64xf32>, vector<16x64xf32> -> vector<16x64xf32>
    %17 = arith.addf %10, %16 : vector<16x64xf32>
    %c2 = arith.constant 2 : index
    %c0_17 = arith.constant 0 : index
    %c0_18 = arith.constant 0 : index
    %18 = vector.load %arg2[%c2, %c0_17, %c0_18] : memref<3x128x64xbf16, #tpu.memory_space<vmem>>, vector<1x128x64xbf16>
    %19 = vector.shape_cast %18 : vector<1x128x64xbf16> to vector<128x64xbf16>
    %cst_19 = arith.constant dense<0.000000e+00> : vector<32x64xf32>
    %20 = tpu.matmul %1, %19, %cst_19 {dimension_numbers = #tpu.dot_dimension_numbers<[1], [0], [0], [1], [0, 0, 1, 1], [], []>} : vector<32x128xbf16>, vector<128x64xbf16>, vector<32x64xf32> -> vector<32x64xf32>
    %c2_20 = arith.constant 2 : index
    %c0_21 = arith.constant 0 : index
    %c0_22 = arith.constant 0 : index
    %21 = vector.load %arg1[%c2_20, %c0_21, %c0_22] : memref<3x16x32xf32, #tpu.memory_space<vmem>>, vector<1x16x32xf32>
    %22 = vector.shape_cast %21 : vector<1x16x32xf32> to vector<16x32xf32>
    %cst_23 = arith.constant dense<0.000000e+00> : vector<16x64xf32>
    %23 = tpu.matmul %22, %20, %cst_23 {dimension_numbers = #tpu.dot_dimension_numbers<[1], [0], [0], [1], [0, 0, 1, 1], [], []>} : vector<16x32xf32>, vector<32x64xf32>, vector<16x64xf32> -> vector<16x64xf32>
    %24 = arith.addf %17, %23 : vector<16x64xf32>
    %c0_24 = arith.constant 0 : index
    %c0_25 = arith.constant 0 : index
    %25 = vector.load %arg13[%c0_24, %c0_25] : memref<64x64xf32, #tpu.memory_space<vmem>>, vector<64x64xf32>
    %26 = arith.truncf %24 : vector<16x64xf32> to vector<16x64xbf16>
    %c0_26 = arith.constant 0 : index
    %c0_27 = arith.constant 0 : index
    %27 = vector.load %arg6[%c0_26, %c0_27] : memref<1x64xf32, #tpu.memory_space<vmem>>, vector<1x64xf32>
    %c0_28 = arith.constant 0 : index
    %c0_29 = arith.constant 0 : index
    %c0_30 = arith.constant 0 : index
    %28 = vector.load %arg5[%c0_28, %c0_29, %c0_30] : memref<3x64x64xbf16, #tpu.memory_space<vmem>>, vector<1x64x64xbf16>
    %29 = vector.shape_cast %28 : vector<1x64x64xbf16> to vector<64x64xbf16>
    %cst_31 = arith.constant dense<0.000000e+00> : vector<16x64xf32>
    %30 = tpu.matmul %26, %29, %cst_31 {dimension_numbers = #tpu.dot_dimension_numbers<[1], [0], [0], [1], [0, 0, 1, 1], [], []>} : vector<16x64xbf16>, vector<64x64xbf16>, vector<16x64xf32> -> vector<16x64xf32>
    %c0_32 = arith.constant 0 : index
    %c0_33 = arith.constant 0 : index
    %c0_34 = arith.constant 0 : index
    %31 = vector.load %arg4[%c0_32, %c0_33, %c0_34] : memref<3x16x16xf32, #tpu.memory_space<vmem>>, vector<1x16x16xf32>
    %32 = vector.shape_cast %31 : vector<1x16x16xf32> to vector<16x16xf32>
    %cst_35 = arith.constant dense<0.000000e+00> : vector<16x64xf32>
    %33 = tpu.matmul %32, %30, %cst_35 {dimension_numbers = #tpu.dot_dimension_numbers<[1], [0], [0], [1], [0, 0, 1, 1], [], []>} : vector<16x16xf32>, vector<16x64xf32>, vector<16x64xf32> -> vector<16x64xf32>
    %34 = vector.broadcast %27 : vector<1x64xf32> to vector<16x64xf32>
    %35 = arith.addf %34, %33 : vector<16x64xf32>
    %c1_36 = arith.constant 1 : index
    %c0_37 = arith.constant 0 : index
    %c0_38 = arith.constant 0 : index
    %36 = vector.load %arg5[%c1_36, %c0_37, %c0_38] : memref<3x64x64xbf16, #tpu.memory_space<vmem>>, vector<1x64x64xbf16>
    %37 = vector.shape_cast %36 : vector<1x64x64xbf16> to vector<64x64xbf16>
    %cst_39 = arith.constant dense<0.000000e+00> : vector<16x64xf32>
    %38 = tpu.matmul %26, %37, %cst_39 {dimension_numbers = #tpu.dot_dimension_numbers<[1], [0], [0], [1], [0, 0, 1, 1], [], []>} : vector<16x64xbf16>, vector<64x64xbf16>, vector<16x64xf32> -> vector<16x64xf32>
    %c1_40 = arith.constant 1 : index
    %c0_41 = arith.constant 0 : index
    %c0_42 = arith.constant 0 : index
    %39 = vector.load %arg4[%c1_40, %c0_41, %c0_42] : memref<3x16x16xf32, #tpu.memory_space<vmem>>, vector<1x16x16xf32>
    %40 = vector.shape_cast %39 : vector<1x16x16xf32> to vector<16x16xf32>
    %cst_43 = arith.constant dense<0.000000e+00> : vector<16x64xf32>
    %41 = tpu.matmul %40, %38, %cst_43 {dimension_numbers = #tpu.dot_dimension_numbers<[1], [0], [0], [1], [0, 0, 1, 1], [], []>} : vector<16x16xf32>, vector<16x64xf32>, vector<16x64xf32> -> vector<16x64xf32>
    %42 = arith.addf %35, %41 : vector<16x64xf32>
    %c2_44 = arith.constant 2 : index
    %c0_45 = arith.constant 0 : index
    %c0_46 = arith.constant 0 : index
    %43 = vector.load %arg5[%c2_44, %c0_45, %c0_46] : memref<3x64x64xbf16, #tpu.memory_space<vmem>>, vector<1x64x64xbf16>
    %44 = vector.shape_cast %43 : vector<1x64x64xbf16> to vector<64x64xbf16>
    %cst_47 = arith.constant dense<0.000000e+00> : vector<16x64xf32>
    %45 = tpu.matmul %26, %44, %cst_47 {dimension_numbers = #tpu.dot_dimension_numbers<[1], [0], [0], [1], [0, 0, 1, 1], [], []>} : vector<16x64xbf16>, vector<64x64xbf16>, vector<16x64xf32> -> vector<16x64xf32>
    %c2_48 = arith.constant 2 : index
    %c0_49 = arith.constant 0 : index
    %c0_50 = arith.constant 0 : index
    %46 = vector.load %arg4[%c2_48, %c0_49, %c0_50] : memref<3x16x16xf32, #tpu.memory_space<vmem>>, vector<1x16x16xf32>
    %47 = vector.shape_cast %46 : vector<1x16x16xf32> to vector<16x16xf32>
    %cst_51 = arith.constant dense<0.000000e+00> : vector<16x64xf32>
    %48 = tpu.matmul %47, %45, %cst_51 {dimension_numbers = #tpu.dot_dimension_numbers<[1], [0], [0], [1], [0, 0, 1, 1], [], []>} : vector<16x16xf32>, vector<16x64xf32>, vector<16x64xf32> -> vector<16x64xf32>
    %49 = arith.addf %42, %48 : vector<16x64xf32>
    %cst_52 = arith.constant 0.000000e+00 : f32
    %50 = vector.broadcast %cst_52 : f32 to vector<16x64xf32>
    %51 = arith.cmpf oge, %49, %50 : vector<16x64xf32>
    %cst_53 = arith.constant 0.00999999977 : f32
    %52 = vector.broadcast %cst_53 : f32 to vector<16x64xf32>
    %53 = arith.mulf %52, %49 : vector<16x64xf32>
    %54 = arith.select %51, %49, %53 : vector<16x64xi1>, vector<16x64xf32>
    %c0_54 = arith.constant 0 : index
    %c0_55 = arith.constant 0 : index
    %55 = vector.load %arg7[%c0_54, %c0_55] : memref<1x64xf32, #tpu.memory_space<vmem>>, vector<1x64xf32>
    %c0_56 = arith.constant 0 : index
    %c0_57 = arith.constant 0 : index
    %56 = vector.load %arg8[%c0_56, %c0_57] : memref<1x64xf32, #tpu.memory_space<vmem>>, vector<1x64xf32>
    %cst_58 = arith.constant dense<0.000000e+00> : vector<16x64xf32>
    %57 = tpu.matmul %54, %25, %cst_58 {dimension_numbers = #tpu.dot_dimension_numbers<[1], [0], [0], [1], [0, 0, 1, 1], [], []>} : vector<16x64xf32>, vector<64x64xf32>, vector<16x64xf32> -> vector<16x64xf32>
    %cst_59 = arith.constant dense<0.000000e+00> : vector<64xf32>
    %58 = vector.multi_reduction <add>, %57, %cst_59 [0] : vector<16x64xf32> to vector<64xf32>
    %59 = vector.shape_cast %58 : vector<64xf32> to vector<1x64xf32>
    %60 = arith.mulf %54, %54 : vector<16x64xf32>
    %cst_60 = arith.constant dense<0.000000e+00> : vector<16x64xf32>
    %61 = tpu.matmul %60, %25, %cst_60 {dimension_numbers = #tpu.dot_dimension_numbers<[1], [0], [0], [1], [0, 0, 1, 1], [], []>} : vector<16x64xf32>, vector<64x64xf32>, vector<16x64xf32> -> vector<16x64xf32>
    %cst_61 = arith.constant dense<0.000000e+00> : vector<64xf32>
    %62 = vector.multi_reduction <add>, %61, %cst_61 [0] : vector<16x64xf32> to vector<64xf32>
    %63 = vector.shape_cast %62 : vector<64xf32> to vector<1x64xf32>
    %cst_62 = arith.constant 7.812500e-03 : f32
    %64 = vector.broadcast %cst_62 : f32 to vector<1x64xf32>
    %65 = arith.mulf %59, %64 : vector<1x64xf32>
    %cst_63 = arith.constant 7.812500e-03 : f32
    %66 = vector.broadcast %cst_63 : f32 to vector<1x64xf32>
    %67 = arith.mulf %63, %66 : vector<1x64xf32>
    %68 = arith.mulf %65, %65 : vector<1x64xf32>
    %69 = arith.subf %67, %68 : vector<1x64xf32>
    %cst_64 = arith.constant 0.000000e+00 : f32
    %70 = vector.broadcast %cst_64 : f32 to vector<1x64xf32>
    %71 = arith.maximumf %69, %70 : vector<1x64xf32>
    %cst_65 = arith.constant 9.99999974E-6 : f32
    %72 = vector.broadcast %cst_65 : f32 to vector<1x64xf32>
    %73 = arith.addf %71, %72 : vector<1x64xf32>
    %74 = math.rsqrt %73 : vector<1x64xf32>
    %75 = arith.mulf %55, %74 : vector<1x64xf32>
    %76 = arith.mulf %65, %75 : vector<1x64xf32>
    %77 = arith.subf %56, %76 : vector<1x64xf32>
    %78 = vector.broadcast %75 : vector<1x64xf32> to vector<16x64xf32>
    %79 = arith.mulf %54, %78 : vector<16x64xf32>
    %80 = vector.broadcast %77 : vector<1x64xf32> to vector<16x64xf32>
    %81 = arith.addf %79, %80 : vector<16x64xf32>
    %82 = arith.truncf %81 : vector<16x64xf32> to vector<16x64xbf16>
    %c0_66 = arith.constant 0 : index
    %c0_67 = arith.constant 0 : index
    %83 = vector.load %arg10[%c0_66, %c0_67] : memref<1x64xf32, #tpu.memory_space<vmem>>, vector<1x64xf32>
    %c0_68 = arith.constant 0 : index
    %c0_69 = arith.constant 0 : index
    %c0_70 = arith.constant 0 : index
    %84 = vector.load %arg9[%c0_68, %c0_69, %c0_70] : memref<3x64x64xbf16, #tpu.memory_space<vmem>>, vector<1x64x64xbf16>
    %85 = vector.shape_cast %84 : vector<1x64x64xbf16> to vector<64x64xbf16>
    %cst_71 = arith.constant dense<0.000000e+00> : vector<16x64xf32>
    %86 = tpu.matmul %82, %85, %cst_71 {dimension_numbers = #tpu.dot_dimension_numbers<[1], [0], [0], [1], [0, 0, 1, 1], [], []>} : vector<16x64xbf16>, vector<64x64xbf16>, vector<16x64xf32> -> vector<16x64xf32>
    %c0_72 = arith.constant 0 : index
    %c0_73 = arith.constant 0 : index
    %c0_74 = arith.constant 0 : index
    %87 = vector.load %arg4[%c0_72, %c0_73, %c0_74] : memref<3x16x16xf32, #tpu.memory_space<vmem>>, vector<1x16x16xf32>
    %88 = vector.shape_cast %87 : vector<1x16x16xf32> to vector<16x16xf32>
    %cst_75 = arith.constant dense<0.000000e+00> : vector<16x64xf32>
    %89 = tpu.matmul %88, %86, %cst_75 {dimension_numbers = #tpu.dot_dimension_numbers<[1], [0], [0], [1], [0, 0, 1, 1], [], []>} : vector<16x16xf32>, vector<16x64xf32>, vector<16x64xf32> -> vector<16x64xf32>
    %90 = vector.broadcast %83 : vector<1x64xf32> to vector<16x64xf32>
    %91 = arith.addf %90, %89 : vector<16x64xf32>
    %c1_76 = arith.constant 1 : index
    %c0_77 = arith.constant 0 : index
    %c0_78 = arith.constant 0 : index
    %92 = vector.load %arg9[%c1_76, %c0_77, %c0_78] : memref<3x64x64xbf16, #tpu.memory_space<vmem>>, vector<1x64x64xbf16>
    %93 = vector.shape_cast %92 : vector<1x64x64xbf16> to vector<64x64xbf16>
    %cst_79 = arith.constant dense<0.000000e+00> : vector<16x64xf32>
    %94 = tpu.matmul %82, %93, %cst_79 {dimension_numbers = #tpu.dot_dimension_numbers<[1], [0], [0], [1], [0, 0, 1, 1], [], []>} : vector<16x64xbf16>, vector<64x64xbf16>, vector<16x64xf32> -> vector<16x64xf32>
    %c1_80 = arith.constant 1 : index
    %c0_81 = arith.constant 0 : index
    %c0_82 = arith.constant 0 : index
    %95 = vector.load %arg4[%c1_80, %c0_81, %c0_82] : memref<3x16x16xf32, #tpu.memory_space<vmem>>, vector<1x16x16xf32>
    %96 = vector.shape_cast %95 : vector<1x16x16xf32> to vector<16x16xf32>
    %cst_83 = arith.constant dense<0.000000e+00> : vector<16x64xf32>
    %97 = tpu.matmul %96, %94, %cst_83 {dimension_numbers = #tpu.dot_dimension_numbers<[1], [0], [0], [1], [0, 0, 1, 1], [], []>} : vector<16x16xf32>, vector<16x64xf32>, vector<16x64xf32> -> vector<16x64xf32>
    %98 = arith.addf %91, %97 : vector<16x64xf32>
    %c2_84 = arith.constant 2 : index
    %c0_85 = arith.constant 0 : index
    %c0_86 = arith.constant 0 : index
    %99 = vector.load %arg9[%c2_84, %c0_85, %c0_86] : memref<3x64x64xbf16, #tpu.memory_space<vmem>>, vector<1x64x64xbf16>
    %100 = vector.shape_cast %99 : vector<1x64x64xbf16> to vector<64x64xbf16>
    %cst_87 = arith.constant dense<0.000000e+00> : vector<16x64xf32>
    %101 = tpu.matmul %82, %100, %cst_87 {dimension_numbers = #tpu.dot_dimension_numbers<[1], [0], [0], [1], [0, 0, 1, 1], [], []>} : vector<16x64xbf16>, vector<64x64xbf16>, vector<16x64xf32> -> vector<16x64xf32>
    %c2_88 = arith.constant 2 : index
    %c0_89 = arith.constant 0 : index
    %c0_90 = arith.constant 0 : index
    %102 = vector.load %arg4[%c2_88, %c0_89, %c0_90] : memref<3x16x16xf32, #tpu.memory_space<vmem>>, vector<1x16x16xf32>
    %103 = vector.shape_cast %102 : vector<1x16x16xf32> to vector<16x16xf32>
    %cst_91 = arith.constant dense<0.000000e+00> : vector<16x64xf32>
    %104 = tpu.matmul %103, %101, %cst_91 {dimension_numbers = #tpu.dot_dimension_numbers<[1], [0], [0], [1], [0, 0, 1, 1], [], []>} : vector<16x16xf32>, vector<16x64xf32>, vector<16x64xf32> -> vector<16x64xf32>
    %105 = arith.addf %98, %104 : vector<16x64xf32>
    %cst_92 = arith.constant 0.000000e+00 : f32
    %106 = vector.broadcast %cst_92 : f32 to vector<16x64xf32>
    %107 = arith.cmpf oge, %105, %106 : vector<16x64xf32>
    %cst_93 = arith.constant 0.00999999977 : f32
    %108 = vector.broadcast %cst_93 : f32 to vector<16x64xf32>
    %109 = arith.mulf %108, %105 : vector<16x64xf32>
    %110 = arith.select %107, %105, %109 : vector<16x64xi1>, vector<16x64xf32>
    %c0_94 = arith.constant 0 : index
    %c0_95 = arith.constant 0 : index
    %111 = vector.load %arg11[%c0_94, %c0_95] : memref<1x64xf32, #tpu.memory_space<vmem>>, vector<1x64xf32>
    %c0_96 = arith.constant 0 : index
    %c0_97 = arith.constant 0 : index
    %112 = vector.load %arg12[%c0_96, %c0_97] : memref<1x64xf32, #tpu.memory_space<vmem>>, vector<1x64xf32>
    %cst_98 = arith.constant dense<0.000000e+00> : vector<16x64xf32>
    %113 = tpu.matmul %110, %25, %cst_98 {dimension_numbers = #tpu.dot_dimension_numbers<[1], [0], [0], [1], [0, 0, 1, 1], [], []>} : vector<16x64xf32>, vector<64x64xf32>, vector<16x64xf32> -> vector<16x64xf32>
    %cst_99 = arith.constant dense<0.000000e+00> : vector<64xf32>
    %114 = vector.multi_reduction <add>, %113, %cst_99 [0] : vector<16x64xf32> to vector<64xf32>
    %115 = vector.shape_cast %114 : vector<64xf32> to vector<1x64xf32>
    %116 = arith.mulf %110, %110 : vector<16x64xf32>
    %cst_100 = arith.constant dense<0.000000e+00> : vector<16x64xf32>
    %117 = tpu.matmul %116, %25, %cst_100 {dimension_numbers = #tpu.dot_dimension_numbers<[1], [0], [0], [1], [0, 0, 1, 1], [], []>} : vector<16x64xf32>, vector<64x64xf32>, vector<16x64xf32> -> vector<16x64xf32>
    %cst_101 = arith.constant dense<0.000000e+00> : vector<64xf32>
    %118 = vector.multi_reduction <add>, %117, %cst_101 [0] : vector<16x64xf32> to vector<64xf32>
    %119 = vector.shape_cast %118 : vector<64xf32> to vector<1x64xf32>
    %cst_102 = arith.constant 7.812500e-03 : f32
    %120 = vector.broadcast %cst_102 : f32 to vector<1x64xf32>
    %121 = arith.mulf %115, %120 : vector<1x64xf32>
    %cst_103 = arith.constant 7.812500e-03 : f32
    %122 = vector.broadcast %cst_103 : f32 to vector<1x64xf32>
    %123 = arith.mulf %119, %122 : vector<1x64xf32>
    %124 = arith.mulf %121, %121 : vector<1x64xf32>
    %125 = arith.subf %123, %124 : vector<1x64xf32>
    %cst_104 = arith.constant 0.000000e+00 : f32
    %126 = vector.broadcast %cst_104 : f32 to vector<1x64xf32>
    %127 = arith.maximumf %125, %126 : vector<1x64xf32>
    %cst_105 = arith.constant 9.99999974E-6 : f32
    %128 = vector.broadcast %cst_105 : f32 to vector<1x64xf32>
    %129 = arith.addf %127, %128 : vector<1x64xf32>
    %130 = math.rsqrt %129 : vector<1x64xf32>
    %131 = arith.mulf %111, %130 : vector<1x64xf32>
    %132 = arith.mulf %121, %131 : vector<1x64xf32>
    %133 = arith.subf %112, %132 : vector<1x64xf32>
    %134 = vector.broadcast %131 : vector<1x64xf32> to vector<16x64xf32>
    %135 = arith.mulf %110, %134 : vector<16x64xf32>
    %136 = vector.broadcast %133 : vector<1x64xf32> to vector<16x64xf32>
    %137 = arith.addf %135, %136 : vector<16x64xf32>
    %c0_106 = arith.constant 0 : index
    %c0_107 = arith.constant 0 : index
    %138 = vector.load %arg14[%c0_106, %c0_107] : memref<16x64xf32, #tpu.memory_space<vmem>>, vector<16x64xf32>
    tpu.vector_store %arg14[%c0_106, %c0_107], %137 {strides = array<i32>} : memref<16x64xf32, #tpu.memory_space<vmem>>, vector<16x64xf32>,
    return
  }
}

module attributes {stable_mosaic.version = 11 : i64} {
  func.func @_block_kernel(%arg0: memref<16x64xf32, #tpu.memory_space<vmem>>, %arg1: memref<3x8x16xf32, #tpu.memory_space<vmem>>, %arg2: memref<3x64x64xbf16, #tpu.memory_space<vmem>>, %arg3: memref<1x64xf32, #tpu.memory_space<vmem>>, %arg4: memref<3x8x8xf32, #tpu.memory_space<vmem>>, %arg5: memref<3x64x64xbf16, #tpu.memory_space<vmem>>, %arg6: memref<1x64xf32, #tpu.memory_space<vmem>>, %arg7: memref<1x64xf32, #tpu.memory_space<vmem>>, %arg8: memref<1x64xf32, #tpu.memory_space<vmem>>, %arg9: memref<3x64x64xbf16, #tpu.memory_space<vmem>>, %arg10: memref<1x64xf32, #tpu.memory_space<vmem>>, %arg11: memref<1x64xf32, #tpu.memory_space<vmem>>, %arg12: memref<1x64xf32, #tpu.memory_space<vmem>>, %arg13: memref<64x64xf32, #tpu.memory_space<vmem>>, %arg14: memref<8x64xf32, #tpu.memory_space<vmem>>) attributes {dimension_semantics = [], scalar_prefetch = 0 : i64, scratch_operands = 0 : i64, tpu.core_type = #tpu.core_type<tc>} {
    %c0 = arith.constant 0 : index
    %c0_0 = arith.constant 0 : index
    %0 = vector.load %arg0[%c0, %c0_0] : memref<16x64xf32, #tpu.memory_space<vmem>>, vector<16x64xf32>
    %1 = arith.truncf %0 : vector<16x64xf32> to vector<16x64xbf16>
    %c0_1 = arith.constant 0 : index
    %c0_2 = arith.constant 0 : index
    %2 = vector.load %arg3[%c0_1, %c0_2] : memref<1x64xf32, #tpu.memory_space<vmem>>, vector<1x64xf32>
    %c0_3 = arith.constant 0 : index
    %c0_4 = arith.constant 0 : index
    %c0_5 = arith.constant 0 : index
    %3 = vector.load %arg2[%c0_3, %c0_4, %c0_5] : memref<3x64x64xbf16, #tpu.memory_space<vmem>>, vector<1x64x64xbf16>
    %4 = vector.shape_cast %3 : vector<1x64x64xbf16> to vector<64x64xbf16>
    %cst = arith.constant dense<0.000000e+00> : vector<16x64xf32>
    %5 = tpu.matmul %1, %4, %cst {dimension_numbers = #tpu.dot_dimension_numbers<[1], [0], [0], [1], [0, 0, 1, 1], [], []>} : vector<16x64xbf16>, vector<64x64xbf16>, vector<16x64xf32> -> vector<16x64xf32>
    %c0_6 = arith.constant 0 : index
    %c0_7 = arith.constant 0 : index
    %c0_8 = arith.constant 0 : index
    %6 = vector.load %arg1[%c0_6, %c0_7, %c0_8] : memref<3x8x16xf32, #tpu.memory_space<vmem>>, vector<1x8x16xf32>
    %7 = vector.shape_cast %6 : vector<1x8x16xf32> to vector<8x16xf32>
    %cst_9 = arith.constant dense<0.000000e+00> : vector<8x64xf32>
    %8 = tpu.matmul %7, %5, %cst_9 {dimension_numbers = #tpu.dot_dimension_numbers<[1], [0], [0], [1], [0, 0, 1, 1], [], []>} : vector<8x16xf32>, vector<16x64xf32>, vector<8x64xf32> -> vector<8x64xf32>
    %9 = vector.broadcast %2 : vector<1x64xf32> to vector<8x64xf32>
    %10 = arith.addf %9, %8 : vector<8x64xf32>
    %c1 = arith.constant 1 : index
    %c0_10 = arith.constant 0 : index
    %c0_11 = arith.constant 0 : index
    %11 = vector.load %arg2[%c1, %c0_10, %c0_11] : memref<3x64x64xbf16, #tpu.memory_space<vmem>>, vector<1x64x64xbf16>
    %12 = vector.shape_cast %11 : vector<1x64x64xbf16> to vector<64x64xbf16>
    %cst_12 = arith.constant dense<0.000000e+00> : vector<16x64xf32>
    %13 = tpu.matmul %1, %12, %cst_12 {dimension_numbers = #tpu.dot_dimension_numbers<[1], [0], [0], [1], [0, 0, 1, 1], [], []>} : vector<16x64xbf16>, vector<64x64xbf16>, vector<16x64xf32> -> vector<16x64xf32>
    %c1_13 = arith.constant 1 : index
    %c0_14 = arith.constant 0 : index
    %c0_15 = arith.constant 0 : index
    %14 = vector.load %arg1[%c1_13, %c0_14, %c0_15] : memref<3x8x16xf32, #tpu.memory_space<vmem>>, vector<1x8x16xf32>
    %15 = vector.shape_cast %14 : vector<1x8x16xf32> to vector<8x16xf32>
    %cst_16 = arith.constant dense<0.000000e+00> : vector<8x64xf32>
    %16 = tpu.matmul %15, %13, %cst_16 {dimension_numbers = #tpu.dot_dimension_numbers<[1], [0], [0], [1], [0, 0, 1, 1], [], []>} : vector<8x16xf32>, vector<16x64xf32>, vector<8x64xf32> -> vector<8x64xf32>
    %17 = arith.addf %10, %16 : vector<8x64xf32>
    %c2 = arith.constant 2 : index
    %c0_17 = arith.constant 0 : index
    %c0_18 = arith.constant 0 : index
    %18 = vector.load %arg2[%c2, %c0_17, %c0_18] : memref<3x64x64xbf16, #tpu.memory_space<vmem>>, vector<1x64x64xbf16>
    %19 = vector.shape_cast %18 : vector<1x64x64xbf16> to vector<64x64xbf16>
    %cst_19 = arith.constant dense<0.000000e+00> : vector<16x64xf32>
    %20 = tpu.matmul %1, %19, %cst_19 {dimension_numbers = #tpu.dot_dimension_numbers<[1], [0], [0], [1], [0, 0, 1, 1], [], []>} : vector<16x64xbf16>, vector<64x64xbf16>, vector<16x64xf32> -> vector<16x64xf32>
    %c2_20 = arith.constant 2 : index
    %c0_21 = arith.constant 0 : index
    %c0_22 = arith.constant 0 : index
    %21 = vector.load %arg1[%c2_20, %c0_21, %c0_22] : memref<3x8x16xf32, #tpu.memory_space<vmem>>, vector<1x8x16xf32>
    %22 = vector.shape_cast %21 : vector<1x8x16xf32> to vector<8x16xf32>
    %cst_23 = arith.constant dense<0.000000e+00> : vector<8x64xf32>
    %23 = tpu.matmul %22, %20, %cst_23 {dimension_numbers = #tpu.dot_dimension_numbers<[1], [0], [0], [1], [0, 0, 1, 1], [], []>} : vector<8x16xf32>, vector<16x64xf32>, vector<8x64xf32> -> vector<8x64xf32>
    %24 = arith.addf %17, %23 : vector<8x64xf32>
    %c0_24 = arith.constant 0 : index
    %c0_25 = arith.constant 0 : index
    %25 = vector.load %arg13[%c0_24, %c0_25] : memref<64x64xf32, #tpu.memory_space<vmem>>, vector<64x64xf32>
    %26 = arith.truncf %24 : vector<8x64xf32> to vector<8x64xbf16>
    %c0_26 = arith.constant 0 : index
    %c0_27 = arith.constant 0 : index
    %27 = vector.load %arg6[%c0_26, %c0_27] : memref<1x64xf32, #tpu.memory_space<vmem>>, vector<1x64xf32>
    %c0_28 = arith.constant 0 : index
    %c0_29 = arith.constant 0 : index
    %c0_30 = arith.constant 0 : index
    %28 = vector.load %arg5[%c0_28, %c0_29, %c0_30] : memref<3x64x64xbf16, #tpu.memory_space<vmem>>, vector<1x64x64xbf16>
    %29 = vector.shape_cast %28 : vector<1x64x64xbf16> to vector<64x64xbf16>
    %cst_31 = arith.constant dense<0.000000e+00> : vector<8x64xf32>
    %30 = tpu.matmul %26, %29, %cst_31 {dimension_numbers = #tpu.dot_dimension_numbers<[1], [0], [0], [1], [0, 0, 1, 1], [], []>} : vector<8x64xbf16>, vector<64x64xbf16>, vector<8x64xf32> -> vector<8x64xf32>
    %c0_32 = arith.constant 0 : index
    %c0_33 = arith.constant 0 : index
    %c0_34 = arith.constant 0 : index
    %31 = vector.load %arg4[%c0_32, %c0_33, %c0_34] : memref<3x8x8xf32, #tpu.memory_space<vmem>>, vector<1x8x8xf32>
    %32 = vector.shape_cast %31 : vector<1x8x8xf32> to vector<8x8xf32>
    %cst_35 = arith.constant dense<0.000000e+00> : vector<8x64xf32>
    %33 = tpu.matmul %32, %30, %cst_35 {dimension_numbers = #tpu.dot_dimension_numbers<[1], [0], [0], [1], [0, 0, 1, 1], [], []>} : vector<8x8xf32>, vector<8x64xf32>, vector<8x64xf32> -> vector<8x64xf32>
    %34 = vector.broadcast %27 : vector<1x64xf32> to vector<8x64xf32>
    %35 = arith.addf %34, %33 : vector<8x64xf32>
    %c1_36 = arith.constant 1 : index
    %c0_37 = arith.constant 0 : index
    %c0_38 = arith.constant 0 : index
    %36 = vector.load %arg5[%c1_36, %c0_37, %c0_38] : memref<3x64x64xbf16, #tpu.memory_space<vmem>>, vector<1x64x64xbf16>
    %37 = vector.shape_cast %36 : vector<1x64x64xbf16> to vector<64x64xbf16>
    %cst_39 = arith.constant dense<0.000000e+00> : vector<8x64xf32>
    %38 = tpu.matmul %26, %37, %cst_39 {dimension_numbers = #tpu.dot_dimension_numbers<[1], [0], [0], [1], [0, 0, 1, 1], [], []>} : vector<8x64xbf16>, vector<64x64xbf16>, vector<8x64xf32> -> vector<8x64xf32>
    %c1_40 = arith.constant 1 : index
    %c0_41 = arith.constant 0 : index
    %c0_42 = arith.constant 0 : index
    %39 = vector.load %arg4[%c1_40, %c0_41, %c0_42] : memref<3x8x8xf32, #tpu.memory_space<vmem>>, vector<1x8x8xf32>
    %40 = vector.shape_cast %39 : vector<1x8x8xf32> to vector<8x8xf32>
    %cst_43 = arith.constant dense<0.000000e+00> : vector<8x64xf32>
    %41 = tpu.matmul %40, %38, %cst_43 {dimension_numbers = #tpu.dot_dimension_numbers<[1], [0], [0], [1], [0, 0, 1, 1], [], []>} : vector<8x8xf32>, vector<8x64xf32>, vector<8x64xf32> -> vector<8x64xf32>
    %42 = arith.addf %35, %41 : vector<8x64xf32>
    %c2_44 = arith.constant 2 : index
    %c0_45 = arith.constant 0 : index
    %c0_46 = arith.constant 0 : index
    %43 = vector.load %arg5[%c2_44, %c0_45, %c0_46] : memref<3x64x64xbf16, #tpu.memory_space<vmem>>, vector<1x64x64xbf16>
    %44 = vector.shape_cast %43 : vector<1x64x64xbf16> to vector<64x64xbf16>
    %cst_47 = arith.constant dense<0.000000e+00> : vector<8x64xf32>
    %45 = tpu.matmul %26, %44, %cst_47 {dimension_numbers = #tpu.dot_dimension_numbers<[1], [0], [0], [1], [0, 0, 1, 1], [], []>} : vector<8x64xbf16>, vector<64x64xbf16>, vector<8x64xf32> -> vector<8x64xf32>
    %c2_48 = arith.constant 2 : index
    %c0_49 = arith.constant 0 : index
    %c0_50 = arith.constant 0 : index
    %46 = vector.load %arg4[%c2_48, %c0_49, %c0_50] : memref<3x8x8xf32, #tpu.memory_space<vmem>>, vector<1x8x8xf32>
    %47 = vector.shape_cast %46 : vector<1x8x8xf32> to vector<8x8xf32>
    %cst_51 = arith.constant dense<0.000000e+00> : vector<8x64xf32>
    %48 = tpu.matmul %47, %45, %cst_51 {dimension_numbers = #tpu.dot_dimension_numbers<[1], [0], [0], [1], [0, 0, 1, 1], [], []>} : vector<8x8xf32>, vector<8x64xf32>, vector<8x64xf32> -> vector<8x64xf32>
    %49 = arith.addf %42, %48 : vector<8x64xf32>
    %cst_52 = arith.constant 0.000000e+00 : f32
    %50 = vector.broadcast %cst_52 : f32 to vector<8x64xf32>
    %51 = arith.cmpf oge, %49, %50 : vector<8x64xf32>
    %cst_53 = arith.constant 0.00999999977 : f32
    %52 = vector.broadcast %cst_53 : f32 to vector<8x64xf32>
    %53 = arith.mulf %52, %49 : vector<8x64xf32>
    %54 = arith.select %51, %49, %53 : vector<8x64xi1>, vector<8x64xf32>
    %c0_54 = arith.constant 0 : index
    %c0_55 = arith.constant 0 : index
    %55 = vector.load %arg7[%c0_54, %c0_55] : memref<1x64xf32, #tpu.memory_space<vmem>>, vector<1x64xf32>
    %c0_56 = arith.constant 0 : index
    %c0_57 = arith.constant 0 : index
    %56 = vector.load %arg8[%c0_56, %c0_57] : memref<1x64xf32, #tpu.memory_space<vmem>>, vector<1x64xf32>
    %cst_58 = arith.constant dense<0.000000e+00> : vector<8x64xf32>
    %57 = tpu.matmul %54, %25, %cst_58 {dimension_numbers = #tpu.dot_dimension_numbers<[1], [0], [0], [1], [0, 0, 1, 1], [], []>} : vector<8x64xf32>, vector<64x64xf32>, vector<8x64xf32> -> vector<8x64xf32>
    %cst_59 = arith.constant dense<0.000000e+00> : vector<64xf32>
    %58 = vector.multi_reduction <add>, %57, %cst_59 [0] : vector<8x64xf32> to vector<64xf32>
    %59 = vector.shape_cast %58 : vector<64xf32> to vector<1x64xf32>
    %60 = arith.mulf %54, %54 : vector<8x64xf32>
    %cst_60 = arith.constant dense<0.000000e+00> : vector<8x64xf32>
    %61 = tpu.matmul %60, %25, %cst_60 {dimension_numbers = #tpu.dot_dimension_numbers<[1], [0], [0], [1], [0, 0, 1, 1], [], []>} : vector<8x64xf32>, vector<64x64xf32>, vector<8x64xf32> -> vector<8x64xf32>
    %cst_61 = arith.constant dense<0.000000e+00> : vector<64xf32>
    %62 = vector.multi_reduction <add>, %61, %cst_61 [0] : vector<8x64xf32> to vector<64xf32>
    %63 = vector.shape_cast %62 : vector<64xf32> to vector<1x64xf32>
    %cst_62 = arith.constant 3.125000e-02 : f32
    %64 = vector.broadcast %cst_62 : f32 to vector<1x64xf32>
    %65 = arith.mulf %59, %64 : vector<1x64xf32>
    %cst_63 = arith.constant 3.125000e-02 : f32
    %66 = vector.broadcast %cst_63 : f32 to vector<1x64xf32>
    %67 = arith.mulf %63, %66 : vector<1x64xf32>
    %68 = arith.mulf %65, %65 : vector<1x64xf32>
    %69 = arith.subf %67, %68 : vector<1x64xf32>
    %cst_64 = arith.constant 0.000000e+00 : f32
    %70 = vector.broadcast %cst_64 : f32 to vector<1x64xf32>
    %71 = arith.maximumf %69, %70 : vector<1x64xf32>
    %cst_65 = arith.constant 9.99999974E-6 : f32
    %72 = vector.broadcast %cst_65 : f32 to vector<1x64xf32>
    %73 = arith.addf %71, %72 : vector<1x64xf32>
    %74 = math.rsqrt %73 : vector<1x64xf32>
    %75 = arith.mulf %55, %74 : vector<1x64xf32>
    %76 = arith.mulf %65, %75 : vector<1x64xf32>
    %77 = arith.subf %56, %76 : vector<1x64xf32>
    %78 = vector.broadcast %75 : vector<1x64xf32> to vector<8x64xf32>
    %79 = arith.mulf %54, %78 : vector<8x64xf32>
    %80 = vector.broadcast %77 : vector<1x64xf32> to vector<8x64xf32>
    %81 = arith.addf %79, %80 : vector<8x64xf32>
    %82 = arith.truncf %81 : vector<8x64xf32> to vector<8x64xbf16>
    %c0_66 = arith.constant 0 : index
    %c0_67 = arith.constant 0 : index
    %83 = vector.load %arg10[%c0_66, %c0_67] : memref<1x64xf32, #tpu.memory_space<vmem>>, vector<1x64xf32>
    %c0_68 = arith.constant 0 : index
    %c0_69 = arith.constant 0 : index
    %c0_70 = arith.constant 0 : index
    %84 = vector.load %arg9[%c0_68, %c0_69, %c0_70] : memref<3x64x64xbf16, #tpu.memory_space<vmem>>, vector<1x64x64xbf16>
    %85 = vector.shape_cast %84 : vector<1x64x64xbf16> to vector<64x64xbf16>
    %cst_71 = arith.constant dense<0.000000e+00> : vector<8x64xf32>
    %86 = tpu.matmul %82, %85, %cst_71 {dimension_numbers = #tpu.dot_dimension_numbers<[1], [0], [0], [1], [0, 0, 1, 1], [], []>} : vector<8x64xbf16>, vector<64x64xbf16>, vector<8x64xf32> -> vector<8x64xf32>
    %c0_72 = arith.constant 0 : index
    %c0_73 = arith.constant 0 : index
    %c0_74 = arith.constant 0 : index
    %87 = vector.load %arg4[%c0_72, %c0_73, %c0_74] : memref<3x8x8xf32, #tpu.memory_space<vmem>>, vector<1x8x8xf32>
    %88 = vector.shape_cast %87 : vector<1x8x8xf32> to vector<8x8xf32>
    %cst_75 = arith.constant dense<0.000000e+00> : vector<8x64xf32>
    %89 = tpu.matmul %88, %86, %cst_75 {dimension_numbers = #tpu.dot_dimension_numbers<[1], [0], [0], [1], [0, 0, 1, 1], [], []>} : vector<8x8xf32>, vector<8x64xf32>, vector<8x64xf32> -> vector<8x64xf32>
    %90 = vector.broadcast %83 : vector<1x64xf32> to vector<8x64xf32>
    %91 = arith.addf %90, %89 : vector<8x64xf32>
    %c1_76 = arith.constant 1 : index
    %c0_77 = arith.constant 0 : index
    %c0_78 = arith.constant 0 : index
    %92 = vector.load %arg9[%c1_76, %c0_77, %c0_78] : memref<3x64x64xbf16, #tpu.memory_space<vmem>>, vector<1x64x64xbf16>
    %93 = vector.shape_cast %92 : vector<1x64x64xbf16> to vector<64x64xbf16>
    %cst_79 = arith.constant dense<0.000000e+00> : vector<8x64xf32>
    %94 = tpu.matmul %82, %93, %cst_79 {dimension_numbers = #tpu.dot_dimension_numbers<[1], [0], [0], [1], [0, 0, 1, 1], [], []>} : vector<8x64xbf16>, vector<64x64xbf16>, vector<8x64xf32> -> vector<8x64xf32>
    %c1_80 = arith.constant 1 : index
    %c0_81 = arith.constant 0 : index
    %c0_82 = arith.constant 0 : index
    %95 = vector.load %arg4[%c1_80, %c0_81, %c0_82] : memref<3x8x8xf32, #tpu.memory_space<vmem>>, vector<1x8x8xf32>
    %96 = vector.shape_cast %95 : vector<1x8x8xf32> to vector<8x8xf32>
    %cst_83 = arith.constant dense<0.000000e+00> : vector<8x64xf32>
    %97 = tpu.matmul %96, %94, %cst_83 {dimension_numbers = #tpu.dot_dimension_numbers<[1], [0], [0], [1], [0, 0, 1, 1], [], []>} : vector<8x8xf32>, vector<8x64xf32>, vector<8x64xf32> -> vector<8x64xf32>
    %98 = arith.addf %91, %97 : vector<8x64xf32>
    %c2_84 = arith.constant 2 : index
    %c0_85 = arith.constant 0 : index
    %c0_86 = arith.constant 0 : index
    %99 = vector.load %arg9[%c2_84, %c0_85, %c0_86] : memref<3x64x64xbf16, #tpu.memory_space<vmem>>, vector<1x64x64xbf16>
    %100 = vector.shape_cast %99 : vector<1x64x64xbf16> to vector<64x64xbf16>
    %cst_87 = arith.constant dense<0.000000e+00> : vector<8x64xf32>
    %101 = tpu.matmul %82, %100, %cst_87 {dimension_numbers = #tpu.dot_dimension_numbers<[1], [0], [0], [1], [0, 0, 1, 1], [], []>} : vector<8x64xbf16>, vector<64x64xbf16>, vector<8x64xf32> -> vector<8x64xf32>
    %c2_88 = arith.constant 2 : index
    %c0_89 = arith.constant 0 : index
    %c0_90 = arith.constant 0 : index
    %102 = vector.load %arg4[%c2_88, %c0_89, %c0_90] : memref<3x8x8xf32, #tpu.memory_space<vmem>>, vector<1x8x8xf32>
    %103 = vector.shape_cast %102 : vector<1x8x8xf32> to vector<8x8xf32>
    %cst_91 = arith.constant dense<0.000000e+00> : vector<8x64xf32>
    %104 = tpu.matmul %103, %101, %cst_91 {dimension_numbers = #tpu.dot_dimension_numbers<[1], [0], [0], [1], [0, 0, 1, 1], [], []>} : vector<8x8xf32>, vector<8x64xf32>, vector<8x64xf32> -> vector<8x64xf32>
    %105 = arith.addf %98, %104 : vector<8x64xf32>
    %cst_92 = arith.constant 0.000000e+00 : f32
    %106 = vector.broadcast %cst_92 : f32 to vector<8x64xf32>
    %107 = arith.cmpf oge, %105, %106 : vector<8x64xf32>
    %cst_93 = arith.constant 0.00999999977 : f32
    %108 = vector.broadcast %cst_93 : f32 to vector<8x64xf32>
    %109 = arith.mulf %108, %105 : vector<8x64xf32>
    %110 = arith.select %107, %105, %109 : vector<8x64xi1>, vector<8x64xf32>
    %c0_94 = arith.constant 0 : index
    %c0_95 = arith.constant 0 : index
    %111 = vector.load %arg11[%c0_94, %c0_95] : memref<1x64xf32, #tpu.memory_space<vmem>>, vector<1x64xf32>
    %c0_96 = arith.constant 0 : index
    %c0_97 = arith.constant 0 : index
    %112 = vector.load %arg12[%c0_96, %c0_97] : memref<1x64xf32, #tpu.memory_space<vmem>>, vector<1x64xf32>
    %cst_98 = arith.constant dense<0.000000e+00> : vector<8x64xf32>
    %113 = tpu.matmul %110, %25, %cst_98 {dimension_numbers = #tpu.dot_dimension_numbers<[1], [0], [0], [1], [0, 0, 1, 1], [], []>} : vector<8x64xf32>, vector<64x64xf32>, vector<8x64xf32> -> vector<8x64xf32>
    %cst_99 = arith.constant dense<0.000000e+00> : vector<64xf32>
    %114 = vector.multi_reduction <add>, %113, %cst_99 [0] : vector<8x64xf32> to vector<64xf32>
    %115 = vector.shape_cast %114 : vector<64xf32> to vector<1x64xf32>
    %116 = arith.mulf %110, %110 : vector<8x64xf32>
    %cst_100 = arith.constant dense<0.000000e+00> : vector<8x64xf32>
    %117 = tpu.matmul %116, %25, %cst_100 {dimension_numbers = #tpu.dot_dimension_numbers<[1], [0], [0], [1], [0, 0, 1, 1], [], []>} : vector<8x64xf32>, vector<64x64xf32>, vector<8x64xf32> -> vector<8x64xf32>
    %cst_101 = arith.constant dense<0.000000e+00> : vector<64xf32>
    %118 = vector.multi_reduction <add>, %117, %cst_101 [0] : vector<8x64xf32> to vector<64xf32>
    %119 = vector.shape_cast %118 : vector<64xf32> to vector<1x64xf32>
    %cst_102 = arith.constant 3.125000e-02 : f32
    %120 = vector.broadcast %cst_102 : f32 to vector<1x64xf32>
    %121 = arith.mulf %115, %120 : vector<1x64xf32>
    %cst_103 = arith.constant 3.125000e-02 : f32
    %122 = vector.broadcast %cst_103 : f32 to vector<1x64xf32>
    %123 = arith.mulf %119, %122 : vector<1x64xf32>
    %124 = arith.mulf %121, %121 : vector<1x64xf32>
    %125 = arith.subf %123, %124 : vector<1x64xf32>
    %cst_104 = arith.constant 0.000000e+00 : f32
    %126 = vector.broadcast %cst_104 : f32 to vector<1x64xf32>
    %127 = arith.maximumf %125, %126 : vector<1x64xf32>
    %cst_105 = arith.constant 9.99999974E-6 : f32
    %128 = vector.broadcast %cst_105 : f32 to vector<1x64xf32>
    %129 = arith.addf %127, %128 : vector<1x64xf32>
    %130 = math.rsqrt %129 : vector<1x64xf32>
    %131 = arith.mulf %111, %130 : vector<1x64xf32>
    %132 = arith.mulf %121, %131 : vector<1x64xf32>
    %133 = arith.subf %112, %132 : vector<1x64xf32>
    %134 = vector.broadcast %131 : vector<1x64xf32> to vector<8x64xf32>
    %135 = arith.mulf %110, %134 : vector<8x64xf32>
    %136 = vector.broadcast %133 : vector<1x64xf32> to vector<8x64xf32>
    %137 = arith.addf %135, %136 : vector<8x64xf32>
    %c0_106 = arith.constant 0 : index
    %c0_107 = arith.constant 0 : index
    %138 = vector.load %arg14[%c0_106, %c0_107] : memref<8x64xf32, #tpu.memory_space<vmem>>, vector<8x64xf32>
    tpu.vector_store %arg14[%c0_106, %c0_107], %137 {strides = array<i32>} : memref<8x64xf32, #tpu.memory_space<vmem>>, vector<8x64xf32>,
    return
  }
}

</mosaic_0001>

<bundles_post_ra>
// kernel: encoder_forward.3
= control target key start
LH: loop header
LB: loop body
LE: loop exit
PB: predicated region body
PF: predicated region fallthrough
CT: control target
= control target key end

     0   :  { %vm94_vm0 = vcmask 523264   ;;  %vm154_vm1 = vcmask 261120   ;;  %s3105_s2 = inlined_call_operand.vmem [shape: bf16[3,64,128], index: 2, kind: input, shape index: {}]   ;;  %s3106_s0 = inlined_call_operand.vmem [shape: f32[32,64], index: 0, kind: input, shape index: {}]   ;;  %s3107_s1 = inlined_call_operand.vmem [shape: f32[3,32,32], index: 1, kind: input, shape index: {}]   ;;  %s3108_s10 = inlined_call_operand.vmem [shape: f32[128,128], index: 10, kind: input, shape index: {}]   ;;  %s3109_s3 = inlined_call_operand.vmem [shape: f32[1,128], index: 3, kind: input, shape index: {}]   ;;  %s3110_s6 = inlined_call_operand.vmem [shape: bf16[3,128,128], index: 6, kind: input, shape index: {}]   ;;  %s3111_s4 = inlined_call_operand.vmem [shape: f32[1,128], index: 4, kind: input, shape index: {}]   ;;  %s3112_s5 = inlined_call_operand.vmem [shape: f32[1,128], index: 5, kind: input, shape index: {}]   ;;  %s3113_s7 = inlined_call_operand.vmem [shape: f32[1,128], index: 7, kind: input, shape index: {}]   ;;  %s3114_s8 = inlined_call_operand.vmem [shape: f32[1,128], index: 8, kind: input, shape index: {}]   ;;  %s3115_s9 = inlined_call_operand.vmem [shape: f32[1,128], index: 9, kind: input, shape index: {}]   ;;  %s3116_s11 = inlined_call_operand.vmem [shape: f32[32,128], index: 11, kind: output, shape index: {}]  }
   0x1   :  { %v2567_v0 = vld [vmem:[%s3105_s2] sm:$0xff]   ;;  %v2568_v1 = vld [vmem:[%s3105_s2 + $0x8] sm:$0xff]   ;;  %v2569_v2 = vld [vmem:[%s3105_s2 + $0x10] sm:$0xff]  }
   0x2   :  { %2035 = vmatprep.subr.bf16.mxu0 %v2567_v0  ;;  %v39_v3 = vld [vmem:[%s3106_s0] sm:$0xff]  ;;  %v40_v4 = vld [vmem:[%s3106_s0 + $0x8] sm:$0xff]  ;;  %v2570_v6 = vld [vmem:[%s3105_s2 + $0x18] sm:$0xff]  }
   0x3   :  { %2036 = vmatpush3.bf16.msra.mxu0 %v2567_v0  ;;  %v59_v5 = vpack.c.bf16 %v40_v4, %v39_v3  ;;  %v41_v7 = vld [vmem:[%s3106_s0 + $0x10] sm:$0xff]  ;;  %v42_v8 = vld [vmem:[%s3106_s0 + $0x18] sm:$0xff]  ;;  %v2697_v10 = vld [vmem:[%s3107_s1] sm:$0xff] }
   0x4   :  { %2037 = vmatprep.subr.bf16.mxu0 %v2568_v1  ;;  %v60_v9 = vpack.c.bf16 %v42_v8, %v41_v7  ;;  %2055 = vmatprep.mubr.msk.f32.mxu1 %vm154_vm1, %v2697_v10  ;;  %v2573_v11 = vld [vmem:[%s3105_s2 + $0x40] sm:$0xff]   ;;  %v2575_v12 = vld [vmem:[%s3105_s2 + $0x48] sm:$0xff]   ;;  %v2577_v13 = vld [vmem:[%s3105_s2 + $0x50] sm:$0xff]  }
   0x5   :  { %2043 = vmatprep.mubr.msk.bf16.mxu0 %vm94_vm0, %v59_v5  ;;  %v2578_v14 = vld [vmem:[%s3105_s2 + $0x58] sm:$0xff]   ;;  %v2571_v21 = vld [vmem:[%s3105_s2 + $0x20] sm:$0xff]   ;;  %v2720_v22 = vld [vmem:[%s3107_s1 + $0x8] sm:$0xff] }
   0x6   :  { %v2572_v23 = vld [vmem:[%s3105_s2 + $0x28] sm:$0xff]   ;;  %v2728_v24 = vld [vmem:[%s3107_s1 + $0x10] sm:$0xff]  ;;  %v2737_v25 = vld [vmem:[%s3107_s1 + $0x18] sm:$0xff] }
   0x7   :  { %2038 = vmatpush3.bf16.msra.mxu0 %v2568_v1  ;;  %v2574_v26 = vld [vmem:[%s3105_s2 + $0x30] sm:$0xff]   ;;  %v2576_v27 = vld [vmem:[%s3105_s2 + $0x38] sm:$0xff]   ;;  %v2752_v34 = vld [vmem:[%s3107_s1 + $0x20] sm:$0xff] }
   0x8   :  { %2039 = vmatprep.subr.bf16.mxu0 %v2569_v2  ;;  %v43_v35 = vld [vmem:[%s3108_s10] sm:$0xff]  ;;  %v44_v36 = vld [vmem:[%s3108_s10 + $0x8] sm:$0xff]  ;;  %v45_v37 = vld [vmem:[%s3108_s10 + $0x10] sm:$0xff] }
   0x9   :  { %v2765_v38 = vpack.c.bf16 %v44_v36, %v43_v35  ;;  %v46_v39 = vld [vmem:[%s3108_s10 + $0x18] sm:$0xff]  ;;  %v47_v41 = vld [vmem:[%s3108_s10 + $0x20] sm:$0xff]  ;;  %v48_v42 = vld [vmem:[%s3108_s10 + $0x28] sm:$0xff] }
   0xa   :  { %v2770_v40 = vpack.c.bf16 %v46_v39, %v45_v37  ;;  %v2781_v43 = vpack.c.bf16 %v48_v42, %v47_v41  ;;  %v49_v44 = vld [vmem:[%s3108_s10 + $0x30] sm:$0xff]  ;;  %v50_v45 = vld [vmem:[%s3108_s10 + $0x38] sm:$0xff]  ;;  %v51_v47 = vld [vmem:[%s3108_s10 + $0x40] sm:$0xff] }
   0xb   :  { %2040 = vmatpush3.bf16.msra.mxu0 %v2569_v2  ;;  %v2791_v46 = vpack.c.bf16 %v50_v45, %v49_v44  ;;  %v52_v48 = vld [vmem:[%s3108_s10 + $0x48] sm:$0xff]  ;;  %v53_v50 = vld [vmem:[%s3108_s10 + $0x50] sm:$0xff]  ;;  %v54_v51 = vld [vmem:[%s3108_s10 + $0x58] sm:$0xff] }
   0xc   :  { %2041 = vmatprep.subr.bf16.mxu0 %v2570_v6  ;;  %v2801_v49 = vpack.c.bf16 %v52_v48, %v51_v47  ;;  %v2811_v52 = vpack.c.bf16 %v54_v51, %v53_v50  ;;  %v2819_v59 = vld [vmem:[%s3107_s1 + $0x28] sm:$0xff]  ;;  %v2824_v60 = vld [vmem:[%s3107_s1 + $0x30] sm:$0xff]  ;;  %v2833_v61 = vld [vmem:[%s3107_s1 + $0x38] sm:$0xff] }
   0xd   :  { %v2838_v62 = vld [vmem:[%s3107_s1 + $0x40] sm:$0xff]  ;;  %v2847_v63 = vld [vmem:[%s3107_s1 + $0x48] sm:$0xff]  ;;  %v2852_v0 = vld [vmem:[%s3107_s1 + $0x50] sm:$0xff] }
   0xe   :  { %v2862_v1 = vld [vmem:[%s3107_s1 + $0x58] sm:$0xff]  ;;  %v55_v2 = vld [vmem:[%s3108_s10 + $0x60] sm:$0xff]  ;;  %v56_v3 = vld [vmem:[%s3108_s10 + $0x68] sm:$0xff] }
   0xf   :  { %2042 = vmatpush3.bf16.msra.mxu0 %v2570_v6  ;;  %v2883_v4 = vpack.c.bf16 %v56_v3, %v55_v2  ;;  %v58_v6 = vld [vmem:[%s3108_s10 + $0x78] sm:$0xff]  ;;  %v1745_v8 = vld [vmem:[%s3109_s3] ss:$0 sm:$0xff]  ;;  %v2580_v35 = vld [vmem:[%s3110_s6 + $0x8] sm:$0xff]  }
  0x10   :  { %2087 = vmatprep.subr.bf16.mxu0 %v2573_v11  ;;  %v2581_v36 = vld [vmem:[%s3110_s6 + $0x10] sm:$0xff]   ;;  %v2583_v37 = vld [vmem:[%s3110_s6 + $0x20] sm:$0xff]   ;;  %v2584_v39 = vld [vmem:[%s3110_s6 + $0x28] sm:$0xff]  }
  0x11   :  { %v2585_v41 = vld [vmem:[%s3110_s6 + $0x30] sm:$0xff]   ;;  %v2586_v42 = vld [vmem:[%s3110_s6 + $0x38] sm:$0xff]   ;;  %v2587_v44 = vld [vmem:[%s3110_s6 + $0x80] sm:$0xff]  }
  0x12   :  { %2044 = vmatmul.mubr.msk.bf16.vlgmr.msra.gmra.mrb[0].mxu0 %vm94_vm0, %v60_v9 }
  0x13   :  { %2095 = vmatprep.mubr.msk.bf16.mxu0 %vm94_vm0, %v59_v5  ;;  %2088 = vmatpush3.bf16.msra.mxu0 %v2573_v11 }
  0x14   :  { %2089 = vmatprep.subr.bf16.mxu0 %v2575_v12 }
  0x17   :  { %2090 = vmatpush3.bf16.msra.mxu0 %v2575_v12 }
  0x18   :  { %2091 = vmatprep.subr.bf16.mxu0 %v2577_v13 }
  0x1b   :  { %2092 = vmatpush3.bf16.msra.mxu0 %v2577_v13 }
  0x1c   :  { %2093 = vmatprep.subr.bf16.mxu0 %v2578_v14 }
  0x1f   :  { %2094 = vmatpush3.bf16.msra.mxu0 %v2578_v14 }
  0x20   :  { %2392 = vmatprep.subr.bf16.mxu0 %v2765_v38 }
  0x22   :  { %2096 = vmatmul.mubr.msk.bf16.vlgmr.msra.gmra.mrb[4].mxu0 %vm94_vm0, %v60_v9 }
  0x23   :  { %2394 = vmatpush3.bf16.msra.mxu0 %v2765_v38 }
  0x24   :  { %2396 = vmatprep.subr.bf16.mxu0 %v2770_v40 }
  0x27   :  { %2398 = vmatpush3.bf16.msra.mxu0 %v2770_v40 }
  0x28   :  { %2400 = vmatprep.subr.bf16.mxu0 %v2781_v43 }
  0x2b   :  { %2402 = vmatpush3.bf16.msra.mxu0 %v2781_v43 }
  0x2c   :  { %2404 = vmatprep.subr.bf16.mxu0 %v2791_v46 }
  0x2f   :  { %2406 = vmatpush3.bf16.msra.mxu0 %v2791_v46 }
  0x30   :  { %2408 = vmatprep.subr.bf16.mxu0 %v2801_v49 }
  0x33   :  { %2410 = vmatpush3.bf16.msra.mxu0 %v2801_v49 }
  0x34   :  { %2412 = vmatprep.subr.bf16.mxu0 %v2811_v52 }
  0x37   :  { %2414 = vmatpush3.bf16.msra.mxu0 %v2811_v52 }
  0x38   :  { %2416 = vmatprep.subr.bf16.mxu0 %v2883_v4 }
  0x3b   :  { %2418 = vmatpush3.bf16.msra.mxu0 %v2883_v4 }
  0xe5   :  { %v2045_v15 = vpop.f32.mrb[0].mxu0 }
  0xe6   :  { %v135_v16 = vpop.f32.mrb[1].mxu0 }
  0xe7   :  { %v2046_v17 = vpop.f32.mrb[2].mxu0 }
  0xe8   :  { %v2371_v18 = vpack.c.bf16 %v2046_v17, %v2045_v15  ;;  %v138_v19 = vpop.f32.mrb[3].mxu0 }
  0xe9   :  { %v2367_v20 = vpack.c.bf16 %v138_v19, %v135_v16 }
  0xeb   :  { %2368 = vmatprep.subr.bf16.mxu1 %v2367_v20 }
  0xec   :  { %2370 = vmatpush3.bf16.msra.mxu1 %v2367_v20 }
  0xed   :  { %2372 = vmatprep.subr.bf16.mxu1 %v2371_v18 }
  0xf0   :  { %2374 = vmatpush3.bf16.msra.mxu1 %v2371_v18 }
  0xf1   :  { %2061 = vmatprep.subr.bf16.mxu1 %v2571_v21 }
  0xf3   :  { %2056 = vmatmul.mubr.msk.f32.vlgmr.msra.gmra.mrb[0].mxu1 %vm154_vm1, %v2720_v22 }
  0xf4   :  { %2062 = vmatpush3.bf16.msra.mxu1 %v2571_v21  ;;  %2058 = vmatprep.mubr.msk.f32.mxu1 %vm154_vm1, %v2728_v24 }
  0xf5   :  { %2063 = vmatprep.subr.bf16.mxu1 %v2572_v23  ;;  %v2097_v28 = vpop.f32.mrb[4].mxu0 }
  0xf6   :  { %v517_v29 = vpop.f32.mrb[5].mxu0 }
  0xf7   :  { %2059 = vmatmul.mubr.msk.f32.gmra.mrb[2].mxu1 %vm154_vm1, %v2737_v25  ;;  %v2098_v30 = vpop.f32.mrb[6].mxu0 }
  0xf8   :  { %2064 = vmatpush3.bf16.msra.mxu1 %v2572_v23  ;;  %2069 = vmatprep.mubr.msk.bf16.mxu1 %vm94_vm0, %v59_v5  ;;  %v2387_v31 = vpack.c.bf16 %v2098_v30, %v2097_v28  ;;  %v520_v32 = vpop.f32.mrb[7].mxu0  ;;  %v57_v5 = vld [vmem:[%s3108_s10 + $0x70] sm:$0xff] }
  0xf9   :  { %2065 = vmatprep.subr.bf16.mxu1 %v2574_v26  ;;  %v2383_v33 = vpack.c.bf16 %v520_v32, %v517_v29  ;;  %v2895_v7 = vpack.c.bf16 %v58_v6, %v57_v5 }
  0xfb   :  { %2420 = vmatprep.subr.bf16.mxu0 %v2895_v7 }
  0xfc   :  { %2066 = vmatpush3.bf16.msra.mxu1 %v2574_v26  ;;  %2422 = vmatpush3.bf16.msra.mxu0 %v2895_v7 }
  0xfd   :  { %2067 = vmatprep.subr.bf16.mxu1 %v2576_v27 }
 0x100   :  { %2068 = vmatpush3.bf16.msra.mxu1 %v2576_v27 }
 0x103   :  { %2070 = vmatmul.mubr.msk.bf16.vlgmr.msra.gmra.mrb[4].mxu1 %vm94_vm0, %v60_v9 }
 0x104   :  { %2081 = vmatprep.mubr.msk.f32.mxu1 %vm154_vm1, %v2752_v34 }
 0x1d6   :  { %v2071_v53 = vpop.f32.mrb[4].mxu1 }
 0x1d7   :  { %v329_v54 = vpop.f32.mrb[5].mxu1 }
 0x1d8   :  { %v2072_v55 = vpop.f32.mrb[6].mxu1 }
 0x1d9   :  { %v2379_v56 = vpack.c.bf16 %v2072_v55, %v2071_v53  ;;  %v332_v57 = vpop.f32.mrb[7].mxu1 }
 0x1da   :  { %v2375_v58 = vpack.c.bf16 %v332_v57, %v329_v54 }
 0x1dc   :  { %2376 = vmatprep.subr.bf16.mxu1 %v2375_v58 }
 0x1dd   :  { %2378 = vmatpush3.bf16.msra.mxu1 %v2375_v58 }
 0x1de   :  { %2380 = vmatprep.subr.bf16.mxu1 %v2379_v56 }
 0x1e1   :  { %2382 = vmatpush3.bf16.msra.mxu1 %v2379_v56 }
 0x1e2   :  { %2384 = vmatprep.subr.bf16.mxu1 %v2383_v33 }
 0x1e4   :  { %2082 = vmatmul.mubr.msk.f32.vlgmr.msra.gmra.mrb[0].mxu1 %vm154_vm1, %v2819_v59 }
 0x1e5   :  { %2386 = vmatpush3.bf16.msra.mxu1 %v2383_v33  ;;  %2084 = vmatprep.mubr.msk.f32.mxu1 %vm154_vm1, %v2824_v60  ;;  %v2579_v33 = vld [vmem:[%s3110_s6] sm:$0xff]  }
 0x1e6   :  { %2388 = vmatprep.subr.bf16.mxu1 %v2387_v31  ;;  %2189 = vmatprep.subr.bf16.mxu0 %v2579_v33 }
 0x1e8   :  { %2085 = vmatmul.mubr.msk.f32.gmra.mrb[2].mxu1 %vm154_vm1, %v2833_v61 }
 0x1e9   :  { %2390 = vmatpush3.bf16.msra.mxu1 %v2387_v31  ;;  %2107 = vmatprep.mubr.msk.f32.mxu1 %vm154_vm1, %v2838_v62 }
 0x1ea   :  { %2424 = vmatprep.subr.bf16.mxu1 %v2765_v38 }
 0x1ec   :  { %2108 = vmatmul.mubr.msk.f32.vlgmr.msra.gmra.mrb[0].mxu1 %vm154_vm1, %v2847_v63 }
 0x1ed   :  { %2110 = vmatprep.mubr.msk.f32.mxu1 %vm154_vm1, %v2852_v0  ;;  %2426 = vmatpush3.bf16.msra.mxu1 %v2765_v38 }
 0x1ee   :  { %2428 = vmatprep.subr.bf16.mxu1 %v2770_v40 }
 0x1f0   :  { %2111 = vmatmul.mubr.msk.f32.gmra.mrb[2].mxu1 %vm154_vm1, %v2862_v1 }
 0x1f1   :  { %2430 = vmatpush3.bf16.msra.mxu1 %v2770_v40 }
 0x1f2   :  { %2432 = vmatprep.subr.bf16.mxu1 %v2781_v43 }
 0x1f5   :  { %2434 = vmatpush3.bf16.msra.mxu1 %v2781_v43 }
 0x1f6   :  { %2436 = vmatprep.subr.bf16.mxu1 %v2791_v46 }
 0x1f9   :  { %2438 = vmatpush3.bf16.msra.mxu1 %v2791_v46 }
 0x1fa   :  { %2440 = vmatprep.subr.bf16.mxu1 %v2801_v49 }
 0x1fd   :  { %2442 = vmatpush3.bf16.msra.mxu1 %v2801_v49 }
 0x1fe   :  { %2444 = vmatprep.subr.bf16.mxu1 %v2811_v52 }
 0x201   :  { %2446 = vmatpush3.bf16.msra.mxu1 %v2811_v52 }
 0x202   :  { %2448 = vmatprep.subr.bf16.mxu1 %v2883_v4 }
 0x205   :  { %2450 = vmatpush3.bf16.msra.mxu1 %v2883_v4 }
 0x206   :  { %2452 = vmatprep.subr.bf16.mxu1 %v2895_v7 }
 0x209   :  { %2454 = vmatpush3.bf16.msra.mxu1 %v2895_v7 }
 0x2bf   :  { %v2109_v9 = vpop.f32.mrb[0].mxu1 }
 0x2c0   :  { %v2543_v11 = vadd.f32 %v2109_v9, %v1745_v8  ;;  %v615_v12 = vpop.f32.mrb[1].mxu1 }
 0x2c1   :  { %v2544_v13 = vadd.f32 %v1745_v8, %v615_v12 }
 0x2c2   :  { %vm639_vm2 = vcmp.ge.f32.partialorder %v2543_v11, 0.0  ;;  %v643_v14 = vmul.f32 0.01, %v2543_v11 }
 0x2c3   :  { %v642_v15 = vmul.f32 0.01, %v2544_v13  ;;  %v2112_v16 = vpop.f32.mrb[2].mxu1  ;;  %vm638_vm3 = vcmp.ge.f32.partialorder %v2544_v13, 0.0 }
 0x2c4   :  { %v2545_v17 = vadd.f32 %v2112_v16, %v1745_v8  ;;  %v625_v18 = vpop.f32.mrb[3].mxu1  ;;  %v2904_v19 = vsel %vm639_vm2, %v2543_v11, %v643_v14 }
 0x2c5   :  { %v2546_v20 = vadd.f32 %v1745_v8, %v625_v18  ;;  %v2906_v21 = vsel %vm638_vm3, %v2544_v13, %v642_v15  ;;  %v747_v28 = vmul.f32 %v2904_v19, %v2904_v19 }
 0x2c6   :  { %v645_v23 = vmul.f32 0.01, %v2545_v17  ;;  %2145 = vmatprep.mubr.f32.mxu0 %v2906_v21  ;;  %v746_v26 = vmul.f32 %v2906_v21, %v2906_v21  ;;  %vm641_vm4 = vcmp.ge.f32.partialorder %v2545_v17, 0.0 }
 0x2c7   :  { %v644_v27 = vmul.f32 0.01, %v2546_v20  ;;  %2146 = vmatmul.mubr.f32.vlgmr.msra.gmra.mrb[8].mxu0 %v2904_v19  ;;  %vm640_vm5 = vcmp.ge.f32.partialorder %v2546_v20, 0.0 }
 0x2c8   :  { %2183 = vmatprep.mubr.f32.mxu1 %v746_v26  ;;  %v2914_v29 = vsel %vm641_vm4, %v2545_v17, %v645_v23  ;;  %2190 = vmatpush3.bf16.msra.mxu0 %v2579_v33  ;;  %v855_v33 = vlaneseq }
 0x2c9   :  { %2184 = vmatmul.mubr.f32.vlgmr.msra.gmra.mrb[8].mxu1 %v747_v28  ;;  %v2916_v30 = vsel %vm640_vm5, %v2546_v20, %v644_v27  ;;  %v749_v32 = vmul.f32 %v2914_v29, %v2914_v29  ;;  %2191 = vmatprep.subr.bf16.mxu0 %v2580_v35 }
 0x2ca   :  { %2148 = vmatprep.mubr.f32.mxu0 %v2916_v30  ;;  %v748_v31 = vmul.f32 %v2916_v30, %v2916_v30 }
 0x2cb   :  { %2149 = vmatmul.mubr.f32.gmra.mrb[10].mxu0 %v2914_v29 }
 0x2cc   :  { %2186 = vmatprep.mubr.f32.mxu1 %v748_v31  ;;  %2192 = vmatpush3.bf16.msra.mxu0 %v2580_v35  ;;  %v856_v35 = vshrl.u32 %v855_v33, 7 }
 0x2cd   :  { %2187 = vmatmul.mubr.f32.gmra.mrb[10].mxu1 %v749_v32  ;;  %2193 = vmatprep.subr.bf16.mxu0 %v2581_v36 }
 0x2ce   :  { %2217 = vmatprep.mubr.msk.f32.mxu1 %vm154_vm1, %v2697_v10  ;;  %v2582_v10 = vld [vmem:[%s3110_s6 + $0x18] sm:$0xff]  }
 0x2d0   :  { %2194 = vmatpush3.bf16.msra.mxu0 %v2581_v36  ;;  %v650_v36 = vld [vmem:[%s3111_s4] sm:$0x1] }
 0x2d1   :  { %2195 = vmatprep.subr.bf16.mxu0 %v2582_v10 }
 0x2d4   :  { %2196 = vmatpush3.bf16.msra.mxu0 %v2582_v10  ;;  %v2956_v10 = vsub.s32 0, %v856_v35 }
 0x2d5   :  { %2197 = vmatprep.subr.bf16.mxu0 %v2583_v37 }
 0x2d8   :  { %2198 = vmatpush3.bf16.msra.mxu0 %v2583_v37 }
 0x2d9   :  { %2199 = vmatprep.subr.bf16.mxu0 %v2584_v39 }
 0x2dc   :  { %2200 = vmatpush3.bf16.msra.mxu0 %v2584_v39 }
 0x2dd   :  { %2201 = vmatprep.subr.bf16.mxu0 %v2585_v41 }
 0x2e0   :  { %2202 = vmatpush3.bf16.msra.mxu0 %v2585_v41  ;;  %v651_v41 = vld [vmem:[%s3112_s5] sm:$0x1] }
 0x2e1   :  { %2203 = vmatprep.subr.bf16.mxu0 %v2586_v42 }
 0x2e4   :  { %2204 = vmatpush3.bf16.msra.mxu0 %v2586_v42 }
 0x2e5   :  { %2257 = vmatprep.subr.bf16.mxu0 %v2587_v44 }
 0x39a   :  { %v2147_v45 = vpop.f32.mrb[8].mxu0 }
 0x39b   :  { %v718_v47 = vpop.f32.mrb[9].mxu0 }
 0x39c   :  { %v737_v48 = vadd.f32 %v2147_v45, %v718_v47  ;;  %v2185_v50 = vpop.f32.mrb[8].mxu1 }
 0x39d   :  { %v816_v51 = vpop.f32.mrb[9].mxu1 }
 0x39e   :  { %v835_v53 = vadd.f32 %v2185_v50, %v816_v51  ;;  %v2150_v54 = vpop.f32.mrb[10].mxu0 }
 0x39f   :  { %v728_v55 = vpop.f32.mrb[11].mxu0 }
 0x3a0   :  { %v738_v56 = vadd.f32 %v737_v48, %v728_v55  ;;  %v2188_v57 = vpop.f32.mrb[10].mxu1 }
 0x3a1   :  { %v826_v58 = vpop.f32.mrb[11].mxu1 }
 0x3a2   :  { %v739_v2 = vadd.f32 %v2150_v54, %v738_v56  ;;  %v836_v3 = vadd.f32 %v835_v53, %v826_v58 }
 0x3a4   :  { %v740_v5 = vrot.slane %v739_v2, 4  ;;  %v837_v6 = vadd.f32 %v2188_v57, %v836_v3 }
 0x3a6   :  { %v741_v8 = vadd.f32 %v740_v5, %v739_v2  ;;  %v838_v9 = vrot.slane %v837_v6, 4  ;;  %v2593_v5 = vld [vmem:[%s3110_s6 + $0xb0] sm:$0xff]  }
 0x3a8   :  { %v742_v11 = vrot.slane %v741_v8, 2  ;;  %v839_v12 = vadd.f32 %v838_v9, %v837_v6  ;;  %v2594_v6 = vld [vmem:[%s3110_s6 + $0xb8] sm:$0xff]  }
 0x3aa   :  { %v743_v13 = vadd.f32 %v742_v11, %v741_v8  ;;  %v840_v14 = vrot.slane %v839_v12, 2 }
 0x3ac   :  { %v744_v15 = vrot.slane %v743_v13, 1  ;;  %v841_v16 = vadd.f32 %v840_v14, %v839_v12 }
 0x3ae   :  { %v745_v17 = vadd.f32 %v744_v15, %v743_v13  ;;  %v842_v18 = vrot.slane %v841_v16, 1  ;;  %v2595_v15 = vld [vmem:[%s3110_s6 + $0x40] sm:$0xff]  }
 0x3b0   :  { %v844_v20 = vmul.f32 0.001953125, %v745_v17  ;;  %v843_v23 = vadd.f32 %v842_v18, %v841_v16  ;;  %v2596_v16 = vld [vmem:[%s3110_s6 + $0x48] sm:$0xff]   ;;  %v2597_v17 = vld [vmem:[%s3110_s6 + $0x50] sm:$0xff]  }
 0x3b2   :  { %v846_v26 = vmul.f32 %v844_v20, %v844_v20  ;;  %v845_v27 = vmul.f32 0.001953125, %v843_v23 }
 0x3b4   :  { %v847_v28 = vsub.f32 %v845_v27, %v846_v26 }
 0x3b6   :  { %v848_v31 = vmax.f32 %v847_v28, 0.0 }
 0x3b8   :  { %v849_v32 = vadd.f32 1e-05, %v848_v31 }
 0x3ba   :  { %2603 = vrsqrt.f32 %v849_v32  ;;  %v2602_v32 = vld [vmem:[%s3110_s6 + $0x78] sm:$0xff]  }
 0x3c4   :  { %v2604_v37 = vpop.eup %2603 }
 0x3c5   :  { %v851_v39 = vmul.f32 %v2604_v37, %v650_v36 }
 0x3c7   :  { %v852_v42 = vmul.f32 %v851_v39, %v844_v20  ;;  %v858_v45 = vrot.slane %v851_v39, %v2956_v10  ;;  %v2601_v20 = vld [vmem:[%s3110_s6 + $0x70] sm:$0xff]  }
 0x3c9   :  { %v853_v47 = vsub.f32 %v651_v41, %v852_v42  ;;  %v860_v48 = vmul.f32 %v858_v45, %v2906_v21  ;;  %v861_v50 = vmul.f32 %v858_v45, %v2904_v19  ;;  %v862_v53 = vmul.f32 %v858_v45, %v2916_v30  ;;  %v2588_v21 = vld [vmem:[%s3110_s6 + $0x88] sm:$0xff]   ;;  %v2589_v19 = vld [vmem:[%s3110_s6 + $0x90] sm:$0xff]   ;;  %v2591_v30 = vld [vmem:[%s3110_s6 + $0xa0] sm:$0xff]  }
 0x3ca   :  { %v863_v54 = vmul.f32 %v858_v45, %v2914_v29  ;;  %v2590_v29 = vld [vmem:[%s3110_s6 + $0x98] sm:$0xff]  }
 0x3cb   :  { %v868_v51 = vrot.slane %v853_v47, %v2956_v10 }
 0x3cd   :  { %v870_v55 = vadd.f32 %v868_v51, %v860_v48  ;;  %v871_v56 = vadd.f32 %v868_v51, %v861_v50  ;;  %v872_v57 = vadd.f32 %v868_v51, %v862_v53  ;;  %v873_v58 = vadd.f32 %v868_v51, %v863_v54 }
 0x3cf   :  { %v2967_v2 = vpack.c.bf16 %v871_v56, %v870_v55  ;;  %v2969_v3 = vpack.c.bf16 %v873_v58, %v872_v57 }
 0x3d1   :  { %2205 = vmatprep.mubr.bf16.mxu0 %v2967_v2 }
 0x3d2   :  { %2206 = vmatmul.mubr.bf16.vlgmr.msra.gmra.mrb[12].mxu0 %v2969_v3 }
 0x3d3   :  { %2258 = vmatpush3.bf16.msra.mxu0 %v2587_v44  ;;  %2273 = vmatprep.mubr.bf16.mxu0 %v2967_v2  ;;  %v2592_v44 = vld [vmem:[%s3110_s6 + $0xa8] sm:$0xff]  }
 0x3d4   :  { %2259 = vmatprep.subr.bf16.mxu0 %v2588_v21 }
 0x3d7   :  { %2260 = vmatpush3.bf16.msra.mxu0 %v2588_v21 }
 0x3d8   :  { %2261 = vmatprep.subr.bf16.mxu0 %v2589_v19 }
 0x3db   :  { %2262 = vmatpush3.bf16.msra.mxu0 %v2589_v19 }
 0x3dc   :  { %2263 = vmatprep.subr.bf16.mxu0 %v2590_v29 }
 0x3df   :  { %2264 = vmatpush3.bf16.msra.mxu0 %v2590_v29 }
 0x3e0   :  { %2265 = vmatprep.subr.bf16.mxu0 %v2591_v30 }
 0x3e3   :  { %2266 = vmatpush3.bf16.msra.mxu0 %v2591_v30 }
 0x3e4   :  { %2267 = vmatprep.subr.bf16.mxu0 %v2592_v44 }
 0x3e7   :  { %2268 = vmatpush3.bf16.msra.mxu0 %v2592_v44 }
 0x3e8   :  { %2269 = vmatprep.subr.bf16.mxu0 %v2593_v5 }
 0x3eb   :  { %2270 = vmatpush3.bf16.msra.mxu0 %v2593_v5 }
 0x3ec   :  { %2271 = vmatprep.subr.bf16.mxu0 %v2594_v6 }
 0x3ef   :  { %2272 = vmatpush3.bf16.msra.mxu0 %v2594_v6 }
 0x3f0   :  { %2480 = vmatprep.subr.bf16.mxu0 %v2765_v38 }
 0x3f2   :  { %2274 = vmatmul.mubr.bf16.vlgmr.msra.gmra.mrb[16].mxu0 %v2969_v3 }
 0x3f3   :  { %2482 = vmatpush3.bf16.msra.mxu0 %v2765_v38 }
 0x3f4   :  { %2484 = vmatprep.subr.bf16.mxu0 %v2770_v40 }
 0x3f7   :  { %2486 = vmatpush3.bf16.msra.mxu0 %v2770_v40 }
 0x3f8   :  { %2488 = vmatprep.subr.bf16.mxu0 %v2781_v43 }
 0x3fb   :  { %2490 = vmatpush3.bf16.msra.mxu0 %v2781_v43 }
 0x3fc   :  { %2492 = vmatprep.subr.bf16.mxu0 %v2791_v46 }
 0x3ff   :  { %2494 = vmatpush3.bf16.msra.mxu0 %v2791_v46 }
 0x400   :  { %2496 = vmatprep.subr.bf16.mxu0 %v2801_v49 }
 0x403   :  { %2498 = vmatpush3.bf16.msra.mxu0 %v2801_v49 }
 0x404   :  { %2500 = vmatprep.subr.bf16.mxu0 %v2811_v52 }
 0x407   :  { %2502 = vmatpush3.bf16.msra.mxu0 %v2811_v52 }
 0x408   :  { %2504 = vmatprep.subr.bf16.mxu0 %v2883_v4 }
 0x40b   :  { %2506 = vmatpush3.bf16.msra.mxu0 %v2883_v4 }
 0x40c   :  { %2508 = vmatprep.subr.bf16.mxu0 %v2895_v7 }
 0x40f   :  { %2510 = vmatpush3.bf16.msra.mxu0 %v2895_v7 }
 0x4a5   :  { %v2207_v8 = vpop.f32.mrb[12].mxu0 }
 0x4a6   :  { %v975_v9 = vpop.f32.mrb[13].mxu0 }
 0x4a7   :  { %v2208_v11 = vpop.f32.mrb[14].mxu0 }
 0x4a8   :  { %v2459_v12 = vpack.c.bf16 %v2208_v11, %v2207_v8  ;;  %v978_v13 = vpop.f32.mrb[15].mxu0 }
 0x4a9   :  { %v2455_v14 = vpack.c.bf16 %v978_v13, %v975_v9 }
 0x4ab   :  { %2456 = vmatprep.subr.bf16.mxu1 %v2455_v14 }
 0x4ac   :  { %2458 = vmatpush3.bf16.msra.mxu1 %v2455_v14 }
 0x4ad   :  { %2460 = vmatprep.subr.bf16.mxu1 %v2459_v12 }
 0x4b0   :  { %2462 = vmatpush3.bf16.msra.mxu1 %v2459_v12 }
 0x4b1   :  { %2223 = vmatprep.subr.bf16.mxu1 %v2595_v15 }
 0x4b3   :  { %2218 = vmatmul.mubr.msk.f32.vlgmr.msra.gmra.mrb[12].mxu1 %vm154_vm1, %v2720_v22  ;;  %v2598_v22 = vld [vmem:[%s3110_s6 + $0x58] sm:$0xff]  }
 0x4b4   :  { %2224 = vmatpush3.bf16.msra.mxu1 %v2595_v15  ;;  %2220 = vmatprep.mubr.msk.f32.mxu1 %vm154_vm1, %v2728_v24  ;;  %v2599_v24 = vld [vmem:[%s3110_s6 + $0x60] sm:$0xff]  }
 0x4b5   :  { %2225 = vmatprep.subr.bf16.mxu1 %v2596_v16 }
 0x4b7   :  { %2221 = vmatmul.mubr.msk.f32.gmra.mrb[14].mxu1 %vm154_vm1, %v2737_v25  ;;  %v2600_v25 = vld [vmem:[%s3110_s6 + $0x68] sm:$0xff]  }
 0x4b8   :  { %2226 = vmatpush3.bf16.msra.mxu1 %v2596_v16  ;;  %2239 = vmatprep.mubr.bf16.mxu1 %v2967_v2 }
 0x4b9   :  { %2227 = vmatprep.subr.bf16.mxu1 %v2597_v17 }
 0x4bc   :  { %2228 = vmatpush3.bf16.msra.mxu1 %v2597_v17 }
 0x4bd   :  { %2229 = vmatprep.subr.bf16.mxu1 %v2598_v22 }
 0x4c0   :  { %2230 = vmatpush3.bf16.msra.mxu1 %v2598_v22 }
 0x4c1   :  { %2231 = vmatprep.subr.bf16.mxu1 %v2599_v24 }
 0x4c4   :  { %2232 = vmatpush3.bf16.msra.mxu1 %v2599_v24 }
 0x4c5   :  { %v2275_v18 = vpop.f32.mrb[16].mxu0  ;;  %2233 = vmatprep.subr.bf16.mxu1 %v2600_v25 }
 0x4c6   :  { %v1387_v23 = vpop.f32.mrb[17].mxu0 }
 0x4c7   :  { %v2276_v26 = vpop.f32.mrb[18].mxu0 }
 0x4c8   :  { %v2475_v27 = vpack.c.bf16 %v2276_v26, %v2275_v18  ;;  %v1390_v28 = vpop.f32.mrb[19].mxu0  ;;  %2234 = vmatpush3.bf16.msra.mxu1 %v2600_v25 }
 0x4c9   :  { %v2471_v31 = vpack.c.bf16 %v1390_v28, %v1387_v23  ;;  %2235 = vmatprep.subr.bf16.mxu1 %v2601_v20 }
 0x4cc   :  { %2236 = vmatpush3.bf16.msra.mxu1 %v2601_v20 }
 0x4cd   :  { %2237 = vmatprep.subr.bf16.mxu1 %v2602_v32 }
 0x4d0   :  { %2238 = vmatpush3.bf16.msra.mxu1 %v2602_v32  ;;  %v1504_v32 = vld [vmem:[%s3115_s9] sm:$0x1] }
 0x4d3   :  { %2240 = vmatmul.mubr.bf16.vlgmr.msra.gmra.mrb[16].mxu1 %v2969_v3 }
 0x4d4   :  { %2251 = vmatprep.mubr.msk.f32.mxu1 %vm154_vm1, %v2752_v34  ;;  %v1802_v34 = vld [vmem:[%s3113_s7] ss:$0 sm:$0xff] }
 0x5a6   :  { %v2241_v33 = vpop.f32.mrb[16].mxu1 }
 0x5a7   :  { %v1184_v35 = vpop.f32.mrb[17].mxu1 }
 0x5a8   :  { %v2242_v36 = vpop.f32.mrb[18].mxu1 }
 0x5a9   :  { %v2467_v37 = vpack.c.bf16 %v2242_v36, %v2241_v33  ;;  %v1187_v39 = vpop.f32.mrb[19].mxu1 }
 0x5aa   :  { %v2463_v41 = vpack.c.bf16 %v1187_v39, %v1184_v35 }
 0x5ac   :  { %2464 = vmatprep.subr.bf16.mxu1 %v2463_v41 }
 0x5ad   :  { %2466 = vmatpush3.bf16.msra.mxu1 %v2463_v41 }
 0x5ae   :  { %2468 = vmatprep.subr.bf16.mxu1 %v2467_v37 }
 0x5b1   :  { %2470 = vmatpush3.bf16.msra.mxu1 %v2467_v37 }
 0x5b2   :  { %2472 = vmatprep.subr.bf16.mxu1 %v2471_v31 }
 0x5b4   :  { %2252 = vmatmul.mubr.msk.f32.vlgmr.msra.gmra.mrb[12].mxu1 %vm154_vm1, %v2819_v59 }
 0x5b5   :  { %2474 = vmatpush3.bf16.msra.mxu1 %v2471_v31  ;;  %2254 = vmatprep.mubr.msk.f32.mxu1 %vm154_vm1, %v2824_v60 }
 0x5b6   :  { %2476 = vmatprep.subr.bf16.mxu1 %v2475_v27 }
 0x5b8   :  { %2255 = vmatmul.mubr.msk.f32.gmra.mrb[14].mxu1 %vm154_vm1, %v2833_v61 }
 0x5b9   :  { %2478 = vmatpush3.bf16.msra.mxu1 %v2475_v27  ;;  %2285 = vmatprep.mubr.msk.f32.mxu1 %vm154_vm1, %v2838_v62  ;;  %v1503_v27 = vld [vmem:[%s3114_s8] sm:$0x1] }
 0x5ba   :  { %2512 = vmatprep.subr.bf16.mxu1 %v2765_v38 }
 0x5bc   :  { %2286 = vmatmul.mubr.msk.f32.vlgmr.msra.gmra.mrb[12].mxu1 %vm154_vm1, %v2847_v63 }
 0x5bd   :  { %2288 = vmatprep.mubr.msk.f32.mxu1 %vm154_vm1, %v2852_v0  ;;  %2514 = vmatpush3.bf16.msra.mxu1 %v2765_v38 }
 0x5be   :  { %2516 = vmatprep.subr.bf16.mxu1 %v2770_v40 }
 0x5c0   :  { %2289 = vmatmul.mubr.msk.f32.gmra.mrb[14].mxu1 %vm154_vm1, %v2862_v1 }
 0x5c1   :  { %2518 = vmatpush3.bf16.msra.mxu1 %v2770_v40 }
 0x5c2   :  { %2520 = vmatprep.subr.bf16.mxu1 %v2781_v43 }
 0x5c5   :  { %2522 = vmatpush3.bf16.msra.mxu1 %v2781_v43 }
 0x5c6   :  { %2524 = vmatprep.subr.bf16.mxu1 %v2791_v46 }
 0x5c9   :  { %2526 = vmatpush3.bf16.msra.mxu1 %v2791_v46 }
 0x5ca   :  { %2528 = vmatprep.subr.bf16.mxu1 %v2801_v49 }
 0x5cd   :  { %2530 = vmatpush3.bf16.msra.mxu1 %v2801_v49 }
 0x5ce   :  { %2532 = vmatprep.subr.bf16.mxu1 %v2811_v52 }
 0x5d1   :  { %2534 = vmatpush3.bf16.msra.mxu1 %v2811_v52 }
 0x5d2   :  { %2536 = vmatprep.subr.bf16.mxu1 %v2883_v4 }
 0x5d5   :  { %2538 = vmatpush3.bf16.msra.mxu1 %v2883_v4 }
 0x5d6   :  { %2540 = vmatprep.subr.bf16.mxu1 %v2895_v7 }
 0x5d9   :  { %2542 = vmatpush3.bf16.msra.mxu1 %v2895_v7 }
 0x68f   :  { %v2287_v38 = vpop.f32.mrb[12].mxu1 }
 0x690   :  { %v2547_v40 = vadd.f32 %v2287_v38, %v1802_v34  ;;  %v1468_v43 = vpop.f32.mrb[13].mxu1 }
 0x691   :  { %v2548_v46 = vadd.f32 %v1802_v34, %v1468_v43 }
 0x692   :  { %vm1492_vm6 = vcmp.ge.f32.partialorder %v2547_v40, 0.0  ;;  %v1496_v49 = vmul.f32 0.01, %v2547_v40 }
 0x693   :  { %v1495_v59 = vmul.f32 0.01, %v2548_v46  ;;  %v2290_v52 = vpop.f32.mrb[14].mxu1  ;;  %vm1491_vm7 = vcmp.ge.f32.partialorder %v2548_v46, 0.0 }
 0x694   :  { %v2549_v60 = vadd.f32 %v2290_v52, %v1802_v34  ;;  %v1478_v61 = vpop.f32.mrb[15].mxu1  ;;  %v3079_v62 = vsel %vm1492_vm6, %v2547_v40, %v1496_v49 }
 0x695   :  { %v2550_v63 = vadd.f32 %v1802_v34, %v1478_v61  ;;  %v1499_v0 = vsel %vm1491_vm7, %v2548_v46, %v1495_v59  ;;  %v1600_v42 = vmul.f32 %v3079_v62, %v3079_v62 }
 0x696   :  { %v1498_v1 = vmul.f32 0.01, %v2549_v60  ;;  %2323 = vmatprep.mubr.f32.mxu0 %v1499_v0  ;;  %v1599_v4 = vmul.f32 %v1499_v0, %v1499_v0  ;;  %vm1494_vm8 = vcmp.ge.f32.partialorder %v2549_v60, 0.0 }
 0x697   :  { %v1497_v7 = vmul.f32 0.01, %v2550_v63  ;;  %2324 = vmatmul.mubr.f32.vlgmr.msra.gmra.mrb[20].mxu0 %v3079_v62  ;;  %vm1493_vm9 = vcmp.ge.f32.partialorder %v2550_v63, 0.0 }
 0x698   :  { %2361 = vmatprep.mubr.f32.mxu1 %v1599_v4  ;;  %v1502_v45 = vsel %vm1494_vm8, %v2549_v60, %v1498_v1 }
 0x699   :  { %2362 = vmatmul.mubr.f32.vlgmr.msra.gmra.mrb[20].mxu1 %v1600_v42  ;;  %v1501_v47 = vsel %vm1493_vm9, %v2550_v63, %v1497_v7  ;;  %v1602_v50 = vmul.f32 %v1502_v45, %v1502_v45 }
 0x69a   :  { %2326 = vmatprep.mubr.f32.mxu0 %v1501_v47  ;;  %v1601_v48 = vmul.f32 %v1501_v47, %v1501_v47 }
 0x69b   :  { %2327 = vmatmul.mubr.f32.gmra.mrb[22].mxu0 %v1502_v45 }
 0x69c   :  { %2364 = vmatprep.mubr.f32.mxu1 %v1601_v48 }
 0x69d   :  { %2365 = vmatmul.mubr.f32.gmra.mrb[22].mxu1 %v1602_v50 }
 0x76a   :  { %v2325_v51 = vpop.f32.mrb[20].mxu0 }
 0x76b   :  { %v1571_v53 = vpop.f32.mrb[21].mxu0 }
 0x76c   :  { %v1590_v54 = vadd.f32 %v2325_v51, %v1571_v53  ;;  %v2363_v55 = vpop.f32.mrb[20].mxu1 }
 0x76d   :  { %v1669_v56 = vpop.f32.mrb[21].mxu1 }
 0x76e   :  { %v1688_v57 = vadd.f32 %v2363_v55, %v1669_v56  ;;  %v2328_v58 = vpop.f32.mrb[22].mxu0 }
 0x76f   :  { %v1581_v2 = vpop.f32.mrb[23].mxu0 }
 0x770   :  { %v1591_v3 = vadd.f32 %v1590_v54, %v1581_v2  ;;  %v2366_v21 = vpop.f32.mrb[22].mxu1 }
 0x771   :  { %v1679_v19 = vpop.f32.mrb[23].mxu1 }
 0x772   :  { %v1592_v29 = vadd.f32 %v2328_v58, %v1591_v3  ;;  %v1689_v30 = vadd.f32 %v1688_v57, %v1679_v19 }
 0x774   :  { %v1593_v44 = vrot.slane %v1592_v29, 4  ;;  %v1690_v5 = vadd.f32 %v2366_v21, %v1689_v30 }
 0x776   :  { %v1594_v6 = vadd.f32 %v1593_v44, %v1592_v29  ;;  %v1691_v8 = vrot.slane %v1690_v5, 4 }
 0x778   :  { %v1595_v9 = vrot.slane %v1594_v6, 2  ;;  %v1692_v11 = vadd.f32 %v1691_v8, %v1690_v5 }
 0x77a   :  { %v1596_v12 = vadd.f32 %v1595_v9, %v1594_v6  ;;  %v1693_v13 = vrot.slane %v1692_v11, 2 }
 0x77c   :  { %v1597_v14 = vrot.slane %v1596_v12, 1  ;;  %v1694_v15 = vadd.f32 %v1693_v13, %v1692_v11 }
 0x77e   :  { %v1598_v16 = vadd.f32 %v1597_v14, %v1596_v12  ;;  %v1695_v17 = vrot.slane %v1694_v15, 1 }
 0x780   :  { %v1697_v22 = vmul.f32 0.001953125, %v1598_v16  ;;  %v1696_v24 = vadd.f32 %v1695_v17, %v1694_v15 }
 0x782   :  { %v1699_v25 = vmul.f32 %v1697_v22, %v1697_v22  ;;  %v1698_v18 = vmul.f32 0.001953125, %v1696_v24 }
 0x784   :  { %v1700_v20 = vsub.f32 %v1698_v18, %v1699_v25 }
 0x786   :  { %v1701_v23 = vmax.f32 %v1700_v20, 0.0 }
 0x788   :  { %v1702_v26 = vadd.f32 1e-05, %v1701_v23 }
 0x78a   :  { %2605 = vrsqrt.f32 %v1702_v26 }
 0x794   :  { %v2606_v28 = vpop.eup %2605 }
 0x795   :  { %v1704_v31 = vmul.f32 %v2606_v28, %v1503_v27 }
 0x797   :  { %v1705_v33 = vmul.f32 %v1704_v31, %v1697_v22  ;;  %v1711_v35 = vrot.slane %v1704_v31, %v2956_v10 }
 0x799   :  { %v1706_v36 = vsub.f32 %v1504_v32, %v1705_v33  ;;  %v1713_v37 = vmul.f32 %v1711_v35, %v1499_v0  ;;  %v1714_v39 = vmul.f32 %v1711_v35, %v3079_v62  ;;  %v1715_v41 = vmul.f32 %v1711_v35, %v1501_v47 }
 0x79a   :  { %v1716_v34 = vmul.f32 %v1711_v35, %v1502_v45 }
 0x79b   :  { %v1721_v38 = vrot.slane %v1706_v36, %v2956_v10 }
 0x79d   :  { %v1723_v40 = vadd.f32 %v1721_v38, %v1713_v37  ;;  %v1724_v43 = vadd.f32 %v1721_v38, %v1714_v39  ;;  %v1725_v46 = vadd.f32 %v1721_v38, %v1715_v41  ;;  %v1726_v49 = vadd.f32 %v1721_v38, %v1716_v34 }
 0x79f   :  { %1727 = vst [vmem:[%s3116_s11] sm:$0xff] %v1723_v40  ;;  %1728 = vst [vmem:[%s3116_s11 + $0x8] sm:$0xff] %v1724_v43 }
 0x7a0   :  { %1729 = vst [vmem:[%s3116_s11 + $0x10] sm:$0xff] %v1725_v46  ;;  %1730 = vst [vmem:[%s3116_s11 + $0x18] sm:$0xff] %v1726_v49 }

// kernel: encoder_forward.5
= control target key start
LH: loop header
LB: loop body
LE: loop exit
PB: predicated region body
PF: predicated region fallthrough
CT: control target
= control target key end

     0   :  { %v2368_v0 = vmov 0.0   ;;  %vm2369_vm0 = vmmov 0   ;;  %vm84_vm1 = vcmask 523264   ;;  %v2370_v8 = vmov 0.0|0.0   ;;  %s2800_s2 = inlined_call_operand.vmem [shape: bf16[3,64,64], index: 2, kind: input, shape index: {}]   ;;  %s2801_s0 = inlined_call_operand.vmem [shape: f32[16,64], index: 0, kind: input, shape index: {}]   ;;  %s2802_s1 = inlined_call_operand.vmem [shape: f32[3,8,16], index: 1, kind: input, shape index: {}]   ;;  %s2803_s5 = inlined_call_operand.vmem [shape: bf16[3,64,64], index: 5, kind: input, shape index: {}]   ;;  %s2804_s3 = inlined_call_operand.vmem [shape: f32[1,64], index: 3, kind: input, shape index: {}]   ;;  %s2805_s4 = inlined_call_operand.vmem [shape: f32[3,8,8], index: 4, kind: input, shape index: {}]   ;;  %s2806_s13 = inlined_call_operand.vmem [shape: f32[64,64], index: 13, kind: input, shape index: {}]   ;;  %s2807_s6 = inlined_call_operand.vmem [shape: f32[1,64], index: 6, kind: input, shape index: {}]   ;;  %s2808_s9 = inlined_call_operand.vmem [shape: bf16[3,64,64], index: 9, kind: input, shape index: {}]   ;;  %s2809_s7 = inlined_call_operand.vmem [shape: f32[1,64], index: 7, kind: input, shape index: {}]   ;;  %s2810_s8 = inlined_call_operand.vmem [shape: f32[1,64], index: 8, kind: input, shape index: {}]   ;;  %s2811_s10 = inlined_call_operand.vmem [shape: f32[1,64], index: 10, kind: input, shape index: {}]   ;;  %s2812_s11 = inlined_call_operand.vmem [shape: f32[1,64], index: 11, kind: input, shape index: {}]   ;;  %s2813_s12 = inlined_call_operand.vmem [shape: f32[1,64], index: 12, kind: input, shape index: {}]   ;;  %s2814_s14 = inlined_call_operand.vmem [shape: f32[8,64], index: 14, kind: output, shape index: {}]  }
   0x1   :  { %2018 = vmatprep.subr.bf16.mxu0 %v2368_v0  ;;  %v2328_v1 = vld [vmem:[%s2800_s2] sm:$0xff]   ;;  %2026 = vmatprep.mubr.msk.bf16.mxu0 %vm2369_vm0, %v2368_v0  ;;  %v2329_v2 = vld [vmem:[%s2800_s2 + $0x8] sm:$0xff]   ;;  %v2330_v3 = vld [vmem:[%s2800_s2 + $0x10] sm:$0xff]   ;;  %vm130_vm2 = vcmask 130048   ;;  %vm597_vm3 = vcmask 64512  }
   0x2   :  { %2034 = vmatprep.mubr.msk.f32.mxu1 %vm2369_vm0, %v2368_v0  ;;  %2019 = vmatpush3.bf16.msra.mxu0 %v2328_v1  ;;  %v2331_v4 = vld [vmem:[%s2800_s2 + $0x18] sm:$0xff]   ;;  %v48_v5 = vld [vmem:[%s2801_s0] sm:$0xff]  ;;  %v49_v6 = vld [vmem:[%s2801_s0 + $0x8] sm:$0xff] }
   0x3   :  { %2020 = vmatprep.subr.bf16.mxu0 %v2368_v0  ;;  %v50_v7 = vpack.c.bf16 %v49_v6, %v48_v5  ;;  %2253 = vmatprep.subr.bf16.mxu1 %v2370_v8  ;;  %v2334_v9 = vld [vmem:[%s2800_s2 + $0x40] sm:$0xff]   ;;  %v2336_v10 = vld [vmem:[%s2800_s2 + $0x48] sm:$0xff]   ;;  %v2338_v11 = vld [vmem:[%s2800_s2 + $0x50] sm:$0xff]  }
   0x4   :  { %v2339_v12 = vld [vmem:[%s2800_s2 + $0x58] sm:$0xff]   ;;  %v129_v18 = vld [vmem:[%s2802_s1] sm:$0xff]  ;;  %v2333_v20 = vld [vmem:[%s2800_s2 + $0x28] sm:$0xff]  }
   0x5   :  { %v2332_v19 = vld [vmem:[%s2800_s2 + $0x20] sm:$0xff]   ;;  %v2335_v21 = vld [vmem:[%s2800_s2 + $0x30] sm:$0xff]   ;;  %v2337_v22 = vld [vmem:[%s2800_s2 + $0x38] sm:$0xff]  }
   0x6   :  { %2021 = vmatpush3.bf16.msra.mxu0 %v2329_v2  ;;  %v2340_v28 = vld [vmem:[%s2803_s5] sm:$0xff]   ;;  %v2341_v29 = vld [vmem:[%s2803_s5 + $0x8] sm:$0xff]   ;;  %v2342_v30 = vld [vmem:[%s2803_s5 + $0x10] sm:$0xff]  }
   0x7   :  { %2022 = vmatprep.subr.bf16.mxu0 %v2368_v0  ;;  %v1823_v36 = vld [vmem:[%s2802_s1 + $0x8] sm:$0xff]  ;;  %v1838_v37 = vld [vmem:[%s2802_s1 + $0x10] sm:$0xff]  ;;  %v2343_v38 = vld [vmem:[%s2803_s5 + $0x18] sm:$0xff]  }
   0x8   :  { %v1809_v39 = vld [vmem:[%s2804_s3] ss:$0 sm:$0xff]  ;;  %v2345_v45 = vld [vmem:[%s2803_s5 + $0x48] sm:$0xff]   ;;  %v2346_v46 = vld [vmem:[%s2803_s5 + $0x50] sm:$0xff]  }
   0x9   :  { %v2344_v43 = vld [vmem:[%s2803_s5 + $0x40] sm:$0xff]   ;;  %v2347_v47 = vld [vmem:[%s2803_s5 + $0x58] sm:$0xff]   ;;  %v2349_v54 = vld [vmem:[%s2803_s5 + $0x28] sm:$0xff]  }
   0xa   :  { %2023 = vmatpush3.bf16.msra.mxu0 %v2330_v3  ;;  %v2580_v48 = vld [vmem:[%s2805_s4] sm:$0xff]  ;;  %v2350_v55 = vld [vmem:[%s2803_s5 + $0x30] sm:$0xff]   ;;  %v2351_v56 = vld [vmem:[%s2803_s5 + $0x38] sm:$0xff]  }
   0xb   :  { %2024 = vmatprep.subr.bf16.mxu0 %v2368_v0  ;;  %v2348_v49 = vld [vmem:[%s2803_s5 + $0x20] sm:$0xff]   ;;  %v512_v62 = vld [vmem:[%s2806_s13 + $0x8] sm:$0xff]  ;;  %v513_v63 = vld [vmem:[%s2806_s13 + $0x10] sm:$0xff] }
   0xc   :  { %v511_v61 = vld [vmem:[%s2806_s13] sm:$0xff]  ;;  %v514_v2 = vld [vmem:[%s2806_s13 + $0x18] sm:$0xff]  ;;  %v516_v5 = vld [vmem:[%s2806_s13 + $0x28] sm:$0xff] }
   0xd   :  { %v2615_v1 = vpack.c.bf16 %v512_v62, %v511_v61  ;;  %v2621_v3 = vpack.c.bf16 %v514_v2, %v513_v63 }
   0xe   :  { %2025 = vmatpush3.bf16.msra.mxu0 %v2331_v4  ;;  %v515_v4 = vld [vmem:[%s2806_s13 + $0x20] sm:$0xff] }
   0xf   :  { %2056 = vmatprep.subr.bf16.mxu0 %v2368_v0  ;;  %v2631_v6 = vpack.c.bf16 %v516_v5, %v515_v4  ;;  %v2356_v5 = vld [vmem:[%s2808_s9 + $0x40] sm:$0xff]  }
  0x11   :  { %2027 = vmatmul.mubr.msk.bf16.vlgmr.msra.gmra.mrb[0].mxu0 %vm84_vm1, %v50_v7 }
  0x12   :  { %2064 = vmatprep.mubr.msk.bf16.mxu0 %vm2369_vm0, %v2368_v0  ;;  %2057 = vmatpush3.bf16.msra.mxu0 %v2334_v9 }
  0x13   :  { %2058 = vmatprep.subr.bf16.mxu0 %v2368_v0 }
  0x16   :  { %2059 = vmatpush3.bf16.msra.mxu0 %v2336_v10 }
  0x17   :  { %2060 = vmatprep.subr.bf16.mxu0 %v2368_v0 }
  0x1a   :  { %2061 = vmatpush3.bf16.msra.mxu0 %v2338_v11 }
  0x1b   :  { %2062 = vmatprep.subr.bf16.mxu0 %v2368_v0 }
  0x1e   :  { %2063 = vmatpush3.bf16.msra.mxu0 %v2339_v12 }
  0x1f   :  { %2075 = vmatprep.subr.bf16.mxu0 %v2368_v0 }
  0x21   :  { %2065 = vmatmul.mubr.msk.bf16.vlgmr.msra.gmra.mrb[4].mxu0 %vm84_vm1, %v50_v7 }
  0x22   :  { %2083 = vmatprep.mubr.msk.bf16.mxu0 %vm2369_vm0, %v2368_v0  ;;  %2076 = vmatpush3.bf16.msra.mxu0 %v2340_v28 }
  0x23   :  { %2077 = vmatprep.subr.bf16.mxu0 %v2368_v0 }
  0x26   :  { %2078 = vmatpush3.bf16.msra.mxu0 %v2341_v29 }
  0x27   :  { %2079 = vmatprep.subr.bf16.mxu0 %v2368_v0 }
  0x2a   :  { %2080 = vmatpush3.bf16.msra.mxu0 %v2342_v30 }
  0x2b   :  { %2081 = vmatprep.subr.bf16.mxu0 %v2368_v0 }
  0x2e   :  { %2082 = vmatpush3.bf16.msra.mxu0 %v2343_v38 }
  0x2f   :  { %2109 = vmatprep.subr.bf16.mxu0 %v2368_v0 }
  0xe4   :  { %v122_v13 = vpop.f32.mrb[0].mxu0 }
  0xe5   :  { %v2028_v14 = vpop.f32.mrb[1].mxu0 }
  0xe6   :  { %v125_v15 = vpop.f32.mrb[2].mxu0  ;;  %v517_v14 = vld [vmem:[%s2806_s13 + $0x30] sm:$0xff] }
  0xe7   :  { %v2254_v16 = vpack.c.bf16 %v125_v15, %v122_v13  ;;  %v2029_v17 = vpop.f32.mrb[3].mxu0  ;;  %v2650_v13 = vld [vmem:[%s2805_s4 + $0x10] sm:$0xff]  ;;  %v518_v15 = vld [vmem:[%s2806_s13 + $0x38] sm:$0xff] }
  0xe8   :  { %v1846_v17 = vld [vmem:[%s2807_s6] ss:$0 sm:$0xff] }
  0xe9   :  { %2255 = vmatpush3.bf16.msra.mxu1 %v2254_v16  ;;  %v2668_v16 = vpack.c.bf16 %v518_v15, %v517_v14  ;;  %v2360_v14 = vld [vmem:[%s2808_s9 + $0x20] sm:$0xff]  }
  0xea   :  { %2037 = vmatprep.subr.bf16.mxu1 %v2368_v0 }
  0xec   :  { %2035 = vmatmul.mubr.msk.f32.vlgmr.msra.gmra.mrb[0].mxu1 %vm130_vm2, %v129_v18 }
  0xed   :  { %2038 = vmatpush3.bf16.msra.mxu1 %v2332_v19  ;;  %2045 = vmatprep.mubr.msk.bf16.mxu1 %vm2369_vm0, %v2368_v0 }
  0xee   :  { %2039 = vmatprep.subr.bf16.mxu1 %v2368_v0 }
  0xf1   :  { %2040 = vmatpush3.bf16.msra.mxu1 %v2333_v20 }
  0xf2   :  { %2041 = vmatprep.subr.bf16.mxu1 %v2368_v0 }
  0xf4   :  { %v428_v23 = vpop.f32.mrb[4].mxu0 }
  0xf5   :  { %2042 = vmatpush3.bf16.msra.mxu1 %v2335_v21  ;;  %v2066_v24 = vpop.f32.mrb[5].mxu0 }
  0xf6   :  { %2043 = vmatprep.subr.bf16.mxu1 %v2368_v0  ;;  %v431_v25 = vpop.f32.mrb[6].mxu0  ;;  %v2352_v24 = vld [vmem:[%s2808_s9] sm:$0xff]  }
  0xf7   :  { %v2260_v26 = vpack.c.bf16 %v431_v25, %v428_v23  ;;  %v2067_v27 = vpop.f32.mrb[7].mxu0  ;;  %v2353_v25 = vld [vmem:[%s2808_s9 + $0x8] sm:$0xff]  }
  0xf8   :  { %v2355_v27 = vld [vmem:[%s2808_s9 + $0x18] sm:$0xff]  }
  0xf9   :  { %2044 = vmatpush3.bf16.msra.mxu1 %v2337_v22 }
  0xfa   :  { %2256 = vmatprep.subr.bf16.mxu1 %v2370_v8 }
  0xfc   :  { %2046 = vmatmul.mubr.msk.bf16.vlgmr.msra.gmra.mrb[4].mxu1 %vm84_vm1, %v50_v7  ;;  %v2639_v7 = vld [vmem:[%s2805_s4 + $0x8] sm:$0xff] }
  0xfd   :  { %2053 = vmatprep.mubr.msk.f32.mxu1 %vm2369_vm0, %v2368_v0 }
 0x1cf   :  { %v278_v31 = vpop.f32.mrb[4].mxu1 }
 0x1d0   :  { %v2047_v32 = vpop.f32.mrb[5].mxu1 }
 0x1d1   :  { %v281_v33 = vpop.f32.mrb[6].mxu1 }
 0x1d2   :  { %v2257_v34 = vpack.c.bf16 %v281_v33, %v278_v31  ;;  %v2048_v35 = vpop.f32.mrb[7].mxu1 }
 0x1d4   :  { %2258 = vmatpush3.bf16.msra.mxu1 %v2257_v34 }
 0x1d5   :  { %2259 = vmatprep.subr.bf16.mxu1 %v2370_v8 }
 0x1d7   :  { %2054 = vmatmul.mubr.msk.f32.vlgmr.msra.gmra.mrb[0].mxu1 %vm130_vm2, %v1823_v36 }
 0x1d8   :  { %2261 = vmatpush3.bf16.msra.mxu1 %v2260_v26  ;;  %2072 = vmatprep.mubr.msk.f32.mxu1 %vm2369_vm0, %v2368_v0  ;;  %v2354_v26 = vld [vmem:[%s2808_s9 + $0x10] sm:$0xff]  }
 0x1d9   :  { %2087 = vmatprep.subr.mxu1 %v2368_v0 }
 0x1df   :  { %2073 = vmatmul.mubr.msk.f32.vlgmr.msra.gmra.mrb[0].mxu1 %vm130_vm2, %v1838_v37 }
 0x1e0   :  { %2089 = vmatprep.mubr.msk.f32.mxu1 %vm2369_vm0, %v2368_v0 }
 0x2b2   :  { %v506_v40 = vpop.f32.mrb[0].mxu1 }
 0x2b3   :  { %v2310_v41 = vadd.f32 %v1809_v39, %v506_v40  ;;  %v2074_v42 = vpop.f32.mrb[1].mxu1 }
 0x2b5   :  { %v519_v44 = vpack.c.bf16 %v2310_v41, %v2310_v41 }
 0x2b7   :  { %2084 = vmatmul.mubr.msk.bf16.vlgmr.msra.gmra.mrb[8].mxu0 %vm84_vm1, %v519_v44 }
 0x2b8   :  { %2110 = vmatpush3.bf16.msra.mxu0 %v2344_v43  ;;  %2117 = vmatprep.mubr.msk.bf16.mxu0 %vm2369_vm0, %v2368_v0 }
 0x2b9   :  { %2111 = vmatprep.subr.bf16.mxu0 %v2368_v0 }
 0x2bc   :  { %2112 = vmatpush3.bf16.msra.mxu0 %v2345_v45 }
 0x2bd   :  { %2113 = vmatprep.subr.bf16.mxu0 %v2368_v0 }
 0x2c0   :  { %2114 = vmatpush3.bf16.msra.mxu0 %v2346_v46 }
 0x2c1   :  { %2115 = vmatprep.subr.bf16.mxu0 %v2368_v0 }
 0x2c4   :  { %2116 = vmatpush3.bf16.msra.mxu0 %v2347_v47 }
 0x2c5   :  { %2262 = vmatprep.subr.bf16.mxu0 %v2370_v8 }
 0x2c7   :  { %2118 = vmatmul.mubr.msk.bf16.vlgmr.msra.gmra.mrb[12].mxu0 %vm84_vm1, %v519_v44 }
 0x2c8   :  { %2142 = vmatprep.mubr.msk.f32.mxu0 %vm2369_vm0, %v2368_v0  ;;  %2264 = vmatpush3.bf16.msra.mxu0 %v2615_v1 }
 0x2c9   :  { %2265 = vmatprep.subr.bf16.mxu0 %v2370_v8 }
 0x2cc   :  { %2267 = vmatpush3.bf16.msra.mxu0 %v2621_v3 }
 0x2cd   :  { %2268 = vmatprep.subr.bf16.mxu0 %v2370_v8 }
 0x2d0   :  { %2270 = vmatpush3.bf16.msra.mxu0 %v2631_v6 }
 0x2d1   :  { %2271 = vmatprep.subr.bf16.mxu0 %v2370_v8 }
 0x2d4   :  { %2273 = vmatpush3.bf16.msra.mxu0 %v2668_v16 }
 0x2d5   :  { %2164 = vmatprep.subr.bf16.mxu0 %v2368_v0 }
 0x38a   :  { %v590_v50 = vpop.f32.mrb[8].mxu0 }
 0x38b   :  { %v2085_v51 = vpop.f32.mrb[9].mxu0  ;;  %2088 = vmatpush3.msra.mxu1 %v590_v50 }
 0x38c   :  { %v593_v52 = vpop.f32.mrb[10].mxu0  ;;  %2092 = vmatprep.subr.bf16.mxu1 %v2368_v0  ;;  %2090 = vmatmul.mubr.msk.f32.vlgmr.msra.gmra.mrb[2].mxu1 %vm597_vm3, %v2580_v48 }
 0x38d   :  { %v2086_v53 = vpop.f32.mrb[11].mxu0  ;;  %2093 = vmatpush3.bf16.msra.mxu1 %v2348_v49  ;;  %2100 = vmatprep.mubr.msk.bf16.mxu1 %vm2369_vm0, %v2368_v0 }
 0x38e   :  { %2094 = vmatprep.subr.bf16.mxu1 %v2368_v0  ;;  %v1153_v53 = vlaneseq }
 0x391   :  { %2095 = vmatpush3.bf16.msra.mxu1 %v2349_v54  ;;  %v1154_v54 = vshrl.u32 %v1153_v53, 7 }
 0x392   :  { %2096 = vmatprep.subr.bf16.mxu1 %v2368_v0 }
 0x395   :  { %2097 = vmatpush3.bf16.msra.mxu1 %v2350_v55  ;;  %v979_v55 = vld [vmem:[%s2809_s7] sm:$0x1] }
 0x396   :  { %2098 = vmatprep.subr.bf16.mxu1 %v2368_v0 }
 0x399   :  { %2099 = vmatpush3.bf16.msra.mxu1 %v2351_v56  ;;  %v2704_v56 = vsub.s32 0, %v1154_v54  ;;  %v1611_v54 = vld [vmem:[%s2812_s11] sm:$0x1] }
 0x39a   :  { %v894_v57 = vpop.f32.mrb[12].mxu0  ;;  %2104 = vmatprep.subr.mxu1 %v2368_v0 }
 0x39b   :  { %v2119_v58 = vpop.f32.mrb[13].mxu0 }
 0x39c   :  { %v897_v59 = vpop.f32.mrb[14].mxu0  ;;  %2101 = vmatmul.mubr.msk.bf16.vlgmr.msra.gmra.mrb[8].mxu1 %vm84_vm1, %v519_v44 }
 0x39d   :  { %v2120_v60 = vpop.f32.mrb[15].mxu0  ;;  %2106 = vmatprep.mubr.msk.f32.mxu1 %vm2369_vm0, %v2368_v0  ;;  %v980_v59 = vld [vmem:[%s2810_s8] sm:$0x1] }
 0x46f   :  { %v745_v9 = vpop.f32.mrb[8].mxu1 }
 0x470   :  { %v2102_v10 = vpop.f32.mrb[9].mxu1  ;;  %2105 = vmatpush3.msra.mxu1 %v745_v9 }
 0x471   :  { %v748_v11 = vpop.f32.mrb[10].mxu1  ;;  %2107 = vmatmul.mubr.msk.f32.vlgmr.msra.gmra.mrb[2].mxu1 %vm597_vm3, %v2639_v7  ;;  %2121 = vmatprep.subr.mxu1 %v2368_v0  ;;  %v2357_v10 = vld [vmem:[%s2808_s9 + $0x48] sm:$0xff]  }
 0x472   :  { %v2103_v12 = vpop.f32.mrb[11].mxu1  ;;  %2122 = vmatpush3.msra.mxu1 %v894_v57  ;;  %2123 = vmatprep.mubr.msk.f32.mxu1 %vm2369_vm0, %v2368_v0  ;;  %v2358_v11 = vld [vmem:[%s2808_s9 + $0x50] sm:$0xff]  }
 0x473   :  { %2274 = vmatprep.subr.bf16.mxu1 %v2370_v8  ;;  %v2359_v12 = vld [vmem:[%s2808_s9 + $0x58] sm:$0xff]  }
 0x479   :  { %2124 = vmatmul.mubr.msk.f32.vlgmr.msra.gmra.mrb[2].mxu1 %vm597_vm3, %v2650_v13 }
 0x47a   :  { %2276 = vmatpush3.bf16.msra.mxu1 %v2615_v1  ;;  %2161 = vmatprep.mubr.msk.f32.mxu1 %vm2369_vm0, %v2368_v0 }
 0x47b   :  { %2277 = vmatprep.subr.bf16.mxu1 %v2370_v8 }
 0x47e   :  { %2279 = vmatpush3.bf16.msra.mxu1 %v2621_v3 }
 0x47f   :  { %2280 = vmatprep.subr.bf16.mxu1 %v2370_v8 }
 0x482   :  { %2282 = vmatpush3.bf16.msra.mxu1 %v2631_v6 }
 0x483   :  { %2283 = vmatprep.subr.bf16.mxu1 %v2370_v8 }
 0x486   :  { %2285 = vmatpush3.bf16.msra.mxu1 %v2668_v16 }
 0x487   :  { %2176 = vmatprep.subr.mxu1 %v2368_v0 }
 0x54c   :  { %v971_v18 = vpop.f32.mrb[2].mxu1 }
 0x54d   :  { %v2311_v19 = vadd.f32 %v1846_v17, %v971_v18  ;;  %v2125_v20 = vpop.f32.mrb[3].mxu1 }
 0x54e   :  { %v2361_v20 = vld [vmem:[%s2808_s9 + $0x28] sm:$0xff]  }
 0x54f   :  { %vm976_vm4 = vcmp.ge.f32.partialorder %v2311_v19, 0.0  ;;  %v977_v21 = vmul.f32 0.01, %v2311_v19 }
 0x551   :  { %v978_v22 = vsel %vm976_vm4, %v2311_v19, %v977_v21  ;;  %v2362_v21 = vld [vmem:[%s2808_s9 + $0x30] sm:$0xff]  }
 0x552   :  { %v1061_v23 = vmul.f32 %v978_v22, %v978_v22  ;;  %2143 = vmatmul.mubr.msk.f32.vlgmr.msra.gmra.mrb[16].mxu0 %vm84_vm1, %v978_v22 }
 0x553   :  { %2172 = vmatprep.mubr.msk.bf16.mxu0 %vm2369_vm0, %v2368_v0  ;;  %2165 = vmatpush3.bf16.msra.mxu0 %v2352_v24 }
 0x554   :  { %2162 = vmatmul.mubr.msk.f32.vlgmr.msra.gmra.mrb[12].mxu1 %vm84_vm1, %v1061_v23  ;;  %2166 = vmatprep.subr.bf16.mxu0 %v2368_v0 }
 0x555   :  { %2178 = vmatprep.mubr.msk.f32.mxu1 %vm2369_vm0, %v2368_v0 }
 0x557   :  { %2167 = vmatpush3.bf16.msra.mxu0 %v2353_v25 }
 0x558   :  { %2168 = vmatprep.subr.bf16.mxu0 %v2368_v0 }
 0x55b   :  { %2169 = vmatpush3.bf16.msra.mxu0 %v2354_v26 }
 0x55c   :  { %2170 = vmatprep.subr.bf16.mxu0 %v2368_v0 }
 0x55f   :  { %2171 = vmatpush3.bf16.msra.mxu0 %v2355_v27 }
 0x560   :  { %2198 = vmatprep.subr.bf16.mxu0 %v2368_v0 }
 0x625   :  { %v1050_v28 = vpop.f32.mrb[16].mxu0 }
 0x626   :  { %v1054_v29 = vsel %vm84_vm1, %v1050_v28, 0.0  ;;  %v2144_v30 = vpop.f32.mrb[17].mxu0 }
 0x627   :  { %v1055_v31 = vrot.slane %v1054_v29, 4  ;;  %v1131_v32 = vpop.f32.mrb[12].mxu1 }
 0x628   :  { %v1135_v33 = vsel %vm84_vm1, %v1131_v32, 0.0  ;;  %v2163_v34 = vpop.f32.mrb[13].mxu1 }
 0x629   :  { %v1056_v35 = vadd.f32 %v1055_v31, %v1054_v29  ;;  %v1136_v36 = vrot.slane %v1135_v33, 4 }
 0x62b   :  { %v1057_v37 = vrot.slane %v1056_v35, 2  ;;  %v1137_v38 = vadd.f32 %v1136_v36, %v1135_v33 }
 0x62d   :  { %v1058_v39 = vadd.f32 %v1057_v37, %v1056_v35  ;;  %v1138_v40 = vrot.slane %v1137_v38, 2 }
 0x62f   :  { %v1059_v41 = vrot.slane %v1058_v39, 1  ;;  %v1139_v42 = vadd.f32 %v1138_v40, %v1137_v38 }
 0x631   :  { %v1060_v43 = vadd.f32 %v1059_v41, %v1058_v39  ;;  %v1140_v44 = vrot.slane %v1139_v42, 1 }
 0x633   :  { %v1142_v45 = vmul.f32 0.03125, %v1060_v43  ;;  %v1141_v46 = vadd.f32 %v1140_v44, %v1139_v42 }
 0x635   :  { %v1144_v47 = vmul.f32 %v1142_v45, %v1142_v45  ;;  %v1143_v49 = vmul.f32 0.03125, %v1141_v46 }
 0x637   :  { %v1145_v50 = vsub.f32 %v1143_v49, %v1144_v47 }
 0x639   :  { %v1146_v51 = vmax.f32 %v1145_v50, 0.0 }
 0x63b   :  { %v1147_v52 = vadd.f32 1e-05, %v1146_v51 }
 0x63d   :  { %2364 = vrsqrt.f32 %v1147_v52 }
 0x647   :  { %v2365_v57 = vpop.eup %2364 }
 0x648   :  { %v1149_v58 = vmul.f32 %v2365_v57, %v979_v55 }
 0x64a   :  { %v1150_v60 = vmul.f32 %v1149_v58, %v1142_v45  ;;  %v1156_v61 = vrot.slane %v1149_v58, %v2704_v56  ;;  %v1612_v58 = vld [vmem:[%s2813_s12] sm:$0x1] }
 0x64c   :  { %v1151_v62 = vsub.f32 %v980_v59, %v1150_v60  ;;  %v1158_v63 = vmul.f32 %v1156_v61, %v978_v22 }
 0x64e   :  { %v1163_v2 = vrot.slane %v1151_v62, %v2704_v56 }
 0x650   :  { %v1165_v4 = vadd.f32 %v1163_v2, %v1158_v63 }
 0x652   :  { %v1166_v9 = vpack.c.bf16 %v1165_v4, %v1165_v4 }
 0x654   :  { %2173 = vmatmul.mubr.msk.bf16.vlgmr.msra.gmra.mrb[20].mxu0 %vm84_vm1, %v1166_v9 }
 0x655   :  { %2199 = vmatpush3.bf16.msra.mxu0 %v2356_v5  ;;  %2206 = vmatprep.mubr.msk.bf16.mxu0 %vm2369_vm0, %v2368_v0 }
 0x656   :  { %2200 = vmatprep.subr.bf16.mxu0 %v2368_v0 }
 0x659   :  { %2201 = vmatpush3.bf16.msra.mxu0 %v2357_v10 }
 0x65a   :  { %2202 = vmatprep.subr.bf16.mxu0 %v2368_v0 }
 0x65d   :  { %2203 = vmatpush3.bf16.msra.mxu0 %v2358_v11 }
 0x65e   :  { %2204 = vmatprep.subr.bf16.mxu0 %v2368_v0 }
 0x661   :  { %2205 = vmatpush3.bf16.msra.mxu0 %v2359_v12 }
 0x662   :  { %2286 = vmatprep.subr.bf16.mxu0 %v2370_v8 }
 0x664   :  { %2207 = vmatmul.mubr.msk.bf16.vlgmr.msra.gmra.mrb[24].mxu0 %vm84_vm1, %v1166_v9 }
 0x665   :  { %2288 = vmatpush3.bf16.msra.mxu0 %v2615_v1  ;;  %2231 = vmatprep.mubr.msk.f32.mxu0 %vm2369_vm0, %v2368_v0 }
 0x666   :  { %2289 = vmatprep.subr.bf16.mxu0 %v2370_v8 }
 0x669   :  { %2291 = vmatpush3.bf16.msra.mxu0 %v2621_v3 }
 0x66a   :  { %2292 = vmatprep.subr.bf16.mxu0 %v2370_v8 }
 0x66d   :  { %2294 = vmatpush3.bf16.msra.mxu0 %v2631_v6 }
 0x66e   :  { %2295 = vmatprep.subr.bf16.mxu0 %v2370_v8 }
 0x671   :  { %2297 = vmatpush3.bf16.msra.mxu0 %v2668_v16 }
 0x727   :  { %v1237_v15 = vpop.f32.mrb[20].mxu0 }
 0x728   :  { %v2174_v17 = vpop.f32.mrb[21].mxu0  ;;  %2177 = vmatpush3.msra.mxu1 %v1237_v15 }
 0x729   :  { %v1240_v18 = vpop.f32.mrb[22].mxu0  ;;  %2181 = vmatprep.subr.bf16.mxu1 %v2368_v0  ;;  %2179 = vmatmul.mubr.msk.f32.vlgmr.msra.gmra.mrb[14].mxu1 %vm597_vm3, %v2580_v48  ;;  %v2363_v48 = vld [vmem:[%s2808_s9 + $0x38] sm:$0xff]  }
 0x72a   :  { %v2175_v19 = vpop.f32.mrb[23].mxu0  ;;  %2182 = vmatpush3.bf16.msra.mxu1 %v2360_v14  ;;  %2189 = vmatprep.mubr.msk.bf16.mxu1 %vm2369_vm0, %v2368_v0 }
 0x72b   :  { %2183 = vmatprep.subr.bf16.mxu1 %v2368_v0 }
 0x72e   :  { %2184 = vmatpush3.bf16.msra.mxu1 %v2361_v20 }
 0x72f   :  { %2185 = vmatprep.subr.bf16.mxu1 %v2368_v0 }
 0x732   :  { %2186 = vmatpush3.bf16.msra.mxu1 %v2362_v21 }
 0x733   :  { %2187 = vmatprep.subr.bf16.mxu1 %v2368_v0 }
 0x736   :  { %2188 = vmatpush3.bf16.msra.mxu1 %v2363_v48 }
 0x737   :  { %v1531_v22 = vpop.f32.mrb[24].mxu0  ;;  %2193 = vmatprep.subr.mxu1 %v2368_v0 }
 0x738   :  { %v2208_v23 = vpop.f32.mrb[25].mxu0 }
 0x739   :  { %v1534_v24 = vpop.f32.mrb[26].mxu0  ;;  %2190 = vmatmul.mubr.msk.bf16.vlgmr.msra.gmra.mrb[16].mxu1 %vm84_vm1, %v1166_v9 }
 0x73a   :  { %v2209_v25 = vpop.f32.mrb[27].mxu0  ;;  %2195 = vmatprep.mubr.msk.f32.mxu1 %vm2369_vm0, %v2368_v0 }
 0x80c   :  { %v1387_v26 = vpop.f32.mrb[16].mxu1 }
 0x80d   :  { %v2191_v27 = vpop.f32.mrb[17].mxu1  ;;  %2194 = vmatpush3.msra.mxu1 %v1387_v26 }
 0x80e   :  { %v1390_v28 = vpop.f32.mrb[18].mxu1  ;;  %2196 = vmatmul.mubr.msk.f32.vlgmr.msra.gmra.mrb[14].mxu1 %vm597_vm3, %v2639_v7  ;;  %2210 = vmatprep.subr.mxu1 %v2368_v0  ;;  %v1885_v7 = vld [vmem:[%s2811_s10] ss:$0 sm:$0xff] }
 0x80f   :  { %v2192_v29 = vpop.f32.mrb[19].mxu1  ;;  %2211 = vmatpush3.msra.mxu1 %v1531_v22  ;;  %2212 = vmatprep.mubr.msk.f32.mxu1 %vm2369_vm0, %v2368_v0 }
 0x810   :  { %2298 = vmatprep.subr.bf16.mxu1 %v2370_v8 }
 0x816   :  { %2213 = vmatmul.mubr.msk.f32.vlgmr.msra.gmra.mrb[14].mxu1 %vm597_vm3, %v2650_v13 }
 0x817   :  { %2300 = vmatpush3.bf16.msra.mxu1 %v2615_v1  ;;  %2250 = vmatprep.mubr.msk.f32.mxu1 %vm2369_vm0, %v2368_v0 }
 0x818   :  { %2301 = vmatprep.subr.bf16.mxu1 %v2370_v8 }
 0x81b   :  { %2303 = vmatpush3.bf16.msra.mxu1 %v2621_v3 }
 0x81c   :  { %2304 = vmatprep.subr.bf16.mxu1 %v2370_v8 }
 0x81f   :  { %2306 = vmatpush3.bf16.msra.mxu1 %v2631_v6 }
 0x820   :  { %2307 = vmatprep.subr.bf16.mxu1 %v2370_v8 }
 0x823   :  { %2309 = vmatpush3.bf16.msra.mxu1 %v2668_v16 }
 0x8e9   :  { %v1603_v1 = vpop.f32.mrb[14].mxu1 }
 0x8ea   :  { %v2312_v13 = vadd.f32 %v1885_v7, %v1603_v1  ;;  %v2214_v30 = vpop.f32.mrb[15].mxu1 }
 0x8ec   :  { %vm1608_vm5 = vcmp.ge.f32.partialorder %v2312_v13, 0.0  ;;  %v1609_v0 = vmul.f32 0.01, %v2312_v13 }
 0x8ee   :  { %v1610_v31 = vsel %vm1608_vm5, %v2312_v13, %v1609_v0 }
 0x8ef   :  { %v1693_v32 = vmul.f32 %v1610_v31, %v1610_v31  ;;  %2232 = vmatmul.mubr.msk.f32.vlgmr.msra.gmra.mrb[18].mxu0 %vm84_vm1, %v1610_v31 }
 0x8f1   :  { %2251 = vmatmul.mubr.msk.f32.vlgmr.msra.gmra.mrb[20].mxu1 %vm84_vm1, %v1693_v32 }
 0x9c2   :  { %v1682_v3 = vpop.f32.mrb[18].mxu0 }
 0x9c3   :  { %v1686_v8 = vsel %vm84_vm1, %v1682_v3, 0.0  ;;  %v2233_v6 = vpop.f32.mrb[19].mxu0 }
 0x9c4   :  { %v1687_v16 = vrot.slane %v1686_v8, 4  ;;  %v1763_v33 = vpop.f32.mrb[20].mxu1 }
 0x9c5   :  { %v1767_v34 = vsel %vm84_vm1, %v1763_v33, 0.0  ;;  %v2252_v35 = vpop.f32.mrb[21].mxu1 }
 0x9c6   :  { %v1688_v36 = vadd.f32 %v1687_v16, %v1686_v8  ;;  %v1768_v37 = vrot.slane %v1767_v34, 4 }
 0x9c8   :  { %v1689_v38 = vrot.slane %v1688_v36, 2  ;;  %v1769_v39 = vadd.f32 %v1768_v37, %v1767_v34 }
 0x9ca   :  { %v1690_v40 = vadd.f32 %v1689_v38, %v1688_v36  ;;  %v1770_v41 = vrot.slane %v1769_v39, 2 }
 0x9cc   :  { %v1691_v42 = vrot.slane %v1690_v40, 1  ;;  %v1771_v43 = vadd.f32 %v1770_v41, %v1769_v39 }
 0x9ce   :  { %v1692_v44 = vadd.f32 %v1691_v42, %v1690_v40  ;;  %v1772_v45 = vrot.slane %v1771_v43, 1 }
 0x9d0   :  { %v1774_v46 = vmul.f32 0.03125, %v1692_v44  ;;  %v1773_v47 = vadd.f32 %v1772_v45, %v1771_v43 }
 0x9d2   :  { %v1776_v49 = vmul.f32 %v1774_v46, %v1774_v46  ;;  %v1775_v50 = vmul.f32 0.03125, %v1773_v47 }
 0x9d4   :  { %v1777_v51 = vsub.f32 %v1775_v50, %v1776_v49 }
 0x9d6   :  { %v1778_v52 = vmax.f32 %v1777_v51, 0.0 }
 0x9d8   :  { %v1779_v53 = vadd.f32 1e-05, %v1778_v52 }
 0x9da   :  { %2366 = vrsqrt.f32 %v1779_v53 }
 0x9e4   :  { %v2367_v55 = vpop.eup %2366 }
 0x9e5   :  { %v1781_v57 = vmul.f32 %v2367_v55, %v1611_v54 }
 0x9e7   :  { %v1782_v59 = vmul.f32 %v1781_v57, %v1774_v46  ;;  %v1788_v60 = vrot.slane %v1781_v57, %v2704_v56 }
 0x9e9   :  { %v1783_v61 = vsub.f32 %v1612_v58, %v1782_v59  ;;  %v1790_v62 = vmul.f32 %v1788_v60, %v1610_v31 }
 0x9eb   :  { %v1795_v63 = vrot.slane %v1783_v61, %v2704_v56 }
 0x9ed   :  { %v1797_v2 = vadd.f32 %v1795_v63, %v1790_v62 }
 0x9ef   :  { %1798 = vst.msk [vmem:[%s2814_s14] sm:$0xff] %vm84_vm1, %v1797_v2 }

// kernel: encoder_forward.4
= control target key start
LH: loop header
LB: loop body
LE: loop exit
PB: predicated region body
PF: predicated region fallthrough
CT: control target
= control target key end

     0   :  { %vm170_vm0 = vcmask 261120   ;;  %v2824_v45 = vmov 0.0   ;;  %vm2825_vm1 = vmmov 0   ;;  %vm702_vm2 = vcmask 523264   ;;  %s3314_s2 = inlined_call_operand.vmem [shape: bf16[3,128,64], index: 2, kind: input, shape index: {}]   ;;  %s3315_s0 = inlined_call_operand.vmem [shape: f32[32,128], index: 0, kind: input, shape index: {}]   ;;  %s3316_s1 = inlined_call_operand.vmem [shape: f32[3,16,32], index: 1, kind: input, shape index: {}]   ;;  %s3317_s5 = inlined_call_operand.vmem [shape: bf16[3,64,64], index: 5, kind: input, shape index: {}]   ;;  %s3318_s3 = inlined_call_operand.vmem [shape: f32[1,64], index: 3, kind: input, shape index: {}]   ;;  %s3319_s4 = inlined_call_operand.vmem [shape: f32[3,16,16], index: 4, kind: input, shape index: {}]   ;;  %s3320_s13 = inlined_call_operand.vmem [shape: f32[64,64], index: 13, kind: input, shape index: {}]   ;;  %s3321_s6 = inlined_call_operand.vmem [shape: f32[1,64], index: 6, kind: input, shape index: {}]   ;;  %s3322_s9 = inlined_call_operand.vmem [shape: bf16[3,64,64], index: 9, kind: input, shape index: {}]   ;;  %s3323_s7 = inlined_call_operand.vmem [shape: f32[1,64], index: 7, kind: input, shape index: {}]   ;;  %s3324_s8 = inlined_call_operand.vmem [shape: f32[1,64], index: 8, kind: input, shape index: {}]   ;;  %s3325_s10 = inlined_call_operand.vmem [shape: f32[1,64], index: 10, kind: input, shape index: {}]   ;;  %s3326_s11 = inlined_call_operand.vmem [shape: f32[1,64], index: 11, kind: input, shape index: {}]   ;;  %s3327_s12 = inlined_call_operand.vmem [shape: f32[1,64], index: 12, kind: input, shape index: {}]   ;;  %s3328_s14 = inlined_call_operand.vmem [shape: f32[16,64], index: 14, kind: output, shape index: {}]  }
   0x1   :  { %v2772_v0 = vld [vmem:[%s3314_s2] sm:$0xff]   ;;  %v2773_v1 = vld [vmem:[%s3314_s2 + $0x8] sm:$0xff]   ;;  %v2774_v2 = vld [vmem:[%s3314_s2 + $0x10] sm:$0xff]   ;;  %vm749_vm3 = vcmask 130048  }
   0x2   :  { %2357 = vmatprep.subr.bf16.mxu0 %v2772_v0  ;;  %v2775_v3 = vld [vmem:[%s3314_s2 + $0x18] sm:$0xff]   ;;  %v48_v4 = vld [vmem:[%s3315_s0] sm:$0xff]  ;;  %v49_v5 = vld [vmem:[%s3315_s0 + $0x8] sm:$0xff] }
   0x3   :  { %2358 = vmatpush3.bf16.msra.mxu0 %v2772_v0  ;;  %v2919_v6 = vpack.c.bf16 %v49_v5, %v48_v4  ;;  %v2776_v7 = vld [vmem:[%s3314_s2 + $0x20] sm:$0xff]   ;;  %v2777_v8 = vld [vmem:[%s3314_s2 + $0x28] sm:$0xff]   ;;  %v2778_v9 = vld [vmem:[%s3314_s2 + $0x30] sm:$0xff]  }
   0x4   :  { %2359 = vmatprep.subr.bf16.mxu0 %v2773_v1  ;;  %v2779_v10 = vld [vmem:[%s3314_s2 + $0x38] sm:$0xff]   ;;  %v50_v11 = vld [vmem:[%s3315_s0 + $0x10] sm:$0xff]  ;;  %v168_v14 = vld [vmem:[%s3316_s1] sm:$0xff] }
   0x5   :  { %2373 = vmatprep.mubr.bf16.mxu0 %v2919_v6  ;;  %v51_v12 = vld [vmem:[%s3315_s0 + $0x18] sm:$0xff]  ;;  %2385 = vmatprep.mubr.msk.f32.mxu1 %vm170_vm0, %v168_v14  ;;  %v2782_v15 = vld [vmem:[%s3314_s2 + $0x80] sm:$0xff]   ;;  %v2784_v16 = vld [vmem:[%s3314_s2 + $0x88] sm:$0xff]  }
   0x6   :  { %v2940_v13 = vpack.c.bf16 %v51_v12, %v50_v11  ;;  %v2786_v17 = vld [vmem:[%s3314_s2 + $0x90] sm:$0xff]   ;;  %v2788_v18 = vld [vmem:[%s3314_s2 + $0x98] sm:$0xff]   ;;  %v2790_v19 = vld [vmem:[%s3314_s2 + $0xa0] sm:$0xff]  }
   0x7   :  { %2360 = vmatpush3.bf16.msra.mxu0 %v2773_v1  ;;  %v2792_v20 = vld [vmem:[%s3314_s2 + $0xa8] sm:$0xff]   ;;  %v2794_v21 = vld [vmem:[%s3314_s2 + $0xb0] sm:$0xff]   ;;  %v2795_v22 = vld [vmem:[%s3314_s2 + $0xb8] sm:$0xff]  }
   0x8   :  { %2361 = vmatprep.subr.bf16.mxu0 %v2774_v2  ;;  %v2780_v29 = vld [vmem:[%s3314_s2 + $0x40] sm:$0xff]   ;;  %v169_v30 = vld [vmem:[%s3316_s1 + $0x8] sm:$0xff]  ;;  %v2783_v32 = vld [vmem:[%s3314_s2 + $0x50] sm:$0xff]  }
   0x9   :  { %v2781_v31 = vld [vmem:[%s3314_s2 + $0x48] sm:$0xff]   ;;  %v2785_v33 = vld [vmem:[%s3314_s2 + $0x58] sm:$0xff]   ;;  %v2787_v34 = vld [vmem:[%s3314_s2 + $0x60] sm:$0xff]  }
   0xa   :  { %v2789_v35 = vld [vmem:[%s3314_s2 + $0x68] sm:$0xff]   ;;  %v2791_v36 = vld [vmem:[%s3314_s2 + $0x70] sm:$0xff]   ;;  %v2793_v37 = vld [vmem:[%s3314_s2 + $0x78] sm:$0xff]  }
   0xb   :  { %2362 = vmatpush3.bf16.msra.mxu0 %v2774_v2  ;;  %v2095_v44 = vld [vmem:[%s3316_s1 + $0x10] sm:$0xff]  ;;  %v2797_v46 = vld [vmem:[%s3317_s5 + $0x20] sm:$0xff]   ;;  %v2799_v47 = vld [vmem:[%s3317_s5 + $0x28] sm:$0xff]  }
   0xc   :  { %2363 = vmatprep.subr.bf16.mxu0 %v2775_v3  ;;  %v2801_v48 = vld [vmem:[%s3317_s5 + $0x30] sm:$0xff]   ;;  %v2096_v55 = vld [vmem:[%s3316_s1 + $0x18] sm:$0xff]  ;;  %v2123_v56 = vld [vmem:[%s3316_s1 + $0x20] sm:$0xff] }
   0xd   :  { %v2124_v57 = vld [vmem:[%s3316_s1 + $0x28] sm:$0xff]  ;;  %v2796_v58 = vld [vmem:[%s3317_s5] sm:$0xff]   ;;  %v2800_v60 = vld [vmem:[%s3317_s5 + $0x10] sm:$0xff]  }
   0xe   :  { %v2798_v59 = vld [vmem:[%s3317_s5 + $0x8] sm:$0xff]   ;;  %v2802_v61 = vld [vmem:[%s3317_s5 + $0x18] sm:$0xff]   ;;  %v2070_v63 = vld [vmem:[%s3318_s3] ss:$0 sm:$0xff] }
   0xf   :  { %2364 = vmatpush3.bf16.msra.mxu0 %v2775_v3  ;;  %v2803_v62 = vld [vmem:[%s3317_s5 + $0x38] sm:$0xff]   ;;  %v3063_v5 = vld [vmem:[%s3319_s4] sm:$0xff] }
  0x10   :  { %2365 = vmatprep.subr.bf16.mxu0 %v2776_v7 }
  0x13   :  { %2366 = vmatpush3.bf16.msra.mxu0 %v2776_v7 }
  0x14   :  { %2367 = vmatprep.subr.bf16.mxu0 %v2777_v8 }
  0x17   :  { %2368 = vmatpush3.bf16.msra.mxu0 %v2777_v8 }
  0x18   :  { %2369 = vmatprep.subr.bf16.mxu0 %v2778_v9 }
  0x1b   :  { %2370 = vmatpush3.bf16.msra.mxu0 %v2778_v9 }
  0x1c   :  { %2371 = vmatprep.subr.bf16.mxu0 %v2779_v10 }
  0x1f   :  { %2372 = vmatpush3.bf16.msra.mxu0 %v2779_v10 }
  0x20   :  { %2419 = vmatprep.subr.bf16.mxu0 %v2782_v15 }
  0x22   :  { %2374 = vmatmul.mubr.bf16.vlgmr.msra.gmra.mrb[0].mxu0 %v2940_v13 }
  0x23   :  { %2435 = vmatprep.mubr.bf16.mxu0 %v2919_v6  ;;  %2420 = vmatpush3.bf16.msra.mxu0 %v2782_v15 }
  0x24   :  { %2421 = vmatprep.subr.bf16.mxu0 %v2784_v16 }
  0x27   :  { %2422 = vmatpush3.bf16.msra.mxu0 %v2784_v16  ;;  %v3070_v16 = vld [vmem:[%s3319_s4 + $0x8] sm:$0xff] }
  0x28   :  { %2423 = vmatprep.subr.bf16.mxu0 %v2786_v17 }
  0x2b   :  { %2424 = vmatpush3.bf16.msra.mxu0 %v2786_v17  ;;  %v2804_v17 = vld [vmem:[%s3317_s5 + $0x40] sm:$0xff]  }
  0x2c   :  { %2425 = vmatprep.subr.bf16.mxu0 %v2788_v18 }
  0x2f   :  { %2426 = vmatpush3.bf16.msra.mxu0 %v2788_v18  ;;  %v2805_v18 = vld [vmem:[%s3317_s5 + $0x48] sm:$0xff]  }
  0x30   :  { %2427 = vmatprep.subr.bf16.mxu0 %v2790_v19 }
  0x33   :  { %2428 = vmatpush3.bf16.msra.mxu0 %v2790_v19  ;;  %v2806_v19 = vld [vmem:[%s3317_s5 + $0x50] sm:$0xff]  }
  0x34   :  { %2429 = vmatprep.subr.bf16.mxu0 %v2792_v20 }
  0x37   :  { %2430 = vmatpush3.bf16.msra.mxu0 %v2792_v20  ;;  %v2807_v20 = vld [vmem:[%s3317_s5 + $0x58] sm:$0xff]  }
  0x38   :  { %2431 = vmatprep.subr.bf16.mxu0 %v2794_v21 }
  0x3b   :  { %2432 = vmatpush3.bf16.msra.mxu0 %v2794_v21  ;;  %v3096_v21 = vld [vmem:[%s3319_s4 + $0x10] sm:$0xff] }
  0x3c   :  { %2433 = vmatprep.subr.bf16.mxu0 %v2795_v22 }
  0x3f   :  { %2434 = vmatpush3.bf16.msra.mxu0 %v2795_v22  ;;  %v3103_v22 = vld [vmem:[%s3319_s4 + $0x18] sm:$0xff] }
  0x40   :  { %2469 = vmatprep.subr.bf16.mxu0 %v2824_v45 }
  0x42   :  { %2436 = vmatmul.mubr.bf16.vlgmr.msra.gmra.mrb[4].mxu0 %v2940_v13 }
  0x43   :  { %2470 = vmatpush3.bf16.msra.mxu0 %v2797_v46  ;;  %2477 = vmatprep.mubr.msk.bf16.mxu0 %vm2825_vm1, %v2824_v45 }
  0x44   :  { %2471 = vmatprep.subr.bf16.mxu0 %v2824_v45 }
  0x47   :  { %2472 = vmatpush3.bf16.msra.mxu0 %v2799_v47 }
  0x48   :  { %2473 = vmatprep.subr.bf16.mxu0 %v2824_v45 }
  0x4b   :  { %2474 = vmatpush3.bf16.msra.mxu0 %v2801_v48 }
  0x4c   :  { %2475 = vmatprep.subr.bf16.mxu0 %v2824_v45 }
  0x4f   :  { %2476 = vmatpush3.bf16.msra.mxu0 %v2803_v62 }
  0xf5   :  { %v2375_v23 = vpop.f32.mrb[0].mxu0 }
  0xf6   :  { %v153_v24 = vpop.f32.mrb[1].mxu0 }
  0xf7   :  { %v2376_v25 = vpop.f32.mrb[2].mxu0 }
  0xf8   :  { %v2644_v26 = vpack.c.bf16 %v2376_v25, %v2375_v23  ;;  %v156_v27 = vpop.f32.mrb[3].mxu0  ;;  %v3110_v23 = vld [vmem:[%s3319_s4 + $0x20] sm:$0xff]  ;;  %v661_v25 = vld [vmem:[%s3320_s13 + $0x8] sm:$0xff] }
  0xf9   :  { %v2640_v28 = vpack.c.bf16 %v156_v27, %v153_v24  ;;  %v660_v24 = vld [vmem:[%s3320_s13] sm:$0xff] }
  0xfa   :  { %v3123_v27 = vpack.c.bf16 %v661_v25, %v660_v24 }
  0xfb   :  { %2641 = vmatprep.subr.bf16.mxu1 %v2640_v28 }
  0xfc   :  { %2643 = vmatpush3.bf16.msra.mxu1 %v2640_v28  ;;  %v663_v28 = vld [vmem:[%s3320_s13 + $0x18] sm:$0xff] }
  0xfd   :  { %2645 = vmatprep.subr.bf16.mxu1 %v2644_v26 }
 0x100   :  { %2647 = vmatpush3.bf16.msra.mxu1 %v2644_v26  ;;  %v662_v26 = vld [vmem:[%s3320_s13 + $0x10] sm:$0xff] }
 0x101   :  { %2388 = vmatprep.subr.bf16.mxu1 %v2780_v29 }
 0x103   :  { %2386 = vmatmul.mubr.msk.f32.vlgmr.msra.gmra.mrb[0].mxu1 %vm170_vm0, %v169_v30 }
 0x104   :  { %2389 = vmatpush3.bf16.msra.mxu1 %v2780_v29  ;;  %2404 = vmatprep.mubr.bf16.mxu1 %v2919_v6  ;;  %v3128_v29 = vpack.c.bf16 %v663_v28, %v662_v26 }
 0x105   :  { %2390 = vmatprep.subr.bf16.mxu1 %v2781_v31 }
 0x108   :  { %2391 = vmatpush3.bf16.msra.mxu1 %v2781_v31 }
 0x109   :  { %2392 = vmatprep.subr.bf16.mxu1 %v2783_v32 }
 0x10c   :  { %2393 = vmatpush3.bf16.msra.mxu1 %v2783_v32 }
 0x10d   :  { %2394 = vmatprep.subr.bf16.mxu1 %v2785_v33 }
 0x110   :  { %2395 = vmatpush3.bf16.msra.mxu1 %v2785_v33 }
 0x111   :  { %2396 = vmatprep.subr.bf16.mxu1 %v2787_v34 }
 0x114   :  { %2397 = vmatpush3.bf16.msra.mxu1 %v2787_v34 }
 0x115   :  { %2398 = vmatprep.subr.bf16.mxu1 %v2789_v35  ;;  %v2437_v38 = vpop.f32.mrb[4].mxu0 }
 0x116   :  { %v559_v39 = vpop.f32.mrb[5].mxu0 }
 0x117   :  { %v2438_v40 = vpop.f32.mrb[6].mxu0 }
 0x118   :  { %2399 = vmatpush3.bf16.msra.mxu1 %v2789_v35  ;;  %v2660_v41 = vpack.c.bf16 %v2438_v40, %v2437_v38  ;;  %v562_v42 = vpop.f32.mrb[7].mxu0  ;;  %v664_v38 = vld [vmem:[%s3320_s13 + $0x20] sm:$0xff] }
 0x119   :  { %2400 = vmatprep.subr.bf16.mxu1 %v2791_v36  ;;  %v2656_v43 = vpack.c.bf16 %v562_v42, %v559_v39  ;;  %v665_v39 = vld [vmem:[%s3320_s13 + $0x28] sm:$0xff]  ;;  %v667_v42 = vld [vmem:[%s3320_s13 + $0x38] sm:$0xff] }
 0x11a   :  { %v3151_v40 = vpack.c.bf16 %v665_v39, %v664_v38  ;;  %v1166_v39 = vld [vmem:[%s3324_s8] sm:$0x1] }
 0x11c   :  { %2401 = vmatpush3.bf16.msra.mxu1 %v2791_v36 }
 0x11d   :  { %2402 = vmatprep.subr.bf16.mxu1 %v2793_v37 }
 0x120   :  { %2403 = vmatpush3.bf16.msra.mxu1 %v2793_v37  ;;  %v3137_v37 = vld [vmem:[%s3319_s4 + $0x28] sm:$0xff] }
 0x123   :  { %2405 = vmatmul.mubr.bf16.vlgmr.msra.gmra.mrb[4].mxu1 %v2940_v13 }
 0x124   :  { %2416 = vmatprep.mubr.msk.f32.mxu1 %vm170_vm0, %v2095_v44  ;;  %v2134_v44 = vld [vmem:[%s3321_s6] ss:$0 sm:$0xff] }
 0x1f6   :  { %v2406_v49 = vpop.f32.mrb[4].mxu1 }
 0x1f7   :  { %v359_v50 = vpop.f32.mrb[5].mxu1 }
 0x1f8   :  { %v2407_v51 = vpop.f32.mrb[6].mxu1 }
 0x1f9   :  { %v2652_v52 = vpack.c.bf16 %v2407_v51, %v2406_v49  ;;  %v362_v53 = vpop.f32.mrb[7].mxu1 }
 0x1fa   :  { %v2648_v54 = vpack.c.bf16 %v362_v53, %v359_v50 }
 0x1fc   :  { %2649 = vmatprep.subr.bf16.mxu1 %v2648_v54 }
 0x1fd   :  { %2651 = vmatpush3.bf16.msra.mxu1 %v2648_v54 }
 0x1fe   :  { %2653 = vmatprep.subr.bf16.mxu1 %v2652_v52 }
 0x201   :  { %2655 = vmatpush3.bf16.msra.mxu1 %v2652_v52 }
 0x202   :  { %2657 = vmatprep.subr.bf16.mxu1 %v2656_v43 }
 0x204   :  { %2417 = vmatmul.mubr.msk.f32.vlgmr.msra.gmra.mrb[0].mxu1 %vm170_vm0, %v2096_v55 }
 0x205   :  { %2659 = vmatpush3.bf16.msra.mxu1 %v2656_v43  ;;  %2447 = vmatprep.mubr.msk.f32.mxu1 %vm170_vm0, %v2123_v56 }
 0x206   :  { %2661 = vmatprep.subr.bf16.mxu1 %v2660_v41 }
 0x209   :  { %2663 = vmatpush3.bf16.msra.mxu1 %v2660_v41  ;;  %v666_v41 = vld [vmem:[%s3320_s13 + $0x30] sm:$0xff] }
 0x20a   :  { %2450 = vmatprep.subr.bf16.mxu1 %v2824_v45  ;;  %v3163_v43 = vpack.c.bf16 %v667_v42, %v666_v41 }
 0x20c   :  { %2448 = vmatmul.mubr.msk.f32.vlgmr.msra.gmra.mrb[0].mxu1 %vm170_vm0, %v2124_v57 }
 0x20d   :  { %2451 = vmatpush3.bf16.msra.mxu1 %v2796_v58  ;;  %2458 = vmatprep.mubr.msk.bf16.mxu1 %vm2825_vm1, %v2824_v45  ;;  %v2808_v58 = vld [vmem:[%s3322_s9] sm:$0xff]  }
 0x20e   :  { %2452 = vmatprep.subr.bf16.mxu1 %v2824_v45 }
 0x211   :  { %2453 = vmatpush3.bf16.msra.mxu1 %v2798_v59  ;;  %v2809_v59 = vld [vmem:[%s3322_s9 + $0x8] sm:$0xff]  }
 0x212   :  { %2454 = vmatprep.subr.bf16.mxu1 %v2824_v45 }
 0x215   :  { %2455 = vmatpush3.bf16.msra.mxu1 %v2800_v60  ;;  %v2810_v60 = vld [vmem:[%s3322_s9 + $0x10] sm:$0xff]  }
 0x216   :  { %2456 = vmatprep.subr.bf16.mxu1 %v2824_v45 }
 0x219   :  { %2457 = vmatpush3.bf16.msra.mxu1 %v2802_v61  ;;  %v2811_v61 = vld [vmem:[%s3322_s9 + $0x18] sm:$0xff]  }
 0x2df   :  { %v2449_v0 = vpop.f32.mrb[0].mxu1 }
 0x2e0   :  { %v2752_v1 = vadd.f32 %v2449_v0, %v2070_v63  ;;  %v649_v2 = vpop.f32.mrb[1].mxu1 }
 0x2e1   :  { %v2753_v3 = vadd.f32 %v2070_v63, %v649_v2 }
 0x2e3   :  { %v668_v4 = vpack.c.bf16 %v2752_v1, %v2753_v3 }
 0x2e5   :  { %2459 = vmatmul.mubr.msk.bf16.vlgmr.msra.gmra.mrb[8].mxu1 %vm702_vm2, %v668_v4  ;;  %2478 = vmatmul.mubr.msk.bf16.vlgmr.msra.gmra.mrb[8].mxu0 %vm702_vm2, %v668_v4 }
 0x2e6   :  { %2466 = vmatprep.mubr.msk.f32.mxu1 %vm749_vm3, %v3063_v5  ;;  %2485 = vmatprep.mubr.msk.f32.mxu0 %vm749_vm3, %v3096_v21 }
 0x3b8   :  { %v740_v6 = vpop.f32.mrb[8].mxu1  ;;  %v906_v7 = vpop.f32.mrb[8].mxu0 }
 0x3b9   :  { %v2460_v8 = vpop.f32.mrb[9].mxu1  ;;  %v2479_v9 = vpop.f32.mrb[9].mxu0 }
 0x3ba   :  { %v743_v10 = vpop.f32.mrb[10].mxu1  ;;  %v909_v11 = vpop.f32.mrb[10].mxu0 }
 0x3bb   :  { %v2664_v12 = vpack.c.bf16 %v743_v10, %v740_v6  ;;  %v2668_v13 = vpack.c.bf16 %v909_v11, %v906_v7  ;;  %v2461_v14 = vpop.f32.mrb[11].mxu1  ;;  %v2480_v15 = vpop.f32.mrb[11].mxu0 }
 0x3bd   :  { %2665 = vmatprep.subr.bf16.mxu1 %v2664_v12  ;;  %2669 = vmatprep.subr.bf16.mxu0 %v2668_v13 }
 0x3be   :  { %2667 = vmatpush3.bf16.msra.mxu1 %v2664_v12  ;;  %2671 = vmatpush3.bf16.msra.mxu0 %v2668_v13 }
 0x3bf   :  { %2488 = vmatprep.subr.bf16.mxu1 %v2824_v45 }
 0x3c1   :  { %2467 = vmatmul.mubr.msk.f32.vlgmr.msra.gmra.mrb[2].mxu1 %vm749_vm3, %v3070_v16  ;;  %2486 = vmatmul.mubr.msk.f32.vlgmr.msra.gmra.mrb[12].mxu0 %vm749_vm3, %v3103_v22 }
 0x3c2   :  { %2489 = vmatpush3.bf16.msra.mxu1 %v2804_v17  ;;  %2496 = vmatprep.mubr.msk.bf16.mxu1 %vm2825_vm1, %v2824_v45 }
 0x3c3   :  { %2490 = vmatprep.subr.bf16.mxu1 %v2824_v45  ;;  %2504 = vmatprep.mubr.msk.f32.mxu0 %vm749_vm3, %v3110_v23 }
 0x3c6   :  { %2491 = vmatpush3.bf16.msra.mxu1 %v2805_v18 }
 0x3c7   :  { %2492 = vmatprep.subr.bf16.mxu1 %v2824_v45 }
 0x3ca   :  { %2493 = vmatpush3.bf16.msra.mxu1 %v2806_v19 }
 0x3cb   :  { %2494 = vmatprep.subr.bf16.mxu1 %v2824_v45 }
 0x3ce   :  { %2495 = vmatpush3.bf16.msra.mxu1 %v2807_v20 }
 0x3cf   :  { %2677 = vmatprep.subr.bf16.mxu1 %v3123_v27 }
 0x3d1   :  { %2497 = vmatmul.mubr.msk.bf16.vlgmr.msra.gmra.mrb[12].mxu1 %vm702_vm2, %v668_v4 }
 0x3d2   :  { %2679 = vmatpush3.bf16.msra.mxu1 %v3123_v27 }
 0x3d3   :  { %2681 = vmatprep.subr.bf16.mxu1 %v3128_v29 }
 0x3d6   :  { %2683 = vmatpush3.bf16.msra.mxu1 %v3128_v29 }
 0x3d7   :  { %2685 = vmatprep.subr.bf16.mxu1 %v3151_v40 }
 0x3da   :  { %2687 = vmatpush3.bf16.msra.mxu1 %v3151_v40 }
 0x3db   :  { %2689 = vmatprep.subr.bf16.mxu1 %v3163_v43 }
 0x3de   :  { %2691 = vmatpush3.bf16.msra.mxu1 %v3163_v43 }
 0x3df   :  { %2545 = vmatprep.subr.bf16.mxu1 %v2824_v45 }
 0x494   :  { %v2468_v30 = vpop.f32.mrb[2].mxu1 }
 0x495   :  { %v822_v31 = vpop.f32.mrb[3].mxu1  ;;  %v838_v46 = vadd.f32 %v2468_v30, %v2134_v44 }
 0x496   :  { %v837_v47 = vadd.f32 %v2134_v44, %v822_v31 }
 0x4a4   :  { %v1066_v32 = vpop.f32.mrb[12].mxu1 }
 0x4a5   :  { %v2498_v33 = vpop.f32.mrb[13].mxu1 }
 0x4a6   :  { %v1069_v34 = vpop.f32.mrb[14].mxu1 }
 0x4a7   :  { %v2672_v35 = vpack.c.bf16 %v1069_v34, %v1066_v32  ;;  %v2499_v36 = vpop.f32.mrb[15].mxu1  ;;  %v1360_v32 = vlaneseq  ;;  %v1165_v34 = vld [vmem:[%s3323_s7] sm:$0x1] }
 0x4a9   :  { %2673 = vmatprep.subr.bf16.mxu0 %v2672_v35  ;;  %v1361_v33 = vshrl.u32 %v1360_v32, 7 }
 0x4aa   :  { %2675 = vmatpush3.bf16.msra.mxu0 %v2672_v35 }
 0x4ab   :  { %2693 = vmatprep.subr.bf16.mxu0 %v3123_v27  ;;  %v3214_v35 = vsub.s32 0, %v1361_v33 }
 0x4ad   :  { %2505 = vmatmul.mubr.msk.f32.vlgmr.msra.gmra.mrb[12].mxu0 %vm749_vm3, %v3137_v37 }
 0x4ae   :  { %2695 = vmatpush3.bf16.msra.mxu0 %v3123_v27 }
 0x4af   :  { %2697 = vmatprep.subr.bf16.mxu0 %v3128_v29 }
 0x4b2   :  { %2699 = vmatpush3.bf16.msra.mxu0 %v3128_v29 }
 0x4b3   :  { %2701 = vmatprep.subr.bf16.mxu0 %v3151_v40 }
 0x4b6   :  { %2703 = vmatpush3.bf16.msra.mxu0 %v3151_v40 }
 0x4b7   :  { %2705 = vmatprep.subr.bf16.mxu0 %v3163_v43 }
 0x4ba   :  { %2707 = vmatpush3.bf16.msra.mxu0 %v3163_v43 }
 0x580   :  { %v2506_v48 = vpop.f32.mrb[12].mxu0 }
 0x581   :  { %v2755_v49 = vadd.f32 %v2506_v48, %v838_v46  ;;  %v1148_v50 = vpop.f32.mrb[13].mxu0 }
 0x582   :  { %v2757_v51 = vadd.f32 %v1148_v50, %v837_v47 }
 0x583   :  { %vm1160_vm4 = vcmp.ge.f32.partialorder %v2755_v49, 0.0  ;;  %v1162_v52 = vmul.f32 0.01, %v2755_v49 }
 0x584   :  { %vm1159_vm5 = vcmp.ge.f32.partialorder %v2757_v51, 0.0  ;;  %v1161_v53 = vmul.f32 0.01, %v2757_v51 }
 0x585   :  { %v3173_v54 = vsel %vm1160_vm4, %v2755_v49, %v1162_v52 }
 0x586   :  { %v3175_v55 = vsel %vm1159_vm5, %v2757_v51, %v1161_v53  ;;  %v1258_v57 = vmul.f32 %v3173_v54, %v3173_v54  ;;  %v2812_v51 = vld [vmem:[%s3322_s9 + $0x40] sm:$0xff]   ;;  %v2813_v53 = vld [vmem:[%s3322_s9 + $0x48] sm:$0xff]  }
 0x587   :  { %2523 = vmatprep.mubr.msk.f32.mxu1 %vm702_vm2, %v3175_v55  ;;  %v1257_v56 = vmul.f32 %v3175_v55, %v3175_v55 }
 0x588   :  { %2524 = vmatmul.mubr.msk.f32.vlgmr.msra.gmra.mrb[16].mxu1 %vm702_vm2, %v3173_v54 }
 0x589   :  { %2542 = vmatprep.mubr.msk.f32.mxu0 %vm702_vm2, %v1257_v56  ;;  %2553 = vmatprep.mubr.msk.bf16.mxu1 %vm2825_vm1, %v2824_v45 }
 0x58a   :  { %2543 = vmatmul.mubr.msk.f32.vlgmr.msra.gmra.mrb[14].mxu0 %vm702_vm2, %v1258_v57  ;;  %2546 = vmatpush3.bf16.msra.mxu1 %v2808_v58 }
 0x58b   :  { %2561 = vmatprep.mubr.msk.f32.mxu0 %vm749_vm3, %v3063_v5  ;;  %2547 = vmatprep.subr.bf16.mxu1 %v2824_v45 }
 0x58e   :  { %2548 = vmatpush3.bf16.msra.mxu1 %v2809_v59 }
 0x58f   :  { %2549 = vmatprep.subr.bf16.mxu1 %v2824_v45 }
 0x592   :  { %2550 = vmatpush3.bf16.msra.mxu1 %v2810_v60 }
 0x593   :  { %2551 = vmatprep.subr.bf16.mxu1 %v2824_v45 }
 0x596   :  { %2552 = vmatpush3.bf16.msra.mxu1 %v2811_v61  ;;  %v2816_v61 = vld [vmem:[%s3322_s9 + $0x20] sm:$0xff]  }
 0x597   :  { %2583 = vmatprep.subr.bf16.mxu1 %v2824_v45 }
 0x65b   :  { %v2525_v62 = vpop.f32.mrb[16].mxu1 }
 0x65c   :  { %v1249_v63 = vsel %vm702_vm2, %v2525_v62, 0.0  ;;  %v1239_v0 = vpop.f32.mrb[17].mxu1  ;;  %v2817_v62 = vld [vmem:[%s3322_s9 + $0x28] sm:$0xff]  }
 0x65d   :  { %v1248_v1 = vsel %vm702_vm2, %v1239_v0, 0.0  ;;  %v2544_v2 = vpop.f32.mrb[14].mxu0 }
 0x65e   :  { %v1250_v3 = vadd.f32 %v1249_v63, %v1248_v1  ;;  %v1341_v4 = vsel %vm702_vm2, %v2544_v2, 0.0  ;;  %v1331_v5 = vpop.f32.mrb[15].mxu0  ;;  %v2818_v63 = vld [vmem:[%s3322_s9 + $0x30] sm:$0xff]   ;;  %v2819_v2 = vld [vmem:[%s3322_s9 + $0x38] sm:$0xff]  }
 0x65f   :  { %v1340_v6 = vsel %vm702_vm2, %v1331_v5, 0.0 }
 0x660   :  { %v1251_v7 = vrot.slane %v1250_v3, 4  ;;  %v1342_v8 = vadd.f32 %v1341_v4, %v1340_v6 }
 0x662   :  { %v1252_v9 = vadd.f32 %v1251_v7, %v1250_v3  ;;  %v1343_v10 = vrot.slane %v1342_v8, 4 }
 0x664   :  { %v1253_v11 = vrot.slane %v1252_v9, 2  ;;  %v1344_v12 = vadd.f32 %v1343_v10, %v1342_v8 }
 0x666   :  { %v1254_v13 = vadd.f32 %v1253_v11, %v1252_v9  ;;  %v1345_v14 = vrot.slane %v1344_v12, 2 }
 0x668   :  { %v1255_v15 = vrot.slane %v1254_v13, 1  ;;  %v1346_v17 = vadd.f32 %v1345_v14, %v1344_v12 }
 0x66a   :  { %v1256_v18 = vadd.f32 %v1255_v15, %v1254_v13  ;;  %v1347_v19 = vrot.slane %v1346_v17, 1 }
 0x66c   :  { %v1349_v20 = vmul.f32 0.0078125, %v1256_v18  ;;  %v1348_v24 = vadd.f32 %v1347_v19, %v1346_v17 }
 0x66e   :  { %v1351_v25 = vmul.f32 %v1349_v20, %v1349_v20  ;;  %v1350_v26 = vmul.f32 0.0078125, %v1348_v24 }
 0x670   :  { %v1352_v28 = vsub.f32 %v1350_v26, %v1351_v25 }
 0x672   :  { %v1353_v30 = vmax.f32 %v1352_v28, 0.0 }
 0x674   :  { %v1354_v31 = vadd.f32 1e-05, %v1353_v30 }
 0x676   :  { %2820 = vrsqrt.f32 %v1354_v31 }
 0x680   :  { %v2821_v36 = vpop.eup %2820 }
 0x681   :  { %v1356_v38 = vmul.f32 %v2821_v36, %v1165_v34 }
 0x683   :  { %v1357_v41 = vmul.f32 %v1356_v38, %v1349_v20  ;;  %v1363_v42 = vrot.slane %v1356_v38, %v3214_v35 }
 0x685   :  { %v1358_v44 = vsub.f32 %v1166_v39, %v1357_v41  ;;  %v1365_v46 = vmul.f32 %v1363_v42, %v3175_v55  ;;  %v1366_v47 = vmul.f32 %v1363_v42, %v3173_v54  ;;  %v2814_v54 = vld [vmem:[%s3322_s9 + $0x50] sm:$0xff]   ;;  %v2815_v55 = vld [vmem:[%s3322_s9 + $0x58] sm:$0xff]  }
 0x687   :  { %v1371_v48 = vrot.slane %v1358_v44, %v3214_v35 }
 0x689   :  { %v1373_v49 = vadd.f32 %v1371_v48, %v1365_v46  ;;  %v1374_v50 = vadd.f32 %v1371_v48, %v1366_v47 }
 0x68b   :  { %v1375_v52 = vpack.c.bf16 %v1374_v50, %v1373_v49 }
 0x68d   :  { %2554 = vmatmul.mubr.msk.bf16.vlgmr.msra.gmra.mrb[20].mxu1 %vm702_vm2, %v1375_v52 }
 0x68e   :  { %2584 = vmatpush3.bf16.msra.mxu1 %v2812_v51  ;;  %2591 = vmatprep.mubr.msk.bf16.mxu1 %vm2825_vm1, %v2824_v45  ;;  %v1844_v51 = vld [vmem:[%s3326_s11] sm:$0x1] }
 0x68f   :  { %2585 = vmatprep.subr.bf16.mxu1 %v2824_v45 }
 0x692   :  { %2586 = vmatpush3.bf16.msra.mxu1 %v2813_v53 }
 0x693   :  { %2587 = vmatprep.subr.bf16.mxu1 %v2824_v45 }
 0x696   :  { %2588 = vmatpush3.bf16.msra.mxu1 %v2814_v54  ;;  %v1845_v54 = vld [vmem:[%s3327_s12] sm:$0x1] }
 0x697   :  { %2589 = vmatprep.subr.bf16.mxu1 %v2824_v45 }
 0x69a   :  { %2590 = vmatpush3.bf16.msra.mxu1 %v2815_v55 }
 0x69b   :  { %2721 = vmatprep.subr.bf16.mxu1 %v3123_v27 }
 0x69d   :  { %2592 = vmatmul.mubr.msk.bf16.vlgmr.msra.gmra.mrb[24].mxu1 %vm702_vm2, %v1375_v52 }
 0x69e   :  { %2723 = vmatpush3.bf16.msra.mxu1 %v3123_v27 }
 0x69f   :  { %2725 = vmatprep.subr.bf16.mxu1 %v3128_v29 }
 0x6a2   :  { %2727 = vmatpush3.bf16.msra.mxu1 %v3128_v29 }
 0x6a3   :  { %2729 = vmatprep.subr.bf16.mxu1 %v3151_v40 }
 0x6a6   :  { %2731 = vmatpush3.bf16.msra.mxu1 %v3151_v40 }
 0x6a7   :  { %2733 = vmatprep.subr.bf16.mxu1 %v3163_v43 }
 0x6aa   :  { %2735 = vmatpush3.bf16.msra.mxu1 %v3163_v43 }
 0x760   :  { %v1446_v56 = vpop.f32.mrb[20].mxu1 }
 0x761   :  { %v2555_v57 = vpop.f32.mrb[21].mxu1 }
 0x762   :  { %v1449_v58 = vpop.f32.mrb[22].mxu1 }
 0x763   :  { %v2708_v59 = vpack.c.bf16 %v1449_v58, %v1446_v56  ;;  %v2556_v60 = vpop.f32.mrb[23].mxu1 }
 0x765   :  { %2709 = vmatprep.subr.bf16.mxu0 %v2708_v59 }
 0x766   :  { %2711 = vmatpush3.bf16.msra.mxu0 %v2708_v59 }
 0x767   :  { %2564 = vmatprep.subr.bf16.mxu0 %v2824_v45 }
 0x769   :  { %2562 = vmatmul.mubr.msk.f32.vlgmr.msra.gmra.mrb[16].mxu0 %vm749_vm3, %v3070_v16 }
 0x76a   :  { %2565 = vmatpush3.bf16.msra.mxu0 %v2816_v61  ;;  %2572 = vmatprep.mubr.msk.bf16.mxu0 %vm2825_vm1, %v2824_v45 }
 0x76b   :  { %2566 = vmatprep.subr.bf16.mxu0 %v2824_v45 }
 0x76e   :  { %2567 = vmatpush3.bf16.msra.mxu0 %v2817_v62 }
 0x76f   :  { %2568 = vmatprep.subr.bf16.mxu0 %v2824_v45 }
 0x770   :  { %v1754_v0 = vpop.f32.mrb[24].mxu1 }
 0x771   :  { %v2593_v1 = vpop.f32.mrb[25].mxu1 }
 0x772   :  { %v1757_v16 = vpop.f32.mrb[26].mxu1  ;;  %2569 = vmatpush3.bf16.msra.mxu0 %v2818_v63 }
 0x773   :  { %v2716_v3 = vpack.c.bf16 %v1757_v16, %v1754_v0  ;;  %v2594_v4 = vpop.f32.mrb[27].mxu1  ;;  %2570 = vmatprep.subr.bf16.mxu0 %v2824_v45  ;;  %v2180_v45 = vld [vmem:[%s3325_s10] ss:$0 sm:$0xff] }
 0x776   :  { %2571 = vmatpush3.bf16.msra.mxu0 %v2819_v2 }
 0x779   :  { %2573 = vmatmul.mubr.msk.bf16.vlgmr.msra.gmra.mrb[20].mxu0 %vm702_vm2, %v1375_v52 }
 0x77a   :  { %2580 = vmatprep.mubr.msk.f32.mxu0 %vm749_vm3, %v3096_v21 }
 0x84c   :  { %v1603_v5 = vpop.f32.mrb[20].mxu0 }
 0x84d   :  { %v2574_v6 = vpop.f32.mrb[21].mxu0 }
 0x84e   :  { %v1606_v7 = vpop.f32.mrb[22].mxu0 }
 0x84f   :  { %v2712_v8 = vpack.c.bf16 %v1606_v7, %v1603_v5  ;;  %v2575_v9 = vpop.f32.mrb[23].mxu0 }
 0x851   :  { %2713 = vmatprep.subr.bf16.mxu0 %v2712_v8 }
 0x852   :  { %2715 = vmatpush3.bf16.msra.mxu0 %v2712_v8 }
 0x853   :  { %2717 = vmatprep.subr.bf16.mxu0 %v2716_v3 }
 0x855   :  { %2581 = vmatmul.mubr.msk.f32.vlgmr.msra.gmra.mrb[16].mxu0 %vm749_vm3, %v3103_v22 }
 0x856   :  { %2719 = vmatpush3.bf16.msra.mxu0 %v2716_v3  ;;  %2599 = vmatprep.mubr.msk.f32.mxu0 %vm749_vm3, %v3110_v23 }
 0x857   :  { %2737 = vmatprep.subr.bf16.mxu0 %v3123_v27 }
 0x85d   :  { %2600 = vmatmul.mubr.msk.f32.vlgmr.msra.gmra.mrb[16].mxu0 %vm749_vm3, %v3137_v37 }
 0x85e   :  { %2739 = vmatpush3.bf16.msra.mxu0 %v3123_v27 }
 0x85f   :  { %2741 = vmatprep.subr.bf16.mxu0 %v3128_v29 }
 0x862   :  { %2743 = vmatpush3.bf16.msra.mxu0 %v3128_v29 }
 0x863   :  { %2745 = vmatprep.subr.bf16.mxu0 %v3151_v40 }
 0x866   :  { %2747 = vmatpush3.bf16.msra.mxu0 %v3151_v40 }
 0x867   :  { %2749 = vmatprep.subr.bf16.mxu0 %v3163_v43 }
 0x86a   :  { %2751 = vmatpush3.bf16.msra.mxu0 %v3163_v43 }
 0x930   :  { %v2601_v21 = vpop.f32.mrb[16].mxu0 }
 0x931   :  { %v2758_v22 = vadd.f32 %v2601_v21, %v2180_v45  ;;  %v1827_v23 = vpop.f32.mrb[17].mxu0 }
 0x932   :  { %v2759_v27 = vadd.f32 %v2180_v45, %v1827_v23 }
 0x933   :  { %vm1839_vm6 = vcmp.ge.f32.partialorder %v2758_v22, 0.0  ;;  %v1841_v37 = vmul.f32 0.01, %v2758_v22 }
 0x934   :  { %vm1838_vm7 = vcmp.ge.f32.partialorder %v2759_v27, 0.0  ;;  %v1840_v29 = vmul.f32 0.01, %v2759_v27 }
 0x935   :  { %v1843_v10 = vsel %vm1839_vm6, %v2758_v22, %v1841_v37 }
 0x936   :  { %v1842_v11 = vsel %vm1838_vm7, %v2759_v27, %v1840_v29  ;;  %v1937_v12 = vmul.f32 %v1843_v10, %v1843_v10 }
 0x937   :  { %2618 = vmatprep.mubr.msk.f32.mxu1 %vm702_vm2, %v1842_v11  ;;  %v1936_v40 = vmul.f32 %v1842_v11, %v1842_v11 }
 0x938   :  { %2619 = vmatmul.mubr.msk.f32.vlgmr.msra.gmra.mrb[18].mxu1 %vm702_vm2, %v1843_v10 }
 0x939   :  { %2637 = vmatprep.mubr.msk.f32.mxu0 %vm702_vm2, %v1936_v40 }
 0x93a   :  { %2638 = vmatmul.mubr.msk.f32.vlgmr.msra.gmra.mrb[18].mxu0 %vm702_vm2, %v1937_v12 }
 0xa0b   :  { %v2620_v43 = vpop.f32.mrb[18].mxu1 }
 0xa0c   :  { %v1928_v13 = vsel %vm702_vm2, %v2620_v43, 0.0  ;;  %v1918_v14 = vpop.f32.mrb[19].mxu1 }
 0xa0d   :  { %v1927_v15 = vsel %vm702_vm2, %v1918_v14, 0.0  ;;  %v2639_v17 = vpop.f32.mrb[18].mxu0 }
 0xa0e   :  { %v1929_v18 = vadd.f32 %v1928_v13, %v1927_v15  ;;  %v2020_v19 = vsel %vm702_vm2, %v2639_v17, 0.0  ;;  %v2010_v20 = vpop.f32.mrb[19].mxu0 }
 0xa0f   :  { %v2019_v24 = vsel %vm702_vm2, %v2010_v20, 0.0 }
 0xa10   :  { %v1930_v25 = vrot.slane %v1929_v18, 4  ;;  %v2021_v26 = vadd.f32 %v2020_v19, %v2019_v24 }
 0xa12   :  { %v1931_v28 = vadd.f32 %v1930_v25, %v1929_v18  ;;  %v2022_v30 = vrot.slane %v2021_v26, 4 }
 0xa14   :  { %v1932_v31 = vrot.slane %v1931_v28, 2  ;;  %v2023_v32 = vadd.f32 %v2022_v30, %v2021_v26 }
 0xa16   :  { %v1933_v33 = vadd.f32 %v1932_v31, %v1931_v28  ;;  %v2024_v34 = vrot.slane %v2023_v32, 2 }
 0xa18   :  { %v1934_v36 = vrot.slane %v1933_v33, 1  ;;  %v2025_v38 = vadd.f32 %v2024_v34, %v2023_v32 }
 0xa1a   :  { %v1935_v39 = vadd.f32 %v1934_v36, %v1933_v33  ;;  %v2026_v41 = vrot.slane %v2025_v38, 1 }
 0xa1c   :  { %v2028_v42 = vmul.f32 0.0078125, %v1935_v39  ;;  %v2027_v44 = vadd.f32 %v2026_v41, %v2025_v38 }
 0xa1e   :  { %v2030_v46 = vmul.f32 %v2028_v42, %v2028_v42  ;;  %v2029_v47 = vmul.f32 0.0078125, %v2027_v44 }
 0xa20   :  { %v2031_v48 = vsub.f32 %v2029_v47, %v2030_v46 }
 0xa22   :  { %v2032_v49 = vmax.f32 %v2031_v48, 0.0 }
 0xa24   :  { %v2033_v50 = vadd.f32 1e-05, %v2032_v49 }
 0xa26   :  { %2822 = vrsqrt.f32 %v2033_v50 }
 0xa30   :  { %v2823_v52 = vpop.eup %2822 }
 0xa31   :  { %v2035_v53 = vmul.f32 %v2823_v52, %v1844_v51 }
 0xa33   :  { %v2036_v55 = vmul.f32 %v2035_v53, %v2028_v42  ;;  %v2042_v56 = vrot.slane %v2035_v53, %v3214_v35 }
 0xa35   :  { %v2037_v57 = vsub.f32 %v1845_v54, %v2036_v55  ;;  %v2044_v58 = vmul.f32 %v2042_v56, %v1842_v11  ;;  %v2045_v59 = vmul.f32 %v2042_v56, %v1843_v10 }
 0xa37   :  { %v2050_v60 = vrot.slane %v2037_v57, %v3214_v35 }
 0xa39   :  { %v2052_v61 = vadd.f32 %v2050_v60, %v2044_v58  ;;  %v2053_v62 = vadd.f32 %v2050_v60, %v2045_v59 }
 0xa3b   :  { %2054 = vst.msk [vmem:[%s3328_s14] sm:$0xff] %vm702_vm2, %v2052_v61  ;;  %2055 = vst.msk [vmem:[%s3328_s14 + $0x8] sm:$0xff] %vm702_vm2, %v2053_v62 }

</bundles_post_ra>
